<compile_context>
chip_gen: v7x
topology: tpu7x:2x2x1
jax: 0.10.0
libtpu: 0.0.40
codegen_flags: <defaults>
</compile_context>

<pallas_src>
import functools
import inspect

import jax
import jax.numpy as jnp
from jax import lax
from jax.experimental import pallas as pl
from jax.experimental.pallas import tpu as pltpu

BN_EPS = 1e-5
_TM_MAX = 512            # rows per M tile in the 1x1/matmul path (multiple of 8)
_TN_MAX = 512            # Cout tile in the 1x1/matmul path
_MAX_STAGE_ROWS = 1024   # cap on rows of the (rows, K) staging tile per program

_HAS_PIPELINE_MODE = (
    hasattr(pl, "Buffered")
    and "pipeline_mode" in inspect.signature(pl.BlockSpec).parameters)


def _round_up(n, m):
    return ((n + m - 1) // m) * m


def _phys(c):
    """Physical channel width carried for a c-channel activation: 64-channel
    tensors are zero-padded to 128 so their stores and downstream tap loads
    are lane-dense (full 128-lane vregs instead of masked vst.msk)."""
    return max(c, 128)


@functools.lru_cache(maxsize=None)
def _vmem_limit_bytes():
    """Generation-dependent scoped-VMEM limit: ~half of physical, i.e. 64 MiB
    on v5e/v6e (128 MiB physical) and 32 MiB on v7x (64 MiB physical)."""
    try:
        cap = int(pltpu.get_tpu_info().vmem_capacity_bytes)
    except Exception:                           # conservative fallback
        cap = 128 * 1024 * 1024
    return int(min(96 * 2 ** 20, max(32 * 2 ** 20, cap // 2)))


@functools.lru_cache(maxsize=None)
def _cparams(n_axes):
    return pltpu.CompilerParams(
        dimension_semantics=("parallel",) * n_axes,
        vmem_limit_bytes=_vmem_limit_bytes())


def _block_spec(shape, index_map, single_buffered=False):
    """BlockSpec; constant-index operands are single-buffered so multi-MB
    resident weight slabs are not pointlessly double-buffered in VMEM."""
    if single_buffered and _HAS_PIPELINE_MODE:
        return pl.BlockSpec(shape, index_map, pipeline_mode=pl.Buffered(1))
    return pl.BlockSpec(shape, index_map)


# ----------------------------- Pallas kernels ------------------------------

def _mm_bias_kernel(x_ref, w_ref, b_ref, o_ref, *, relu):
    """o = act(x @ w + b); bf16 inputs, f32 MXU accumulation / epilogue."""
    y = jnp.dot(x_ref[...], w_ref[...], preferred_element_type=jnp.float32)
    y = y + b_ref[...]
    if relu:
        y = jnp.maximum(y, 0.0)
    o_ref[...] = y.astype(o_ref.dtype)


def _mm_bias_res_relu_kernel(x_ref, w_ref, b_ref, r_ref, o_ref):
    """o = relu(x @ w + b + residual) -- bottleneck tail (1x1 conv3)."""
    y = jnp.dot(x_ref[...], w_ref[...], preferred_element_type=jnp.float32)
    y = y + b_ref[...] + r_ref[...].astype(jnp.float32)
    o_ref[...] = jnp.maximum(y, 0.0).astype(o_ref.dtype)


def _conv_taps_kernel(x_ref, w_ref, b_ref, o_ref, stage_ref, *, tr, wo, taps, relu):
    """VALID spatial conv for one (image, output-row band):
      1. gather the shifted taps of the band into the (tr*wo, K) VMEM staging
         tile (in-VMEM im2col -- the HBM activation is read exactly once),
      2. one MXU matmul over the full K with bias/ReLU fused in f32.
    Only valid output rows/columns are ever computed (no padded-row waste)."""
    y0 = pl.program_id(1) * tr

    def gather_row(t, carry):
        col = 0
        for du, dv, cs, cl in taps:                   # static tap list
            stage_ref[pl.ds(t * wo, wo), col:col + cl] = (
                x_ref[0, pl.ds(y0 + t + du, 1), dv:dv + wo, cs:cs + cl][0])
            col += cl
        return carry

    lax.fori_loop(0, tr, gather_row, 0, unroll=tr <= 8)
    y = jnp.dot(stage_ref[...], w_ref[...], preferred_element_type=jnp.float32)
    y = y + b_ref[...]
    if relu:
        y = jnp.maximum(y, 0.0)
    o_ref[0] = y.astype(o_ref.dtype)


# ------------------------------ kernel wrappers -----------------------------

def mm_bias_act(x2d, w2d, bias, *, relu, residual=None):
    """y[M, Cout] = act(x2d[M, K] @ w2d[K, Cout] + bias (+ residual)).
    Grid over (M tiles, Cout tiles)."""
    M, K = x2d.shape
    Cout = w2d.shape[1]
    TM = min(_TM_MAX, _round_up(M, 8))
    Mp = _round_up(M, TM)
    if Mp != M:
        x2d = jnp.pad(x2d, ((0, Mp - M), (0, 0)))
        if residual is not None:
            residual = jnp.pad(residual, ((0, Mp - M), (0, 0)))
    nm = Mp // TM
    TN = min(_TN_MAX, Cout)
    if nm * (Cout // TN) < 2 and Cout >= 256:
        TN = Cout // 2                 # always >=2 programs for small-M late layers
    nn = Cout // TN
    b2d = bias.reshape(1, Cout)

    x_spec = _block_spec((TM, K), lambda i, j: (i, 0), single_buffered=nm == 1)
    w_spec = _block_spec((K, TN), lambda i, j: (0, j), single_buffered=nn == 1)
    b_spec = _block_spec((1, TN), lambda i, j: (0, j), single_buffered=nn == 1)
    o_spec = pl.BlockSpec((TM, TN), lambda i, j: (i, j))
    out_shape = jax.ShapeDtypeStruct((Mp, Cout), jnp.bfloat16)

    if residual is None:
        y = pl.pallas_call(
            functools.partial(_mm_bias_kernel, relu=relu),
            out_shape=out_shape, grid=(nm, nn),
            in_specs=[x_spec, w_spec, b_spec], out_specs=o_spec,
            compiler_params=_cparams(2),
        )(x2d, w2d, b2d)
    else:
        r_spec = pl.BlockSpec((TM, TN), lambda i, j: (i, j))
        y = pl.pallas_call(
            _mm_bias_res_relu_kernel,
            out_shape=out_shape, grid=(nm, nn),
            in_specs=[x_spec, w_spec, b_spec, r_spec], out_specs=o_spec,
            compiler_params=_cparams(2),
        )(x2d, w2d, b2d, residual)
    return y[:M] if Mp != M else y


def _pick_band_rows(ho, wo):
    """Largest per-program output-row band s.t. the staging tile stays small;
    the band's flat row count must be a multiple of 8 (or the whole image)."""
    if ho * wo <= _MAX_STAGE_ROWS:
        return ho
    for tr in range(ho - 1, 0, -1):
        if ho % tr == 0 and tr * wo <= _MAX_STAGE_ROWS and (tr * wo) % 8 == 0:
            return tr
    return ho


def conv_taps(x, p, *, relu):
    """VALID conv via the tap-gather kernel.  x: (N, Hi, Wi, C) bf16 NHWC."""
    N, Hi, Wi, C = x.shape
    w2d, bias, taps = p["w"], p["bias"], p["taps"]
    kh, kw = p["kh"], p["kw"]
    K, Cout = w2d.shape
    assert sum(t[3] for t in taps) == K
    Ho, Wo = Hi - kh + 1, Wi - kw + 1
    TR = _pick_band_rows(Ho, Wo)
    nb = Ho // TR

    out = pl.pallas_call(
        functools.partial(_conv_taps_kernel, tr=TR, wo=Wo, taps=taps, relu=relu),
        out_shape=jax.ShapeDtypeStruct((N, Ho * Wo, Cout), jnp.bfloat16),
        grid=(N, nb),
        in_specs=[
            # Only this image's padded activation is resident (double-buffered
            # across images so the next image's DMA overlaps compute).
            pl.BlockSpec((1, Hi, Wi, C), lambda n, j: (n, 0, 0, 0)),
            _block_spec((K, Cout), lambda n, j: (0, 0), single_buffered=True),
            _block_spec((1, Cout), lambda n, j: (0, 0), single_buffered=True),
        ],
        out_specs=pl.BlockSpec((1, TR * Wo, Cout), lambda n, j: (n, j, 0)),
        scratch_shapes=[pltpu.VMEM((TR * Wo, K), jnp.bfloat16)],
        compiler_params=_cparams(2),
    )(x, w2d, bias.reshape(1, Cout))
    return out.reshape(N, Ho, Wo, Cout)


def _space_to_depth2(x):
    """(N, H, W, C) -> (N, ceil(H/2), ceil(W/2), 4C), channel order (py,px,c)."""
    N, H, W, C = x.shape
    He, We = _round_up(H, 2), _round_up(W, 2)
    if (He, We) != (H, W):
        x = jnp.pad(x, ((0, 0), (0, He - H), (0, We - W), (0, 0)))
    x = x.reshape(N, He // 2, 2, We // 2, 2, C)
    x = x.transpose(0, 1, 3, 2, 4, 5)
    return x.reshape(N, He // 2, We // 2, 4 * C)


def conv_spatial_bn(x, p, *, relu):
    """Spatial conv + folded BN (+ReLU).  Stride-2 convs are lowered to a
    stride-1 VALID conv over a space-to-depth(2) transform (no HBM im2col)."""
    pad = p["pad"]
    x = jnp.pad(x, ((0, 0), (pad, pad), (pad, pad), (0, 0)))
    if p["s2d"]:
        x = _space_to_depth2(x)
    return conv_taps(x, p, relu=relu)


def conv1x1_bn(x, p, *, relu, stride=1, residual=None):
    """1x1 conv + folded BN; im2col is a pure reshape."""
    if stride != 1:
        x = x[:, ::stride, ::stride, :]
    N, Ho, Wo, C = x.shape
    Cout = p["w"].shape[1]
    res = None if residual is None else residual.reshape(N * Ho * Wo, Cout)
    y = mm_bias_act(x.reshape(N * Ho * Wo, C), p["w"], p["bias"],
                    relu=relu, residual=res)
    return y.reshape(N, Ho, Wo, Cout)


def maxpool_3x3_s2_p1(x):
    """nn.MaxPool2d(3, stride=2, padding=1) on NHWC as a 9-way jnp.maximum
    tree.  Kept in XLA on purpose: it fuses into one pass; a Pallas kernel
    here only added launch overhead plus extra HBM traffic."""
    N, H, W, C = x.shape
    Ho = (H + 2 - 3) // 2 + 1
    Wo = (W + 2 - 3) // 2 + 1
    xp = jnp.pad(x, ((0, 0), (1, 1), (1, 1), (0, 0)), constant_values=-jnp.inf)
    out = None
    for dy in range(3):
        for dx in range(3):
            v = xp[:, dy:dy + (Ho - 1) * 2 + 1:2, dx:dx + (Wo - 1) * 2 + 1:2, :]
            out = v if out is None else jnp.maximum(out, v)
    return out


def bottleneck(x, bp):
    """torchvision ResNet-50 Bottleneck (stride applied on the 3x3 conv2)."""
    out = conv1x1_bn(x, bp["conv1"], relu=True)
    out = conv_spatial_bn(out, bp["conv2"], relu=True)
    if "down" in bp:
        identity = conv1x1_bn(x, bp["down"], stride=bp["stride"], relu=False)
    else:
        identity = x
    return conv1x1_bn(out, bp["conv3"], relu=False, residual=identity)


# --------------------------- parameter generation --------------------------

def make_conv_bn(key, cout, cin, kh, kw):
    """Random conv weight + eval-mode BN, BN scale folded into the bf16 taps.
    Returns {"w": (kh*kw, cin, cout) bf16, "bias": (cout,) f32}."""
    kw_key, g_key, b_key, m_key, v_key = jax.random.split(key, 5)
    fan_in = cin * kh * kw
    w = jax.random.normal(kw_key, (cout, cin, kh, kw), jnp.float32)
    w = w * jnp.sqrt(2.0 / fan_in)
    gamma = 1.0 + 0.1 * jax.random.normal(g_key, (cout,), jnp.float32)
    beta = 0.1 * jax.random.normal(b_key, (cout,), jnp.float32)
    rmean = 0.1 * jax.random.normal(m_key, (cout,), jnp.float32)
    rvar = 1.0 + 0.1 * jax.random.uniform(v_key, (cout,), jnp.float32)
    scale = gamma / jnp.sqrt(rvar + BN_EPS)
    bias = beta - rmean * scale
    w_taps = jnp.transpose(w, (2, 3, 1, 0)).reshape(kh * kw, cin, cout)
    w_taps = (w_taps * scale[None, None, :]).astype(jnp.bfloat16)
    return {"w": w_taps, "bias": bias}


def _pad_channels(w_taps, bias, cin_phys, cout_phys):
    """Zero-pad Cin/Cout so 64-channel activations are carried as lane-dense
    128-channel tensors (the padded lanes stay exactly zero)."""
    k2, cin, cout = w_taps.shape
    if cin_phys == cin and cout_phys == cout:
        return w_taps, bias
    w = jnp.zeros((k2, cin_phys, cout_phys), w_taps.dtype)
    w = w.at[:, :cin, :cout].set(w_taps)
    b = jnp.zeros((cout_phys,), bias.dtype).at[:cout].set(bias)
    return w, b


def _s2d_taps_weight(w_taps, kh, kw):
    """Rearrange stride-2 conv taps into the tap grid of the equivalent
    stride-1 conv over the space-to-depth(2) input:
    (ceil(kh/2)*ceil(kw/2), 4*cin, cout), channel order (py, px, c)."""
    k2, cin, cout = w_taps.shape
    kh2, kw2 = (kh + 1) // 2, (kw + 1) // 2
    wn = jnp.zeros((kh2 * kw2, 4 * cin, cout), w_taps.dtype)
    for du in range(kh2):
        for dv in range(kw2):
            for py in range(2):
                for px in range(2):
                    dy, dx = 2 * du + py, 2 * dv + px
                    if dy < kh and dx < kw:
                        ph = py * 2 + px
                        wn = wn.at[du * kw2 + dv,
                                   ph * cin:(ph + 1) * cin, :].set(w_taps[dy * kw + dx])
    return wn


def _make_1x1(key, cout, cin, cin_phys, cout_phys):
    p = make_conv_bn(key, cout, cin, 1, 1)
    w, b = _pad_channels(p["w"], p["bias"], cin_phys, cout_phys)
    return {"w": w[0], "bias": b}


def _make_spatial(key, cout, cin, cin_phys, cout_phys, k, stride):
    p = make_conv_bn(key, cout, cin, k, k)
    w, b = _pad_channels(p["w"], p["bias"], cin_phys, cout_phys)
    if stride == 1:
        taps = tuple((du, dv, 0, cin_phys) for du in range(k) for dv in range(k))
        return {"w": w.reshape(k * k * cin_phys, cout_phys), "bias": b,
                "kh": k, "kw": k, "taps": taps, "pad": k // 2, "s2d": False}
    assert stride == 2
    kh2 = (k + 1) // 2
    if cin_phys % 128 == 0:
        # One tap per original (dy, dx): each reads one phase's lane-aligned
        # channel block of the s2d input -- exact, no extra MXU work.
        taps = tuple((dy // 2, dx // 2,
                      ((dy % 2) * 2 + (dx % 2)) * cin_phys, cin_phys)
                     for dy in range(k) for dx in range(k))
        w2d = w.reshape(k * k * cin_phys, cout_phys)
    else:
        # Narrow-channel stem conv (cin=4): full 2x2-phase tap grid with a
        # zero-padded weight so every slab is a contiguous full-channel read.
        taps = tuple((du, dv, 0, 4 * cin_phys)
                     for du in range(kh2) for dv in range(kh2))
        w2d = _s2d_taps_weight(w, k, k).reshape(kh2 * kh2 * 4 * cin_phys, cout_phys)
    return {"w": w2d, "bias": b, "kh": kh2, "kw": kh2, "taps": taps,
            "pad": k // 2, "s2d": True}


def build_params(key, in_channels=4):
    counter = [0]

    def nk():
        counter[0] += 1
        return jax.random.fold_in(key, counter[0])

    params = {"conv1": _make_spatial(nk(), 64, in_channels, in_channels,
                                     _phys(64), 7, 2)}
    cfg = [(64, 3, 1), (128, 4, 2), (256, 6, 2), (512, 3, 2)]   # ResNet-50
    inplanes = 64
    layers = []
    for planes, blocks, stride in cfg:
        layer = []
        for b in range(blocks):
            s = stride if b == 0 else 1
            bp = {
                "stride": s,
                "conv1": _make_1x1(nk(), planes, inplanes,
                                   _phys(inplanes), _phys(planes)),
                "conv2": _make_spatial(nk(), planes, planes,
                                       _phys(planes), _phys(planes), 3, s),
                "conv3": _make_1x1(nk(), planes * 4, planes,
                                   _phys(planes), _phys(planes * 4)),
            }
            if b == 0:
                bp["down"] = _make_1x1(nk(), planes * 4, inplanes,
                                       _phys(inplanes), _phys(planes * 4))
            inplanes = planes * 4
            layer.append(bp)
        layers.append(layer)
    params["layers"] = layers
    return params


# --------------------------------- forward ---------------------------------

def unet_encoder_forward(x_nchw, params):
    """Mirrors UNetEncoder.forward: returns (layer4_out, [skip1..skip4]) NCHW f32."""
    x = jnp.transpose(x_nchw, (0, 2, 3, 1)).astype(jnp.bfloat16)   # NCHW -> NHWC
    x = conv_spatial_bn(x, params["conv1"], relu=True)             # conv1+bn1+relu
    skips = [(x, 64)]                                              # skip1 (64 of 128 phys)
    x = maxpool_3x3_s2_p1(x)                                       # maxpool
    for li, layer in enumerate(params["layers"]):                  # layer1..layer4
        for bp in layer:
            x = bottleneck(x, bp)
        if li < 3:
            skips.append((x, x.shape[-1]))                         # skip2..skip4

    def to_nchw(t, c):
        return jnp.transpose(t[..., :c], (0, 3, 1, 2)).astype(jnp.float32)

    return to_nchw(x, x.shape[-1]), [to_nchw(t, c) for t, c in skips]


if __name__ == "__main__":
    key = jax.random.PRNGKey(0)
    pkey, xkey = jax.random.split(key)
    params = build_params(pkey, in_channels=4)
    x = jax.random.normal(xkey, (2, 4, 16, 16), jnp.float32)

    out, skips = unet_encoder_forward(x, params)
    out = jax.block_until_ready(out)
    skips = [jax.block_until_ready(s) for s in skips]

    assert out.shape == (2, 2048, 1, 1), out.shape
    expected_skips = [(2, 64, 8, 8), (2, 256, 4, 4), (2, 512, 2, 2),
                      (2, 1024, 1, 1)]
    assert [s.shape for s in skips] == expected_skips, [s.shape for s in skips]
    assert bool(jnp.all(jnp.isfinite(out)))
    print("KERNEL_OK")
</pallas_src>

<mosaic_0001>
module attributes {stable_mosaic.version = 11 : i64} {
  func.func @_conv_taps_kernel(%arg0: i32, %arg1: i32, %arg2: memref<1x11x11x16xbf16, #tpu.memory_space<vmem>>, %arg3: memref<256x128xbf16, #tpu.memory_space<vmem>>, %arg4: memref<1x128xf32, #tpu.memory_space<vmem>>, %arg5: memref<1x64x128xbf16, #tpu.memory_space<vmem>>, %arg6: memref<64x256xbf16, #tpu.memory_space<vmem>>) attributes {dimension_semantics = [#tpu.dimension_semantics<parallel>, #tpu.dimension_semantics<parallel>], iteration_bounds = array<i64: 2, 1>, scalar_prefetch = 0 : i64, scratch_operands = 1 : i64, tpu.core_type = #tpu.core_type<tc>, window_params = [{transform_indices = @transform_0, window_bounds = array<i64: 1, 11, 11, 16>}, {pipeline_mode = #tpu.pipeline_mode<synchronous>, transform_indices = @transform_1, window_bounds = array<i64: 256, 128>}, {pipeline_mode = #tpu.pipeline_mode<synchronous>, transform_indices = @transform_2, window_bounds = array<i64: 1, 128>}, {transform_indices = @transform_3, window_bounds = array<i64: 1, 64, 128>}]} {
    %c8_i32 = arith.constant 8 : i32
    %0 = arith.muli %arg1, %c8_i32 : i32
    %c0_i32 = arith.constant 0 : i32
    %1 = arith.addi %0, %c0_i32 : i32
    %c0_i32_0 = arith.constant 0 : i32
    %2 = arith.addi %1, %c0_i32_0 : i32
    %c0 = arith.constant 0 : index
    %3 = arith.index_cast %2 : i32 to index
    %c0_1 = arith.constant 0 : index
    %c0_2 = arith.constant 0 : index
    %4 = vector.load %arg2[%c0, %3, %c0_1, %c0_2] : memref<1x11x11x16xbf16, #tpu.memory_space<vmem>>, vector<1x1x8x16xbf16>
    %5 = vector.shape_cast %4 : vector<1x1x8x16xbf16> to vector<1x8x16xbf16>
    %6 = vector.shape_cast %5 : vector<1x8x16xbf16> to vector<8x16xbf16>
    %c8_i32_3 = arith.constant 8 : i32
    %7 = arith.muli %c0_i32, %c8_i32_3 : i32
    %8 = arith.index_cast %7 : i32 to index
    %c0_4 = arith.constant 0 : index
    %9 = vector.load %arg6[%8, %c0_4] : memref<64x256xbf16, #tpu.memory_space<vmem>>, vector<8x16xbf16>
    tpu.vector_store %arg6[%8, %c0_4], %6 {strides = array<i32>} : memref<64x256xbf16, #tpu.memory_space<vmem>>, vector<8x16xbf16>,
    %10 = arith.addi %0, %c0_i32 : i32
    %c0_i32_5 = arith.constant 0 : i32
    %11 = arith.addi %10, %c0_i32_5 : i32
    %c0_6 = arith.constant 0 : index
    %12 = arith.index_cast %11 : i32 to index
    %c1 = arith.constant 1 : index
    %c0_7 = arith.constant 0 : index
    %13 = vector.load %arg2[%c0_6, %12, %c1, %c0_7] : memref<1x11x11x16xbf16, #tpu.memory_space<vmem>>, vector<1x1x8x16xbf16>
    %14 = vector.shape_cast %13 : vector<1x1x8x16xbf16> to vector<1x8x16xbf16>
    %15 = vector.shape_cast %14 : vector<1x8x16xbf16> to vector<8x16xbf16>
    %c8_i32_8 = arith.constant 8 : i32
    %16 = arith.muli %c0_i32, %c8_i32_8 : i32
    %17 = arith.index_cast %16 : i32 to index
    %c16 = arith.constant 16 : index
    %18 = vector.load %arg6[%17, %c16] : memref<64x256xbf16, #tpu.memory_space<vmem>>, vector<8x16xbf16>
    tpu.vector_store %arg6[%17, %c16], %15 {strides = array<i32>} : memref<64x256xbf16, #tpu.memory_space<vmem>>, vector<8x16xbf16>,
    %19 = arith.addi %0, %c0_i32 : i32
    %c0_i32_9 = arith.constant 0 : i32
    %20 = arith.addi %19, %c0_i32_9 : i32
    %c0_10 = arith.constant 0 : index
    %21 = arith.index_cast %20 : i32 to index
    %c2 = arith.constant 2 : index
    %c0_11 = arith.constant 0 : index
    %22 = vector.load %arg2[%c0_10, %21, %c2, %c0_11] : memref<1x11x11x16xbf16, #tpu.memory_space<vmem>>, vector<1x1x8x16xbf16>
    %23 = vector.shape_cast %22 : vector<1x1x8x16xbf16> to vector<1x8x16xbf16>
    %24 = vector.shape_cast %23 : vector<1x8x16xbf16> to vector<8x16xbf16>
    %c8_i32_12 = arith.constant 8 : i32
    %25 = arith.muli %c0_i32, %c8_i32_12 : i32
    %26 = arith.index_cast %25 : i32 to index
    %c32 = arith.constant 32 : index
    %27 = vector.load %arg6[%26, %c32] : memref<64x256xbf16, #tpu.memory_space<vmem>>, vector<8x16xbf16>
    tpu.vector_store %arg6[%26, %c32], %24 {strides = array<i32>} : memref<64x256xbf16, #tpu.memory_space<vmem>>, vector<8x16xbf16>,
    %28 = arith.addi %0, %c0_i32 : i32
    %c0_i32_13 = arith.constant 0 : i32
    %29 = arith.addi %28, %c0_i32_13 : i32
    %c0_14 = arith.constant 0 : index
    %30 = arith.index_cast %29 : i32 to index
    %c3 = arith.constant 3 : index
    %c0_15 = arith.constant 0 : index
    %31 = vector.load %arg2[%c0_14, %30, %c3, %c0_15] : memref<1x11x11x16xbf16, #tpu.memory_space<vmem>>, vector<1x1x8x16xbf16>
    %32 = vector.shape_cast %31 : vector<1x1x8x16xbf16> to vector<1x8x16xbf16>
    %33 = vector.shape_cast %32 : vector<1x8x16xbf16> to vector<8x16xbf16>
    %c8_i32_16 = arith.constant 8 : i32
    %34 = arith.muli %c0_i32, %c8_i32_16 : i32
    %35 = arith.index_cast %34 : i32 to index
    %c48 = arith.constant 48 : index
    %36 = vector.load %arg6[%35, %c48] : memref<64x256xbf16, #tpu.memory_space<vmem>>, vector<8x16xbf16>
    tpu.vector_store %arg6[%35, %c48], %33 {strides = array<i32>} : memref<64x256xbf16, #tpu.memory_space<vmem>>, vector<8x16xbf16>,
    %37 = arith.addi %0, %c0_i32 : i32
    %c1_i32 = arith.constant 1 : i32
    %38 = arith.addi %37, %c1_i32 : i32
    %c0_17 = arith.constant 0 : index
    %39 = arith.index_cast %38 : i32 to index
    %c0_18 = arith.constant 0 : index
    %c0_19 = arith.constant 0 : index
    %40 = vector.load %arg2[%c0_17, %39, %c0_18, %c0_19] : memref<1x11x11x16xbf16, #tpu.memory_space<vmem>>, vector<1x1x8x16xbf16>
    %41 = vector.shape_cast %40 : vector<1x1x8x16xbf16> to vector<1x8x16xbf16>
    %42 = vector.shape_cast %41 : vector<1x8x16xbf16> to vector<8x16xbf16>
    %c8_i32_20 = arith.constant 8 : i32
    %43 = arith.muli %c0_i32, %c8_i32_20 : i32
    %44 = arith.index_cast %43 : i32 to index
    %c64 = arith.constant 64 : index
    %45 = vector.load %arg6[%44, %c64] : memref<64x256xbf16, #tpu.memory_space<vmem>>, vector<8x16xbf16>
    tpu.vector_store %arg6[%44, %c64], %42 {strides = array<i32>} : memref<64x256xbf16, #tpu.memory_space<vmem>>, vector<8x16xbf16>,
    %46 = arith.addi %0, %c0_i32 : i32
    %c1_i32_21 = arith.constant 1 : i32
    %47 = arith.addi %46, %c1_i32_21 : i32
    %c0_22 = arith.constant 0 : index
    %48 = arith.index_cast %47 : i32 to index
    %c1_23 = arith.constant 1 : index
    %c0_24 = arith.constant 0 : index
    %49 = vector.load %arg2[%c0_22, %48, %c1_23, %c0_24] : memref<1x11x11x16xbf16, #tpu.memory_space<vmem>>, vector<1x1x8x16xbf16>
    %50 = vector.shape_cast %49 : vector<1x1x8x16xbf16> to vector<1x8x16xbf16>
    %51 = vector.shape_cast %50 : vector<1x8x16xbf16> to vector<8x16xbf16>
    %c8_i32_25 = arith.constant 8 : i32
    %52 = arith.muli %c0_i32, %c8_i32_25 : i32
    %53 = arith.index_cast %52 : i32 to index
    %c80 = arith.constant 80 : index
    %54 = vector.load %arg6[%53, %c80] : memref<64x256xbf16, #tpu.memory_space<vmem>>, vector<8x16xbf16>
    tpu.vector_store %arg6[%53, %c80], %51 {strides = array<i32>} : memref<64x256xbf16, #tpu.memory_space<vmem>>, vector<8x16xbf16>,
    %55 = arith.addi %0, %c0_i32 : i32
    %c1_i32_26 = arith.constant 1 : i32
    %56 = arith.addi %55, %c1_i32_26 : i32
    %c0_27 = arith.constant 0 : index
    %57 = arith.index_cast %56 : i32 to index
    %c2_28 = arith.constant 2 : index
    %c0_29 = arith.constant 0 : index
    %58 = vector.load %arg2[%c0_27, %57, %c2_28, %c0_29] : memref<1x11x11x16xbf16, #tpu.memory_space<vmem>>, vector<1x1x8x16xbf16>
    %59 = vector.shape_cast %58 : vector<1x1x8x16xbf16> to vector<1x8x16xbf16>
    %60 = vector.shape_cast %59 : vector<1x8x16xbf16> to vector<8x16xbf16>
    %c8_i32_30 = arith.constant 8 : i32
    %61 = arith.muli %c0_i32, %c8_i32_30 : i32
    %62 = arith.index_cast %61 : i32 to index
    %c96 = arith.constant 96 : index
    %63 = vector.load %arg6[%62, %c96] : memref<64x256xbf16, #tpu.memory_space<vmem>>, vector<8x16xbf16>
    tpu.vector_store %arg6[%62, %c96], %60 {strides = array<i32>} : memref<64x256xbf16, #tpu.memory_space<vmem>>, vector<8x16xbf16>,
    %64 = arith.addi %0, %c0_i32 : i32
    %c1_i32_31 = arith.constant 1 : i32
    %65 = arith.addi %64, %c1_i32_31 : i32
    %c0_32 = arith.constant 0 : index
    %66 = arith.index_cast %65 : i32 to index
    %c3_33 = arith.constant 3 : index
    %c0_34 = arith.constant 0 : index
    %67 = vector.load %arg2[%c0_32, %66, %c3_33, %c0_34] : memref<1x11x11x16xbf16, #tpu.memory_space<vmem>>, vector<1x1x8x16xbf16>
    %68 = vector.shape_cast %67 : vector<1x1x8x16xbf16> to vector<1x8x16xbf16>
    %69 = vector.shape_cast %68 : vector<1x8x16xbf16> to vector<8x16xbf16>
    %c8_i32_35 = arith.constant 8 : i32
    %70 = arith.muli %c0_i32, %c8_i32_35 : i32
    %71 = arith.index_cast %70 : i32 to index
    %c112 = arith.constant 112 : index
    %72 = vector.load %arg6[%71, %c112] : memref<64x256xbf16, #tpu.memory_space<vmem>>, vector<8x16xbf16>
    tpu.vector_store %arg6[%71, %c112], %69 {strides = array<i32>} : memref<64x256xbf16, #tpu.memory_space<vmem>>, vector<8x16xbf16>,
    %73 = arith.addi %0, %c0_i32 : i32
    %c2_i32 = arith.constant 2 : i32
    %74 = arith.addi %73, %c2_i32 : i32
    %c0_36 = arith.constant 0 : index
    %75 = arith.index_cast %74 : i32 to index
    %c0_37 = arith.constant 0 : index
    %c0_38 = arith.constant 0 : index
    %76 = vector.load %arg2[%c0_36, %75, %c0_37, %c0_38] : memref<1x11x11x16xbf16, #tpu.memory_space<vmem>>, vector<1x1x8x16xbf16>
    %77 = vector.shape_cast %76 : vector<1x1x8x16xbf16> to vector<1x8x16xbf16>
    %78 = vector.shape_cast %77 : vector<1x8x16xbf16> to vector<8x16xbf16>
    %c8_i32_39 = arith.constant 8 : i32
    %79 = arith.muli %c0_i32, %c8_i32_39 : i32
    %80 = arith.index_cast %79 : i32 to index
    %c128 = arith.constant 128 : index
    %81 = vector.load %arg6[%80, %c128] : memref<64x256xbf16, #tpu.memory_space<vmem>>, vector<8x16xbf16>
    tpu.vector_store %arg6[%80, %c128], %78 {strides = array<i32>} : memref<64x256xbf16, #tpu.memory_space<vmem>>, vector<8x16xbf16>,
    %82 = arith.addi %0, %c0_i32 : i32
    %c2_i32_40 = arith.constant 2 : i32
    %83 = arith.addi %82, %c2_i32_40 : i32
    %c0_41 = arith.constant 0 : index
    %84 = arith.index_cast %83 : i32 to index
    %c1_42 = arith.constant 1 : index
    %c0_43 = arith.constant 0 : index
    %85 = vector.load %arg2[%c0_41, %84, %c1_42, %c0_43] : memref<1x11x11x16xbf16, #tpu.memory_space<vmem>>, vector<1x1x8x16xbf16>
    %86 = vector.shape_cast %85 : vector<1x1x8x16xbf16> to vector<1x8x16xbf16>
    %87 = vector.shape_cast %86 : vector<1x8x16xbf16> to vector<8x16xbf16>
    %c8_i32_44 = arith.constant 8 : i32
    %88 = arith.muli %c0_i32, %c8_i32_44 : i32
    %89 = arith.index_cast %88 : i32 to index
    %c144 = arith.constant 144 : index
    %90 = vector.load %arg6[%89, %c144] : memref<64x256xbf16, #tpu.memory_space<vmem>>, vector<8x16xbf16>
    tpu.vector_store %arg6[%89, %c144], %87 {strides = array<i32>} : memref<64x256xbf16, #tpu.memory_space<vmem>>, vector<8x16xbf16>,
    %91 = arith.addi %0, %c0_i32 : i32
    %c2_i32_45 = arith.constant 2 : i32
    %92 = arith.addi %91, %c2_i32_45 : i32
    %c0_46 = arith.constant 0 : index
    %93 = arith.index_cast %92 : i32 to index
    %c2_47 = arith.constant 2 : index
    %c0_48 = arith.constant 0 : index
    %94 = vector.load %arg2[%c0_46, %93, %c2_47, %c0_48] : memref<1x11x11x16xbf16, #tpu.memory_space<vmem>>, vector<1x1x8x16xbf16>
    %95 = vector.shape_cast %94 : vector<1x1x8x16xbf16> to vector<1x8x16xbf16>
    %96 = vector.shape_cast %95 : vector<1x8x16xbf16> to vector<8x16xbf16>
    %c8_i32_49 = arith.constant 8 : i32
    %97 = arith.muli %c0_i32, %c8_i32_49 : i32
    %98 = arith.index_cast %97 : i32 to index
    %c160 = arith.constant 160 : index
    %99 = vector.load %arg6[%98, %c160] : memref<64x256xbf16, #tpu.memory_space<vmem>>, vector<8x16xbf16>
    tpu.vector_store %arg6[%98, %c160], %96 {strides = array<i32>} : memref<64x256xbf16, #tpu.memory_space<vmem>>, vector<8x16xbf16>,
    %100 = arith.addi %0, %c0_i32 : i32
    %c2_i32_50 = arith.constant 2 : i32
    %101 = arith.addi %100, %c2_i32_50 : i32
    %c0_51 = arith.constant 0 : index
    %102 = arith.index_cast %101 : i32 to index
    %c3_52 = arith.constant 3 : index
    %c0_53 = arith.constant 0 : index
    %103 = vector.load %arg2[%c0_51, %102, %c3_52, %c0_53] : memref<1x11x11x16xbf16, #tpu.memory_space<vmem>>, vector<1x1x8x16xbf16>
    %104 = vector.shape_cast %103 : vector<1x1x8x16xbf16> to vector<1x8x16xbf16>
    %105 = vector.shape_cast %104 : vector<1x8x16xbf16> to vector<8x16xbf16>
    %c8_i32_54 = arith.constant 8 : i32
    %106 = arith.muli %c0_i32, %c8_i32_54 : i32
    %107 = arith.index_cast %106 : i32 to index
    %c176 = arith.constant 176 : index
    %108 = vector.load %arg6[%107, %c176] : memref<64x256xbf16, #tpu.memory_space<vmem>>, vector<8x16xbf16>
    tpu.vector_store %arg6[%107, %c176], %105 {strides = array<i32>} : memref<64x256xbf16, #tpu.memory_space<vmem>>, vector<8x16xbf16>,
    %109 = arith.addi %0, %c0_i32 : i32
    %c3_i32 = arith.constant 3 : i32
    %110 = arith.addi %109, %c3_i32 : i32
    %c0_55 = arith.constant 0 : index
    %111 = arith.index_cast %110 : i32 to index
    %c0_56 = arith.constant 0 : index
    %c0_57 = arith.constant 0 : index
    %112 = vector.load %arg2[%c0_55, %111, %c0_56, %c0_57] : memref<1x11x11x16xbf16, #tpu.memory_space<vmem>>, vector<1x1x8x16xbf16>
    %113 = vector.shape_cast %112 : vector<1x1x8x16xbf16> to vector<1x8x16xbf16>
    %114 = vector.shape_cast %113 : vector<1x8x16xbf16> to vector<8x16xbf16>
    %c8_i32_58 = arith.constant 8 : i32
    %115 = arith.muli %c0_i32, %c8_i32_58 : i32
    %116 = arith.index_cast %115 : i32 to index
    %c192 = arith.constant 192 : index
    %117 = vector.load %arg6[%116, %c192] : memref<64x256xbf16, #tpu.memory_space<vmem>>, vector<8x16xbf16>
    tpu.vector_store %arg6[%116, %c192], %114 {strides = array<i32>} : memref<64x256xbf16, #tpu.memory_space<vmem>>, vector<8x16xbf16>,
    %118 = arith.addi %0, %c0_i32 : i32
    %c3_i32_59 = arith.constant 3 : i32
    %119 = arith.addi %118, %c3_i32_59 : i32
    %c0_60 = arith.constant 0 : index
    %120 = arith.index_cast %119 : i32 to index
    %c1_61 = arith.constant 1 : index
    %c0_62 = arith.constant 0 : index
    %121 = vector.load %arg2[%c0_60, %120, %c1_61, %c0_62] : memref<1x11x11x16xbf16, #tpu.memory_space<vmem>>, vector<1x1x8x16xbf16>
    %122 = vector.shape_cast %121 : vector<1x1x8x16xbf16> to vector<1x8x16xbf16>
    %123 = vector.shape_cast %122 : vector<1x8x16xbf16> to vector<8x16xbf16>
    %c8_i32_63 = arith.constant 8 : i32
    %124 = arith.muli %c0_i32, %c8_i32_63 : i32
    %125 = arith.index_cast %124 : i32 to index
    %c208 = arith.constant 208 : index
    %126 = vector.load %arg6[%125, %c208] : memref<64x256xbf16, #tpu.memory_space<vmem>>, vector<8x16xbf16>
    tpu.vector_store %arg6[%125, %c208], %123 {strides = array<i32>} : memref<64x256xbf16, #tpu.memory_space<vmem>>, vector<8x16xbf16>,
    %127 = arith.addi %0, %c0_i32 : i32
    %c3_i32_64 = arith.constant 3 : i32
    %128 = arith.addi %127, %c3_i32_64 : i32
    %c0_65 = arith.constant 0 : index
    %129 = arith.index_cast %128 : i32 to index
    %c2_66 = arith.constant 2 : index
    %c0_67 = arith.constant 0 : index
    %130 = vector.load %arg2[%c0_65, %129, %c2_66, %c0_67] : memref<1x11x11x16xbf16, #tpu.memory_space<vmem>>, vector<1x1x8x16xbf16>
    %131 = vector.shape_cast %130 : vector<1x1x8x16xbf16> to vector<1x8x16xbf16>
    %132 = vector.shape_cast %131 : vector<1x8x16xbf16> to vector<8x16xbf16>
    %c8_i32_68 = arith.constant 8 : i32
    %133 = arith.muli %c0_i32, %c8_i32_68 : i32
    %134 = arith.index_cast %133 : i32 to index
    %c224 = arith.constant 224 : index
    %135 = vector.load %arg6[%134, %c224] : memref<64x256xbf16, #tpu.memory_space<vmem>>, vector<8x16xbf16>
    tpu.vector_store %arg6[%134, %c224], %132 {strides = array<i32>} : memref<64x256xbf16, #tpu.memory_space<vmem>>, vector<8x16xbf16>,
    %136 = arith.addi %0, %c0_i32 : i32
    %c3_i32_69 = arith.constant 3 : i32
    %137 = arith.addi %136, %c3_i32_69 : i32
    %c0_70 = arith.constant 0 : index
    %138 = arith.index_cast %137 : i32 to index
    %c3_71 = arith.constant 3 : index
    %c0_72 = arith.constant 0 : index
    %139 = vector.load %arg2[%c0_70, %138, %c3_71, %c0_72] : memref<1x11x11x16xbf16, #tpu.memory_space<vmem>>, vector<1x1x8x16xbf16>
    %140 = vector.shape_cast %139 : vector<1x1x8x16xbf16> to vector<1x8x16xbf16>
    %141 = vector.shape_cast %140 : vector<1x8x16xbf16> to vector<8x16xbf16>
    %c8_i32_73 = arith.constant 8 : i32
    %142 = arith.muli %c0_i32, %c8_i32_73 : i32
    %143 = arith.index_cast %142 : i32 to index
    %c240 = arith.constant 240 : index
    %144 = vector.load %arg6[%143, %c240] : memref<64x256xbf16, #tpu.memory_space<vmem>>, vector<8x16xbf16>
    tpu.vector_store %arg6[%143, %c240], %141 {strides = array<i32>} : memref<64x256xbf16, #tpu.memory_space<vmem>>, vector<8x16xbf16>,
    %c1_i32_74 = arith.constant 1 : i32
    %145 = arith.addi %0, %c1_i32_74 : i32
    %c0_i32_75 = arith.constant 0 : i32
    %146 = arith.addi %145, %c0_i32_75 : i32
    %c0_76 = arith.constant 0 : index
    %147 = arith.index_cast %146 : i32 to index
    %c0_77 = arith.constant 0 : index
    %c0_78 = arith.constant 0 : index
    %148 = vector.load %arg2[%c0_76, %147, %c0_77, %c0_78] : memref<1x11x11x16xbf16, #tpu.memory_space<vmem>>, vector<1x1x8x16xbf16>
    %149 = vector.shape_cast %148 : vector<1x1x8x16xbf16> to vector<1x8x16xbf16>
    %150 = vector.shape_cast %149 : vector<1x8x16xbf16> to vector<8x16xbf16>
    %c8_i32_79 = arith.constant 8 : i32
    %151 = arith.muli %c1_i32_74, %c8_i32_79 : i32
    %152 = arith.index_cast %151 : i32 to index
    %c0_80 = arith.constant 0 : index
    %153 = vector.load %arg6[%152, %c0_80] : memref<64x256xbf16, #tpu.memory_space<vmem>>, vector<8x16xbf16>
    tpu.vector_store %arg6[%152, %c0_80], %150 {strides = array<i32>} : memref<64x256xbf16, #tpu.memory_space<vmem>>, vector<8x16xbf16>,
    %154 = arith.addi %0, %c1_i32_74 : i32
    %c0_i32_81 = arith.constant 0 : i32
    %155 = arith.addi %154, %c0_i32_81 : i32
    %c0_82 = arith.constant 0 : index
    %156 = arith.index_cast %155 : i32 to index
    %c1_83 = arith.constant 1 : index
    %c0_84 = arith.constant 0 : index
    %157 = vector.load %arg2[%c0_82, %156, %c1_83, %c0_84] : memref<1x11x11x16xbf16, #tpu.memory_space<vmem>>, vector<1x1x8x16xbf16>
    %158 = vector.shape_cast %157 : vector<1x1x8x16xbf16> to vector<1x8x16xbf16>
    %159 = vector.shape_cast %158 : vector<1x8x16xbf16> to vector<8x16xbf16>
    %c8_i32_85 = arith.constant 8 : i32
    %160 = arith.muli %c1_i32_74, %c8_i32_85 : i32
    %161 = arith.index_cast %160 : i32 to index
    %c16_86 = arith.constant 16 : index
    %162 = vector.load %arg6[%161, %c16_86] : memref<64x256xbf16, #tpu.memory_space<vmem>>, vector<8x16xbf16>
    tpu.vector_store %arg6[%161, %c16_86], %159 {strides = array<i32>} : memref<64x256xbf16, #tpu.memory_space<vmem>>, vector<8x16xbf16>,
    %163 = arith.addi %0, %c1_i32_74 : i32
    %c0_i32_87 = arith.constant 0 : i32
    %164 = arith.addi %163, %c0_i32_87 : i32
    %c0_88 = arith.constant 0 : index
    %165 = arith.index_cast %164 : i32 to index
    %c2_89 = arith.constant 2 : index
    %c0_90 = arith.constant 0 : index
    %166 = vector.load %arg2[%c0_88, %165, %c2_89, %c0_90] : memref<1x11x11x16xbf16, #tpu.memory_space<vmem>>, vector<1x1x8x16xbf16>
    %167 = vector.shape_cast %166 : vector<1x1x8x16xbf16> to vector<1x8x16xbf16>
    %168 = vector.shape_cast %167 : vector<1x8x16xbf16> to vector<8x16xbf16>
    %c8_i32_91 = arith.constant 8 : i32
    %169 = arith.muli %c1_i32_74, %c8_i32_91 : i32
    %170 = arith.index_cast %169 : i32 to index
    %c32_92 = arith.constant 32 : index
    %171 = vector.load %arg6[%170, %c32_92] : memref<64x256xbf16, #tpu.memory_space<vmem>>, vector<8x16xbf16>
    tpu.vector_store %arg6[%170, %c32_92], %168 {strides = array<i32>} : memref<64x256xbf16, #tpu.memory_space<vmem>>, vector<8x16xbf16>,
    %172 = arith.addi %0, %c1_i32_74 : i32
    %c0_i32_93 = arith.constant 0 : i32
    %173 = arith.addi %172, %c0_i32_93 : i32
    %c0_94 = arith.constant 0 : index
    %174 = arith.index_cast %173 : i32 to index
    %c3_95 = arith.constant 3 : index
    %c0_96 = arith.constant 0 : index
    %175 = vector.load %arg2[%c0_94, %174, %c3_95, %c0_96] : memref<1x11x11x16xbf16, #tpu.memory_space<vmem>>, vector<1x1x8x16xbf16>
    %176 = vector.shape_cast %175 : vector<1x1x8x16xbf16> to vector<1x8x16xbf16>
    %177 = vector.shape_cast %176 : vector<1x8x16xbf16> to vector<8x16xbf16>
    %c8_i32_97 = arith.constant 8 : i32
    %178 = arith.muli %c1_i32_74, %c8_i32_97 : i32
    %179 = arith.index_cast %178 : i32 to index
    %c48_98 = arith.constant 48 : index
    %180 = vector.load %arg6[%179, %c48_98] : memref<64x256xbf16, #tpu.memory_space<vmem>>, vector<8x16xbf16>
    tpu.vector_store %arg6[%179, %c48_98], %177 {strides = array<i32>} : memref<64x256xbf16, #tpu.memory_space<vmem>>, vector<8x16xbf16>,
    %181 = arith.addi %0, %c1_i32_74 : i32
    %c1_i32_99 = arith.constant 1 : i32
    %182 = arith.addi %181, %c1_i32_99 : i32
    %c0_100 = arith.constant 0 : index
    %183 = arith.index_cast %182 : i32 to index
    %c0_101 = arith.constant 0 : index
    %c0_102 = arith.constant 0 : index
    %184 = vector.load %arg2[%c0_100, %183, %c0_101, %c0_102] : memref<1x11x11x16xbf16, #tpu.memory_space<vmem>>, vector<1x1x8x16xbf16>
    %185 = vector.shape_cast %184 : vector<1x1x8x16xbf16> to vector<1x8x16xbf16>
    %186 = vector.shape_cast %185 : vector<1x8x16xbf16> to vector<8x16xbf16>
    %c8_i32_103 = arith.constant 8 : i32
    %187 = arith.muli %c1_i32_74, %c8_i32_103 : i32
    %188 = arith.index_cast %187 : i32 to index
    %c64_104 = arith.constant 64 : index
    %189 = vector.load %arg6[%188, %c64_104] : memref<64x256xbf16, #tpu.memory_space<vmem>>, vector<8x16xbf16>
    tpu.vector_store %arg6[%188, %c64_104], %186 {strides = array<i32>} : memref<64x256xbf16, #tpu.memory_space<vmem>>, vector<8x16xbf16>,
    %190 = arith.addi %0, %c1_i32_74 : i32
    %c1_i32_105 = arith.constant 1 : i32
    %191 = arith.addi %190, %c1_i32_105 : i32
    %c0_106 = arith.constant 0 : index
    %192 = arith.index_cast %191 : i32 to index
    %c1_107 = arith.constant 1 : index
    %c0_108 = arith.constant 0 : index
    %193 = vector.load %arg2[%c0_106, %192, %c1_107, %c0_108] : memref<1x11x11x16xbf16, #tpu.memory_space<vmem>>, vector<1x1x8x16xbf16>
    %194 = vector.shape_cast %193 : vector<1x1x8x16xbf16> to vector<1x8x16xbf16>
    %195 = vector.shape_cast %194 : vector<1x8x16xbf16> to vector<8x16xbf16>
    %c8_i32_109 = arith.constant 8 : i32
    %196 = arith.muli %c1_i32_74, %c8_i32_109 : i32
    %197 = arith.index_cast %196 : i32 to index
    %c80_110 = arith.constant 80 : index
    %198 = vector.load %arg6[%197, %c80_110] : memref<64x256xbf16, #tpu.memory_space<vmem>>, vector<8x16xbf16>
    tpu.vector_store %arg6[%197, %c80_110], %195 {strides = array<i32>} : memref<64x256xbf16, #tpu.memory_space<vmem>>, vector<8x16xbf16>,
    %199 = arith.addi %0, %c1_i32_74 : i32
    %c1_i32_111 = arith.constant 1 : i32
    %200 = arith.addi %199, %c1_i32_111 : i32
    %c0_112 = arith.constant 0 : index
    %201 = arith.index_cast %200 : i32 to index
    %c2_113 = arith.constant 2 : index
    %c0_114 = arith.constant 0 : index
    %202 = vector.load %arg2[%c0_112, %201, %c2_113, %c0_114] : memref<1x11x11x16xbf16, #tpu.memory_space<vmem>>, vector<1x1x8x16xbf16>
    %203 = vector.shape_cast %202 : vector<1x1x8x16xbf16> to vector<1x8x16xbf16>
    %204 = vector.shape_cast %203 : vector<1x8x16xbf16> to vector<8x16xbf16>
    %c8_i32_115 = arith.constant 8 : i32
    %205 = arith.muli %c1_i32_74, %c8_i32_115 : i32
    %206 = arith.index_cast %205 : i32 to index
    %c96_116 = arith.constant 96 : index
    %207 = vector.load %arg6[%206, %c96_116] : memref<64x256xbf16, #tpu.memory_space<vmem>>, vector<8x16xbf16>
    tpu.vector_store %arg6[%206, %c96_116], %204 {strides = array<i32>} : memref<64x256xbf16, #tpu.memory_space<vmem>>, vector<8x16xbf16>,
    %208 = arith.addi %0, %c1_i32_74 : i32
    %c1_i32_117 = arith.constant 1 : i32
    %209 = arith.addi %208, %c1_i32_117 : i32
    %c0_118 = arith.constant 0 : index
    %210 = arith.index_cast %209 : i32 to index
    %c3_119 = arith.constant 3 : index
    %c0_120 = arith.constant 0 : index
    %211 = vector.load %arg2[%c0_118, %210, %c3_119, %c0_120] : memref<1x11x11x16xbf16, #tpu.memory_space<vmem>>, vector<1x1x8x16xbf16>
    %212 = vector.shape_cast %211 : vector<1x1x8x16xbf16> to vector<1x8x16xbf16>
    %213 = vector.shape_cast %212 : vector<1x8x16xbf16> to vector<8x16xbf16>
    %c8_i32_121 = arith.constant 8 : i32
    %214 = arith.muli %c1_i32_74, %c8_i32_121 : i32
    %215 = arith.index_cast %214 : i32 to index
    %c112_122 = arith.constant 112 : index
    %216 = vector.load %arg6[%215, %c112_122] : memref<64x256xbf16, #tpu.memory_space<vmem>>, vector<8x16xbf16>
    tpu.vector_store %arg6[%215, %c112_122], %213 {strides = array<i32>} : memref<64x256xbf16, #tpu.memory_space<vmem>>, vector<8x16xbf16>,
    %217 = arith.addi %0, %c1_i32_74 : i32
    %c2_i32_123 = arith.constant 2 : i32
    %218 = arith.addi %217, %c2_i32_123 : i32
    %c0_124 = arith.constant 0 : index
    %219 = arith.index_cast %218 : i32 to index
    %c0_125 = arith.constant 0 : index
    %c0_126 = arith.constant 0 : index
    %220 = vector.load %arg2[%c0_124, %219, %c0_125, %c0_126] : memref<1x11x11x16xbf16, #tpu.memory_space<vmem>>, vector<1x1x8x16xbf16>
    %221 = vector.shape_cast %220 : vector<1x1x8x16xbf16> to vector<1x8x16xbf16>
    %222 = vector.shape_cast %221 : vector<1x8x16xbf16> to vector<8x16xbf16>
    %c8_i32_127 = arith.constant 8 : i32
    %223 = arith.muli %c1_i32_74, %c8_i32_127 : i32
    %224 = arith.index_cast %223 : i32 to index
    %c128_128 = arith.constant 128 : index
    %225 = vector.load %arg6[%224, %c128_128] : memref<64x256xbf16, #tpu.memory_space<vmem>>, vector<8x16xbf16>
    tpu.vector_store %arg6[%224, %c128_128], %222 {strides = array<i32>} : memref<64x256xbf16, #tpu.memory_space<vmem>>, vector<8x16xbf16>,
    %226 = arith.addi %0, %c1_i32_74 : i32
    %c2_i32_129 = arith.constant 2 : i32
    %227 = arith.addi %226, %c2_i32_129 : i32
    %c0_130 = arith.constant 0 : index
    %228 = arith.index_cast %227 : i32 to index
    %c1_131 = arith.constant 1 : index
    %c0_132 = arith.constant 0 : index
    %229 = vector.load %arg2[%c0_130, %228, %c1_131, %c0_132] : memref<1x11x11x16xbf16, #tpu.memory_space<vmem>>, vector<1x1x8x16xbf16>
    %230 = vector.shape_cast %229 : vector<1x1x8x16xbf16> to vector<1x8x16xbf16>
    %231 = vector.shape_cast %230 : vector<1x8x16xbf16> to vector<8x16xbf16>
    %c8_i32_133 = arith.constant 8 : i32
    %232 = arith.muli %c1_i32_74, %c8_i32_133 : i32
    %233 = arith.index_cast %232 : i32 to index
    %c144_134 = arith.constant 144 : index
    %234 = vector.load %arg6[%233, %c144_134] : memref<64x256xbf16, #tpu.memory_space<vmem>>, vector<8x16xbf16>
    tpu.vector_store %arg6[%233, %c144_134], %231 {strides = array<i32>} : memref<64x256xbf16, #tpu.memory_space<vmem>>, vector<8x16xbf16>,
    %235 = arith.addi %0, %c1_i32_74 : i32
    %c2_i32_135 = arith.constant 2 : i32
    %236 = arith.addi %235, %c2_i32_135 : i32
    %c0_136 = arith.constant 0 : index
    %237 = arith.index_cast %236 : i32 to index
    %c2_137 = arith.constant 2 : index
    %c0_138 = arith.constant 0 : index
    %238 = vector.load %arg2[%c0_136, %237, %c2_137, %c0_138] : memref<1x11x11x16xbf16, #tpu.memory_space<vmem>>, vector<1x1x8x16xbf16>
    %239 = vector.shape_cast %238 : vector<1x1x8x16xbf16> to vector<1x8x16xbf16>
    %240 = vector.shape_cast %239 : vector<1x8x16xbf16> to vector<8x16xbf16>
    %c8_i32_139 = arith.constant 8 : i32
    %241 = arith.muli %c1_i32_74, %c8_i32_139 : i32
    %242 = arith.index_cast %241 : i32 to index
    %c160_140 = arith.constant 160 : index
    %243 = vector.load %arg6[%242, %c160_140] : memref<64x256xbf16, #tpu.memory_space<vmem>>, vector<8x16xbf16>
    tpu.vector_store %arg6[%242, %c160_140], %240 {strides = array<i32>} : memref<64x256xbf16, #tpu.memory_space<vmem>>, vector<8x16xbf16>,
    %244 = arith.addi %0, %c1_i32_74 : i32
    %c2_i32_141 = arith.constant 2 : i32
    %245 = arith.addi %244, %c2_i32_141 : i32
    %c0_142 = arith.constant 0 : index
    %246 = arith.index_cast %245 : i32 to index
    %c3_143 = arith.constant 3 : index
    %c0_144 = arith.constant 0 : index
    %247 = vector.load %arg2[%c0_142, %246, %c3_143, %c0_144] : memref<1x11x11x16xbf16, #tpu.memory_space<vmem>>, vector<1x1x8x16xbf16>
    %248 = vector.shape_cast %247 : vector<1x1x8x16xbf16> to vector<1x8x16xbf16>
    %249 = vector.shape_cast %248 : vector<1x8x16xbf16> to vector<8x16xbf16>
    %c8_i32_145 = arith.constant 8 : i32
    %250 = arith.muli %c1_i32_74, %c8_i32_145 : i32
    %251 = arith.index_cast %250 : i32 to index
    %c176_146 = arith.constant 176 : index
    %252 = vector.load %arg6[%251, %c176_146] : memref<64x256xbf16, #tpu.memory_space<vmem>>, vector<8x16xbf16>
    tpu.vector_store %arg6[%251, %c176_146], %249 {strides = array<i32>} : memref<64x256xbf16, #tpu.memory_space<vmem>>, vector<8x16xbf16>,
    %253 = arith.addi %0, %c1_i32_74 : i32
    %c3_i32_147 = arith.constant 3 : i32
    %254 = arith.addi %253, %c3_i32_147 : i32
    %c0_148 = arith.constant 0 : index
    %255 = arith.index_cast %254 : i32 to index
    %c0_149 = arith.constant 0 : index
    %c0_150 = arith.constant 0 : index
    %256 = vector.load %arg2[%c0_148, %255, %c0_149, %c0_150] : memref<1x11x11x16xbf16, #tpu.memory_space<vmem>>, vector<1x1x8x16xbf16>
    %257 = vector.shape_cast %256 : vector<1x1x8x16xbf16> to vector<1x8x16xbf16>
    %258 = vector.shape_cast %257 : vector<1x8x16xbf16> to vector<8x16xbf16>
    %c8_i32_151 = arith.constant 8 : i32
    %259 = arith.muli %c1_i32_74, %c8_i32_151 : i32
    %260 = arith.index_cast %259 : i32 to index
    %c192_152 = arith.constant 192 : index
    %261 = vector.load %arg6[%260, %c192_152] : memref<64x256xbf16, #tpu.memory_space<vmem>>, vector<8x16xbf16>
    tpu.vector_store %arg6[%260, %c192_152], %258 {strides = array<i32>} : memref<64x256xbf16, #tpu.memory_space<vmem>>, vector<8x16xbf16>,
    %262 = arith.addi %0, %c1_i32_74 : i32
    %c3_i32_153 = arith.constant 3 : i32
    %263 = arith.addi %262, %c3_i32_153 : i32
    %c0_154 = arith.constant 0 : index
    %264 = arith.index_cast %263 : i32 to index
    %c1_155 = arith.constant 1 : index
    %c0_156 = arith.constant 0 : index
    %265 = vector.load %arg2[%c0_154, %264, %c1_155, %c0_156] : memref<1x11x11x16xbf16, #tpu.memory_space<vmem>>, vector<1x1x8x16xbf16>
    %266 = vector.shape_cast %265 : vector<1x1x8x16xbf16> to vector<1x8x16xbf16>
    %267 = vector.shape_cast %266 : vector<1x8x16xbf16> to vector<8x16xbf16>
    %c8_i32_157 = arith.constant 8 : i32
    %268 = arith.muli %c1_i32_74, %c8_i32_157 : i32
    %269 = arith.index_cast %268 : i32 to index
    %c208_158 = arith.constant 208 : index
    %270 = vector.load %arg6[%269, %c208_158] : memref<64x256xbf16, #tpu.memory_space<vmem>>, vector<8x16xbf16>
    tpu.vector_store %arg6[%269, %c208_158], %267 {strides = array<i32>} : memref<64x256xbf16, #tpu.memory_space<vmem>>, vector<8x16xbf16>,
    %271 = arith.addi %0, %c1_i32_74 : i32
    %c3_i32_159 = arith.constant 3 : i32
    %272 = arith.addi %271, %c3_i32_159 : i32
    %c0_160 = arith.constant 0 : index
    %273 = arith.index_cast %272 : i32 to index
    %c2_161 = arith.constant 2 : index
    %c0_162 = arith.constant 0 : index
    %274 = vector.load %arg2[%c0_160, %273, %c2_161, %c0_162] : memref<1x11x11x16xbf16, #tpu.memory_space<vmem>>, vector<1x1x8x16xbf16>
    %275 = vector.shape_cast %274 : vector<1x1x8x16xbf16> to vector<1x8x16xbf16>
    %276 = vector.shape_cast %275 : vector<1x8x16xbf16> to vector<8x16xbf16>
    %c8_i32_163 = arith.constant 8 : i32
    %277 = arith.muli %c1_i32_74, %c8_i32_163 : i32
    %278 = arith.index_cast %277 : i32 to index
    %c224_164 = arith.constant 224 : index
    %279 = vector.load %arg6[%278, %c224_164] : memref<64x256xbf16, #tpu.memory_space<vmem>>, vector<8x16xbf16>
    tpu.vector_store %arg6[%278, %c224_164], %276 {strides = array<i32>} : memref<64x256xbf16, #tpu.memory_space<vmem>>, vector<8x16xbf16>,
    %280 = arith.addi %0, %c1_i32_74 : i32
    %c3_i32_165 = arith.constant 3 : i32
    %281 = arith.addi %280, %c3_i32_165 : i32
    %c0_166 = arith.constant 0 : index
    %282 = arith.index_cast %281 : i32 to index
    %c3_167 = arith.constant 3 : index
    %c0_168 = arith.constant 0 : index
    %283 = vector.load %arg2[%c0_166, %282, %c3_167, %c0_168] : memref<1x11x11x16xbf16, #tpu.memory_space<vmem>>, vector<1x1x8x16xbf16>
    %284 = vector.shape_cast %283 : vector<1x1x8x16xbf16> to vector<1x8x16xbf16>
    %285 = vector.shape_cast %284 : vector<1x8x16xbf16> to vector<8x16xbf16>
    %c8_i32_169 = arith.constant 8 : i32
    %286 = arith.muli %c1_i32_74, %c8_i32_169 : i32
    %287 = arith.index_cast %286 : i32 to index
    %c240_170 = arith.constant 240 : index
    %288 = vector.load %arg6[%287, %c240_170] : memref<64x256xbf16, #tpu.memory_space<vmem>>, vector<8x16xbf16>
    tpu.vector_store %arg6[%287, %c240_170], %285 {strides = array<i32>} : memref<64x256xbf16, #tpu.memory_space<vmem>>, vector<8x16xbf16>,
    %c2_i32_171 = arith.constant 2 : i32
    %289 = arith.addi %0, %c2_i32_171 : i32
    %c0_i32_172 = arith.constant 0 : i32
    %290 = arith.addi %289, %c0_i32_172 : i32
    %c0_173 = arith.constant 0 : index
    %291 = arith.index_cast %290 : i32 to index
    %c0_174 = arith.constant 0 : index
    %c0_175 = arith.constant 0 : index
    %292 = vector.load %arg2[%c0_173, %291, %c0_174, %c0_175] : memref<1x11x11x16xbf16, #tpu.memory_space<vmem>>, vector<1x1x8x16xbf16>
    %293 = vector.shape_cast %292 : vector<1x1x8x16xbf16> to vector<1x8x16xbf16>
    %294 = vector.shape_cast %293 : vector<1x8x16xbf16> to vector<8x16xbf16>
    %c8_i32_176 = arith.constant 8 : i32
    %295 = arith.muli %c2_i32_171, %c8_i32_176 : i32
    %296 = arith.index_cast %295 : i32 to index
    %c0_177 = arith.constant 0 : index
    %297 = vector.load %arg6[%296, %c0_177] : memref<64x256xbf16, #tpu.memory_space<vmem>>, vector<8x16xbf16>
    tpu.vector_store %arg6[%296, %c0_177], %294 {strides = array<i32>} : memref<64x256xbf16, #tpu.memory_space<vmem>>, vector<8x16xbf16>,
    %298 = arith.addi %0, %c2_i32_171 : i32
    %c0_i32_178 = arith.constant 0 : i32
    %299 = arith.addi %298, %c0_i32_178 : i32
    %c0_179 = arith.constant 0 : index
    %300 = arith.index_cast %299 : i32 to index
    %c1_180 = arith.constant 1 : index
    %c0_181 = arith.constant 0 : index
    %301 = vector.load %arg2[%c0_179, %300, %c1_180, %c0_181] : memref<1x11x11x16xbf16, #tpu.memory_space<vmem>>, vector<1x1x8x16xbf16>
    %302 = vector.shape_cast %301 : vector<1x1x8x16xbf16> to vector<1x8x16xbf16>
    %303 = vector.shape_cast %302 : vector<1x8x16xbf16> to vector<8x16xbf16>
    %c8_i32_182 = arith.constant 8 : i32
    %304 = arith.muli %c2_i32_171, %c8_i32_182 : i32
    %305 = arith.index_cast %304 : i32 to index
    %c16_183 = arith.constant 16 : index
    %306 = vector.load %arg6[%305, %c16_183] : memref<64x256xbf16, #tpu.memory_space<vmem>>, vector<8x16xbf16>
    tpu.vector_store %arg6[%305, %c16_183], %303 {strides = array<i32>} : memref<64x256xbf16, #tpu.memory_space<vmem>>, vector<8x16xbf16>,
    %307 = arith.addi %0, %c2_i32_171 : i32
    %c0_i32_184 = arith.constant 0 : i32
    %308 = arith.addi %307, %c0_i32_184 : i32
    %c0_185 = arith.constant 0 : index
    %309 = arith.index_cast %308 : i32 to index
    %c2_186 = arith.constant 2 : index
    %c0_187 = arith.constant 0 : index
    %310 = vector.load %arg2[%c0_185, %309, %c2_186, %c0_187] : memref<1x11x11x16xbf16, #tpu.memory_space<vmem>>, vector<1x1x8x16xbf16>
    %311 = vector.shape_cast %310 : vector<1x1x8x16xbf16> to vector<1x8x16xbf16>
    %312 = vector.shape_cast %311 : vector<1x8x16xbf16> to vector<8x16xbf16>
    %c8_i32_188 = arith.constant 8 : i32
    %313 = arith.muli %c2_i32_171, %c8_i32_188 : i32
    %314 = arith.index_cast %313 : i32 to index
    %c32_189 = arith.constant 32 : index
    %315 = vector.load %arg6[%314, %c32_189] : memref<64x256xbf16, #tpu.memory_space<vmem>>, vector<8x16xbf16>
    tpu.vector_store %arg6[%314, %c32_189], %312 {strides = array<i32>} : memref<64x256xbf16, #tpu.memory_space<vmem>>, vector<8x16xbf16>,
    %316 = arith.addi %0, %c2_i32_171 : i32
    %c0_i32_190 = arith.constant 0 : i32
    %317 = arith.addi %316, %c0_i32_190 : i32
    %c0_191 = arith.constant 0 : index
    %318 = arith.index_cast %317 : i32 to index
    %c3_192 = arith.constant 3 : index
    %c0_193 = arith.constant 0 : index
    %319 = vector.load %arg2[%c0_191, %318, %c3_192, %c0_193] : memref<1x11x11x16xbf16, #tpu.memory_space<vmem>>, vector<1x1x8x16xbf16>
    %320 = vector.shape_cast %319 : vector<1x1x8x16xbf16> to vector<1x8x16xbf16>
    %321 = vector.shape_cast %320 : vector<1x8x16xbf16> to vector<8x16xbf16>
    %c8_i32_194 = arith.constant 8 : i32
    %322 = arith.muli %c2_i32_171, %c8_i32_194 : i32
    %323 = arith.index_cast %322 : i32 to index
    %c48_195 = arith.constant 48 : index
    %324 = vector.load %arg6[%323, %c48_195] : memref<64x256xbf16, #tpu.memory_space<vmem>>, vector<8x16xbf16>
    tpu.vector_store %arg6[%323, %c48_195], %321 {strides = array<i32>} : memref<64x256xbf16, #tpu.memory_space<vmem>>, vector<8x16xbf16>,
    %325 = arith.addi %0, %c2_i32_171 : i32
    %c1_i32_196 = arith.constant 1 : i32
    %326 = arith.addi %325, %c1_i32_196 : i32
    %c0_197 = arith.constant 0 : index
    %327 = arith.index_cast %326 : i32 to index
    %c0_198 = arith.constant 0 : index
    %c0_199 = arith.constant 0 : index
    %328 = vector.load %arg2[%c0_197, %327, %c0_198, %c0_199] : memref<1x11x11x16xbf16, #tpu.memory_space<vmem>>, vector<1x1x8x16xbf16>
    %329 = vector.shape_cast %328 : vector<1x1x8x16xbf16> to vector<1x8x16xbf16>
    %330 = vector.shape_cast %329 : vector<1x8x16xbf16> to vector<8x16xbf16>
    %c8_i32_200 = arith.constant 8 : i32
    %331 = arith.muli %c2_i32_171, %c8_i32_200 : i32
    %332 = arith.index_cast %331 : i32 to index
    %c64_201 = arith.constant 64 : index
    %333 = vector.load %arg6[%332, %c64_201] : memref<64x256xbf16, #tpu.memory_space<vmem>>, vector<8x16xbf16>
    tpu.vector_store %arg6[%332, %c64_201], %330 {strides = array<i32>} : memref<64x256xbf16, #tpu.memory_space<vmem>>, vector<8x16xbf16>,
    %334 = arith.addi %0, %c2_i32_171 : i32
    %c1_i32_202 = arith.constant 1 : i32
    %335 = arith.addi %334, %c1_i32_202 : i32
    %c0_203 = arith.constant 0 : index
    %336 = arith.index_cast %335 : i32 to index
    %c1_204 = arith.constant 1 : index
    %c0_205 = arith.constant 0 : index
    %337 = vector.load %arg2[%c0_203, %336, %c1_204, %c0_205] : memref<1x11x11x16xbf16, #tpu.memory_space<vmem>>, vector<1x1x8x16xbf16>
    %338 = vector.shape_cast %337 : vector<1x1x8x16xbf16> to vector<1x8x16xbf16>
    %339 = vector.shape_cast %338 : vector<1x8x16xbf16> to vector<8x16xbf16>
    %c8_i32_206 = arith.constant 8 : i32
    %340 = arith.muli %c2_i32_171, %c8_i32_206 : i32
    %341 = arith.index_cast %340 : i32 to index
    %c80_207 = arith.constant 80 : index
    %342 = vector.load %arg6[%341, %c80_207] : memref<64x256xbf16, #tpu.memory_space<vmem>>, vector<8x16xbf16>
    tpu.vector_store %arg6[%341, %c80_207], %339 {strides = array<i32>} : memref<64x256xbf16, #tpu.memory_space<vmem>>, vector<8x16xbf16>,
    %343 = arith.addi %0, %c2_i32_171 : i32
    %c1_i32_208 = arith.constant 1 : i32
    %344 = arith.addi %343, %c1_i32_208 : i32
    %c0_209 = arith.constant 0 : index
    %345 = arith.index_cast %344 : i32 to index
    %c2_210 = arith.constant 2 : index
    %c0_211 = arith.constant 0 : index
    %346 = vector.load %arg2[%c0_209, %345, %c2_210, %c0_211] : memref<1x11x11x16xbf16, #tpu.memory_space<vmem>>, vector<1x1x8x16xbf16>
    %347 = vector.shape_cast %346 : vector<1x1x8x16xbf16> to vector<1x8x16xbf16>
    %348 = vector.shape_cast %347 : vector<1x8x16xbf16> to vector<8x16xbf16>
    %c8_i32_212 = arith.constant 8 : i32
    %349 = arith.muli %c2_i32_171, %c8_i32_212 : i32
    %350 = arith.index_cast %349 : i32 to index
    %c96_213 = arith.constant 96 : index
    %351 = vector.load %arg6[%350, %c96_213] : memref<64x256xbf16, #tpu.memory_space<vmem>>, vector<8x16xbf16>
    tpu.vector_store %arg6[%350, %c96_213], %348 {strides = array<i32>} : memref<64x256xbf16, #tpu.memory_space<vmem>>, vector<8x16xbf16>,
    %352 = arith.addi %0, %c2_i32_171 : i32
    %c1_i32_214 = arith.constant 1 : i32
    %353 = arith.addi %352, %c1_i32_214 : i32
    %c0_215 = arith.constant 0 : index
    %354 = arith.index_cast %353 : i32 to index
    %c3_216 = arith.constant 3 : index
    %c0_217 = arith.constant 0 : index
    %355 = vector.load %arg2[%c0_215, %354, %c3_216, %c0_217] : memref<1x11x11x16xbf16, #tpu.memory_space<vmem>>, vector<1x1x8x16xbf16>
    %356 = vector.shape_cast %355 : vector<1x1x8x16xbf16> to vector<1x8x16xbf16>
    %357 = vector.shape_cast %356 : vector<1x8x16xbf16> to vector<8x16xbf16>
    %c8_i32_218 = arith.constant 8 : i32
    %358 = arith.muli %c2_i32_171, %c8_i32_218 : i32
    %359 = arith.index_cast %358 : i32 to index
    %c112_219 = arith.constant 112 : index
    %360 = vector.load %arg6[%359, %c112_219] : memref<64x256xbf16, #tpu.memory_space<vmem>>, vector<8x16xbf16>
    tpu.vector_store %arg6[%359, %c112_219], %357 {strides = array<i32>} : memref<64x256xbf16, #tpu.memory_space<vmem>>, vector<8x16xbf16>,
    %361 = arith.addi %0, %c2_i32_171 : i32
    %c2_i32_220 = arith.constant 2 : i32
    %362 = arith.addi %361, %c2_i32_220 : i32
    %c0_221 = arith.constant 0 : index
    %363 = arith.index_cast %362 : i32 to index
    %c0_222 = arith.constant 0 : index
    %c0_223 = arith.constant 0 : index
    %364 = vector.load %arg2[%c0_221, %363, %c0_222, %c0_223] : memref<1x11x11x16xbf16, #tpu.memory_space<vmem>>, vector<1x1x8x16xbf16>
    %365 = vector.shape_cast %364 : vector<1x1x8x16xbf16> to vector<1x8x16xbf16>
    %366 = vector.shape_cast %365 : vector<1x8x16xbf16> to vector<8x16xbf16>
    %c8_i32_224 = arith.constant 8 : i32
    %367 = arith.muli %c2_i32_171, %c8_i32_224 : i32
    %368 = arith.index_cast %367 : i32 to index
    %c128_225 = arith.constant 128 : index
    %369 = vector.load %arg6[%368, %c128_225] : memref<64x256xbf16, #tpu.memory_space<vmem>>, vector<8x16xbf16>
    tpu.vector_store %arg6[%368, %c128_225], %366 {strides = array<i32>} : memref<64x256xbf16, #tpu.memory_space<vmem>>, vector<8x16xbf16>,
    %370 = arith.addi %0, %c2_i32_171 : i32
    %c2_i32_226 = arith.constant 2 : i32
    %371 = arith.addi %370, %c2_i32_226 : i32
    %c0_227 = arith.constant 0 : index
    %372 = arith.index_cast %371 : i32 to index
    %c1_228 = arith.constant 1 : index
    %c0_229 = arith.constant 0 : index
    %373 = vector.load %arg2[%c0_227, %372, %c1_228, %c0_229] : memref<1x11x11x16xbf16, #tpu.memory_space<vmem>>, vector<1x1x8x16xbf16>
    %374 = vector.shape_cast %373 : vector<1x1x8x16xbf16> to vector<1x8x16xbf16>
    %375 = vector.shape_cast %374 : vector<1x8x16xbf16> to vector<8x16xbf16>
    %c8_i32_230 = arith.constant 8 : i32
    %376 = arith.muli %c2_i32_171, %c8_i32_230 : i32
    %377 = arith.index_cast %376 : i32 to index
    %c144_231 = arith.constant 144 : index
    %378 = vector.load %arg6[%377, %c144_231] : memref<64x256xbf16, #tpu.memory_space<vmem>>, vector<8x16xbf16>
    tpu.vector_store %arg6[%377, %c144_231], %375 {strides = array<i32>} : memref<64x256xbf16, #tpu.memory_space<vmem>>, vector<8x16xbf16>,
    %379 = arith.addi %0, %c2_i32_171 : i32
    %c2_i32_232 = arith.constant 2 : i32
    %380 = arith.addi %379, %c2_i32_232 : i32
    %c0_233 = arith.constant 0 : index
    %381 = arith.index_cast %380 : i32 to index
    %c2_234 = arith.constant 2 : index
    %c0_235 = arith.constant 0 : index
    %382 = vector.load %arg2[%c0_233, %381, %c2_234, %c0_235] : memref<1x11x11x16xbf16, #tpu.memory_space<vmem>>, vector<1x1x8x16xbf16>
    %383 = vector.shape_cast %382 : vector<1x1x8x16xbf16> to vector<1x8x16xbf16>
    %384 = vector.shape_cast %383 : vector<1x8x16xbf16> to vector<8x16xbf16>
    %c8_i32_236 = arith.constant 8 : i32
    %385 = arith.muli %c2_i32_171, %c8_i32_236 : i32
    %386 = arith.index_cast %385 : i32 to index
    %c160_237 = arith.constant 160 : index
    %387 = vector.load %arg6[%386, %c160_237] : memref<64x256xbf16, #tpu.memory_space<vmem>>, vector<8x16xbf16>
    tpu.vector_store %arg6[%386, %c160_237], %384 {strides = array<i32>} : memref<64x256xbf16, #tpu.memory_space<vmem>>, vector<8x16xbf16>,
    %388 = arith.addi %0, %c2_i32_171 : i32
    %c2_i32_238 = arith.constant 2 : i32
    %389 = arith.addi %388, %c2_i32_238 : i32
    %c0_239 = arith.constant 0 : index
    %390 = arith.index_cast %389 : i32 to index
    %c3_240 = arith.constant 3 : index
    %c0_241 = arith.constant 0 : index
    %391 = vector.load %arg2[%c0_239, %390, %c3_240, %c0_241] : memref<1x11x11x16xbf16, #tpu.memory_space<vmem>>, vector<1x1x8x16xbf16>
    %392 = vector.shape_cast %391 : vector<1x1x8x16xbf16> to vector<1x8x16xbf16>
    %393 = vector.shape_cast %392 : vector<1x8x16xbf16> to vector<8x16xbf16>
    %c8_i32_242 = arith.constant 8 : i32
    %394 = arith.muli %c2_i32_171, %c8_i32_242 : i32
    %395 = arith.index_cast %394 : i32 to index
    %c176_243 = arith.constant 176 : index
    %396 = vector.load %arg6[%395, %c176_243] : memref<64x256xbf16, #tpu.memory_space<vmem>>, vector<8x16xbf16>
    tpu.vector_store %arg6[%395, %c176_243], %393 {strides = array<i32>} : memref<64x256xbf16, #tpu.memory_space<vmem>>, vector<8x16xbf16>,
    %397 = arith.addi %0, %c2_i32_171 : i32
    %c3_i32_244 = arith.constant 3 : i32
    %398 = arith.addi %397, %c3_i32_244 : i32
    %c0_245 = arith.constant 0 : index
    %399 = arith.index_cast %398 : i32 to index
    %c0_246 = arith.constant 0 : index
    %c0_247 = arith.constant 0 : index
    %400 = vector.load %arg2[%c0_245, %399, %c0_246, %c0_247] : memref<1x11x11x16xbf16, #tpu.memory_space<vmem>>, vector<1x1x8x16xbf16>
    %401 = vector.shape_cast %400 : vector<1x1x8x16xbf16> to vector<1x8x16xbf16>
    %402 = vector.shape_cast %401 : vector<1x8x16xbf16> to vector<8x16xbf16>
    %c8_i32_248 = arith.constant 8 : i32
    %403 = arith.muli %c2_i32_171, %c8_i32_248 : i32
    %404 = arith.index_cast %403 : i32 to index
    %c192_249 = arith.constant 192 : index
    %405 = vector.load %arg6[%404, %c192_249] : memref<64x256xbf16, #tpu.memory_space<vmem>>, vector<8x16xbf16>
    tpu.vector_store %arg6[%404, %c192_249], %402 {strides = array<i32>} : memref<64x256xbf16, #tpu.memory_space<vmem>>, vector<8x16xbf16>,
    %406 = arith.addi %0, %c2_i32_171 : i32
    %c3_i32_250 = arith.constant 3 : i32
    %407 = arith.addi %406, %c3_i32_250 : i32
    %c0_251 = arith.constant 0 : index
    %408 = arith.index_cast %407 : i32 to index
    %c1_252 = arith.constant 1 : index
    %c0_253 = arith.constant 0 : index
    %409 = vector.load %arg2[%c0_251, %408, %c1_252, %c0_253] : memref<1x11x11x16xbf16, #tpu.memory_space<vmem>>, vector<1x1x8x16xbf16>
    %410 = vector.shape_cast %409 : vector<1x1x8x16xbf16> to vector<1x8x16xbf16>
    %411 = vector.shape_cast %410 : vector<1x8x16xbf16> to vector<8x16xbf16>
    %c8_i32_254 = arith.constant 8 : i32
    %412 = arith.muli %c2_i32_171, %c8_i32_254 : i32
    %413 = arith.index_cast %412 : i32 to index
    %c208_255 = arith.constant 208 : index
    %414 = vector.load %arg6[%413, %c208_255] : memref<64x256xbf16, #tpu.memory_space<vmem>>, vector<8x16xbf16>
    tpu.vector_store %arg6[%413, %c208_255], %411 {strides = array<i32>} : memref<64x256xbf16, #tpu.memory_space<vmem>>, vector<8x16xbf16>,
    %415 = arith.addi %0, %c2_i32_171 : i32
    %c3_i32_256 = arith.constant 3 : i32
    %416 = arith.addi %415, %c3_i32_256 : i32
    %c0_257 = arith.constant 0 : index
    %417 = arith.index_cast %416 : i32 to index
    %c2_258 = arith.constant 2 : index
    %c0_259 = arith.constant 0 : index
    %418 = vector.load %arg2[%c0_257, %417, %c2_258, %c0_259] : memref<1x11x11x16xbf16, #tpu.memory_space<vmem>>, vector<1x1x8x16xbf16>
    %419 = vector.shape_cast %418 : vector<1x1x8x16xbf16> to vector<1x8x16xbf16>
    %420 = vector.shape_cast %419 : vector<1x8x16xbf16> to vector<8x16xbf16>
    %c8_i32_260 = arith.constant 8 : i32
    %421 = arith.muli %c2_i32_171, %c8_i32_260 : i32
    %422 = arith.index_cast %421 : i32 to index
    %c224_261 = arith.constant 224 : index
    %423 = vector.load %arg6[%422, %c224_261] : memref<64x256xbf16, #tpu.memory_space<vmem>>, vector<8x16xbf16>
    tpu.vector_store %arg6[%422, %c224_261], %420 {strides = array<i32>} : memref<64x256xbf16, #tpu.memory_space<vmem>>, vector<8x16xbf16>,
    %424 = arith.addi %0, %c2_i32_171 : i32
    %c3_i32_262 = arith.constant 3 : i32
    %425 = arith.addi %424, %c3_i32_262 : i32
    %c0_263 = arith.constant 0 : index
    %426 = arith.index_cast %425 : i32 to index
    %c3_264 = arith.constant 3 : index
    %c0_265 = arith.constant 0 : index
    %427 = vector.load %arg2[%c0_263, %426, %c3_264, %c0_265] : memref<1x11x11x16xbf16, #tpu.memory_space<vmem>>, vector<1x1x8x16xbf16>
    %428 = vector.shape_cast %427 : vector<1x1x8x16xbf16> to vector<1x8x16xbf16>
    %429 = vector.shape_cast %428 : vector<1x8x16xbf16> to vector<8x16xbf16>
    %c8_i32_266 = arith.constant 8 : i32
    %430 = arith.muli %c2_i32_171, %c8_i32_266 : i32
    %431 = arith.index_cast %430 : i32 to index
    %c240_267 = arith.constant 240 : index
    %432 = vector.load %arg6[%431, %c240_267] : memref<64x256xbf16, #tpu.memory_space<vmem>>, vector<8x16xbf16>
    tpu.vector_store %arg6[%431, %c240_267], %429 {strides = array<i32>} : memref<64x256xbf16, #tpu.memory_space<vmem>>, vector<8x16xbf16>,
    %c3_i32_268 = arith.constant 3 : i32
    %433 = arith.addi %0, %c3_i32_268 : i32
    %c0_i32_269 = arith.constant 0 : i32
    %434 = arith.addi %433, %c0_i32_269 : i32
    %c0_270 = arith.constant 0 : index
    %435 = arith.index_cast %434 : i32 to index
    %c0_271 = arith.constant 0 : index
    %c0_272 = arith.constant 0 : index
    %436 = vector.load %arg2[%c0_270, %435, %c0_271, %c0_272] : memref<1x11x11x16xbf16, #tpu.memory_space<vmem>>, vector<1x1x8x16xbf16>
    %437 = vector.shape_cast %436 : vector<1x1x8x16xbf16> to vector<1x8x16xbf16>
    %438 = vector.shape_cast %437 : vector<1x8x16xbf16> to vector<8x16xbf16>
    %c8_i32_273 = arith.constant 8 : i32
    %439 = arith.muli %c3_i32_268, %c8_i32_273 : i32
    %440 = arith.index_cast %439 : i32 to index
    %c0_274 = arith.constant 0 : index
    %441 = vector.load %arg6[%440, %c0_274] : memref<64x256xbf16, #tpu.memory_space<vmem>>, vector<8x16xbf16>
    tpu.vector_store %arg6[%440, %c0_274], %438 {strides = array<i32>} : memref<64x256xbf16, #tpu.memory_space<vmem>>, vector<8x16xbf16>,
    %442 = arith.addi %0, %c3_i32_268 : i32
    %c0_i32_275 = arith.constant 0 : i32
    %443 = arith.addi %442, %c0_i32_275 : i32
    %c0_276 = arith.constant 0 : index
    %444 = arith.index_cast %443 : i32 to index
    %c1_277 = arith.constant 1 : index
    %c0_278 = arith.constant 0 : index
    %445 = vector.load %arg2[%c0_276, %444, %c1_277, %c0_278] : memref<1x11x11x16xbf16, #tpu.memory_space<vmem>>, vector<1x1x8x16xbf16>
    %446 = vector.shape_cast %445 : vector<1x1x8x16xbf16> to vector<1x8x16xbf16>
    %447 = vector.shape_cast %446 : vector<1x8x16xbf16> to vector<8x16xbf16>
    %c8_i32_279 = arith.constant 8 : i32
    %448 = arith.muli %c3_i32_268, %c8_i32_279 : i32
    %449 = arith.index_cast %448 : i32 to index
    %c16_280 = arith.constant 16 : index
    %450 = vector.load %arg6[%449, %c16_280] : memref<64x256xbf16, #tpu.memory_space<vmem>>, vector<8x16xbf16>
    tpu.vector_store %arg6[%449, %c16_280], %447 {strides = array<i32>} : memref<64x256xbf16, #tpu.memory_space<vmem>>, vector<8x16xbf16>,
    %451 = arith.addi %0, %c3_i32_268 : i32
    %c0_i32_281 = arith.constant 0 : i32
    %452 = arith.addi %451, %c0_i32_281 : i32
    %c0_282 = arith.constant 0 : index
    %453 = arith.index_cast %452 : i32 to index
    %c2_283 = arith.constant 2 : index
    %c0_284 = arith.constant 0 : index
    %454 = vector.load %arg2[%c0_282, %453, %c2_283, %c0_284] : memref<1x11x11x16xbf16, #tpu.memory_space<vmem>>, vector<1x1x8x16xbf16>
    %455 = vector.shape_cast %454 : vector<1x1x8x16xbf16> to vector<1x8x16xbf16>
    %456 = vector.shape_cast %455 : vector<1x8x16xbf16> to vector<8x16xbf16>
    %c8_i32_285 = arith.constant 8 : i32
    %457 = arith.muli %c3_i32_268, %c8_i32_285 : i32
    %458 = arith.index_cast %457 : i32 to index
    %c32_286 = arith.constant 32 : index
    %459 = vector.load %arg6[%458, %c32_286] : memref<64x256xbf16, #tpu.memory_space<vmem>>, vector<8x16xbf16>
    tpu.vector_store %arg6[%458, %c32_286], %456 {strides = array<i32>} : memref<64x256xbf16, #tpu.memory_space<vmem>>, vector<8x16xbf16>,
    %460 = arith.addi %0, %c3_i32_268 : i32
    %c0_i32_287 = arith.constant 0 : i32
    %461 = arith.addi %460, %c0_i32_287 : i32
    %c0_288 = arith.constant 0 : index
    %462 = arith.index_cast %461 : i32 to index
    %c3_289 = arith.constant 3 : index
    %c0_290 = arith.constant 0 : index
    %463 = vector.load %arg2[%c0_288, %462, %c3_289, %c0_290] : memref<1x11x11x16xbf16, #tpu.memory_space<vmem>>, vector<1x1x8x16xbf16>
    %464 = vector.shape_cast %463 : vector<1x1x8x16xbf16> to vector<1x8x16xbf16>
    %465 = vector.shape_cast %464 : vector<1x8x16xbf16> to vector<8x16xbf16>
    %c8_i32_291 = arith.constant 8 : i32
    %466 = arith.muli %c3_i32_268, %c8_i32_291 : i32
    %467 = arith.index_cast %466 : i32 to index
    %c48_292 = arith.constant 48 : index
    %468 = vector.load %arg6[%467, %c48_292] : memref<64x256xbf16, #tpu.memory_space<vmem>>, vector<8x16xbf16>
    tpu.vector_store %arg6[%467, %c48_292], %465 {strides = array<i32>} : memref<64x256xbf16, #tpu.memory_space<vmem>>, vector<8x16xbf16>,
    %469 = arith.addi %0, %c3_i32_268 : i32
    %c1_i32_293 = arith.constant 1 : i32
    %470 = arith.addi %469, %c1_i32_293 : i32
    %c0_294 = arith.constant 0 : index
    %471 = arith.index_cast %470 : i32 to index
    %c0_295 = arith.constant 0 : index
    %c0_296 = arith.constant 0 : index
    %472 = vector.load %arg2[%c0_294, %471, %c0_295, %c0_296] : memref<1x11x11x16xbf16, #tpu.memory_space<vmem>>, vector<1x1x8x16xbf16>
    %473 = vector.shape_cast %472 : vector<1x1x8x16xbf16> to vector<1x8x16xbf16>
    %474 = vector.shape_cast %473 : vector<1x8x16xbf16> to vector<8x16xbf16>
    %c8_i32_297 = arith.constant 8 : i32
    %475 = arith.muli %c3_i32_268, %c8_i32_297 : i32
    %476 = arith.index_cast %475 : i32 to index
    %c64_298 = arith.constant 64 : index
    %477 = vector.load %arg6[%476, %c64_298] : memref<64x256xbf16, #tpu.memory_space<vmem>>, vector<8x16xbf16>
    tpu.vector_store %arg6[%476, %c64_298], %474 {strides = array<i32>} : memref<64x256xbf16, #tpu.memory_space<vmem>>, vector<8x16xbf16>,
    %478 = arith.addi %0, %c3_i32_268 : i32
    %c1_i32_299 = arith.constant 1 : i32
    %479 = arith.addi %478, %c1_i32_299 : i32
    %c0_300 = arith.constant 0 : index
    %480 = arith.index_cast %479 : i32 to index
    %c1_301 = arith.constant 1 : index
    %c0_302 = arith.constant 0 : index
    %481 = vector.load %arg2[%c0_300, %480, %c1_301, %c0_302] : memref<1x11x11x16xbf16, #tpu.memory_space<vmem>>, vector<1x1x8x16xbf16>
    %482 = vector.shape_cast %481 : vector<1x1x8x16xbf16> to vector<1x8x16xbf16>
    %483 = vector.shape_cast %482 : vector<1x8x16xbf16> to vector<8x16xbf16>
    %c8_i32_303 = arith.constant 8 : i32
    %484 = arith.muli %c3_i32_268, %c8_i32_303 : i32
    %485 = arith.index_cast %484 : i32 to index
    %c80_304 = arith.constant 80 : index
    %486 = vector.load %arg6[%485, %c80_304] : memref<64x256xbf16, #tpu.memory_space<vmem>>, vector<8x16xbf16>
    tpu.vector_store %arg6[%485, %c80_304], %483 {strides = array<i32>} : memref<64x256xbf16, #tpu.memory_space<vmem>>, vector<8x16xbf16>,
    %487 = arith.addi %0, %c3_i32_268 : i32
    %c1_i32_305 = arith.constant 1 : i32
    %488 = arith.addi %487, %c1_i32_305 : i32
    %c0_306 = arith.constant 0 : index
    %489 = arith.index_cast %488 : i32 to index
    %c2_307 = arith.constant 2 : index
    %c0_308 = arith.constant 0 : index
    %490 = vector.load %arg2[%c0_306, %489, %c2_307, %c0_308] : memref<1x11x11x16xbf16, #tpu.memory_space<vmem>>, vector<1x1x8x16xbf16>
    %491 = vector.shape_cast %490 : vector<1x1x8x16xbf16> to vector<1x8x16xbf16>
    %492 = vector.shape_cast %491 : vector<1x8x16xbf16> to vector<8x16xbf16>
    %c8_i32_309 = arith.constant 8 : i32
    %493 = arith.muli %c3_i32_268, %c8_i32_309 : i32
    %494 = arith.index_cast %493 : i32 to index
    %c96_310 = arith.constant 96 : index
    %495 = vector.load %arg6[%494, %c96_310] : memref<64x256xbf16, #tpu.memory_space<vmem>>, vector<8x16xbf16>
    tpu.vector_store %arg6[%494, %c96_310], %492 {strides = array<i32>} : memref<64x256xbf16, #tpu.memory_space<vmem>>, vector<8x16xbf16>,
    %496 = arith.addi %0, %c3_i32_268 : i32
    %c1_i32_311 = arith.constant 1 : i32
    %497 = arith.addi %496, %c1_i32_311 : i32
    %c0_312 = arith.constant 0 : index
    %498 = arith.index_cast %497 : i32 to index
    %c3_313 = arith.constant 3 : index
    %c0_314 = arith.constant 0 : index
    %499 = vector.load %arg2[%c0_312, %498, %c3_313, %c0_314] : memref<1x11x11x16xbf16, #tpu.memory_space<vmem>>, vector<1x1x8x16xbf16>
    %500 = vector.shape_cast %499 : vector<1x1x8x16xbf16> to vector<1x8x16xbf16>
    %501 = vector.shape_cast %500 : vector<1x8x16xbf16> to vector<8x16xbf16>
    %c8_i32_315 = arith.constant 8 : i32
    %502 = arith.muli %c3_i32_268, %c8_i32_315 : i32
    %503 = arith.index_cast %502 : i32 to index
    %c112_316 = arith.constant 112 : index
    %504 = vector.load %arg6[%503, %c112_316] : memref<64x256xbf16, #tpu.memory_space<vmem>>, vector<8x16xbf16>
    tpu.vector_store %arg6[%503, %c112_316], %501 {strides = array<i32>} : memref<64x256xbf16, #tpu.memory_space<vmem>>, vector<8x16xbf16>,
    %505 = arith.addi %0, %c3_i32_268 : i32
    %c2_i32_317 = arith.constant 2 : i32
    %506 = arith.addi %505, %c2_i32_317 : i32
    %c0_318 = arith.constant 0 : index
    %507 = arith.index_cast %506 : i32 to index
    %c0_319 = arith.constant 0 : index
    %c0_320 = arith.constant 0 : index
    %508 = vector.load %arg2[%c0_318, %507, %c0_319, %c0_320] : memref<1x11x11x16xbf16, #tpu.memory_space<vmem>>, vector<1x1x8x16xbf16>
    %509 = vector.shape_cast %508 : vector<1x1x8x16xbf16> to vector<1x8x16xbf16>
    %510 = vector.shape_cast %509 : vector<1x8x16xbf16> to vector<8x16xbf16>
    %c8_i32_321 = arith.constant 8 : i32
    %511 = arith.muli %c3_i32_268, %c8_i32_321 : i32
    %512 = arith.index_cast %511 : i32 to index
    %c128_322 = arith.constant 128 : index
    %513 = vector.load %arg6[%512, %c128_322] : memref<64x256xbf16, #tpu.memory_space<vmem>>, vector<8x16xbf16>
    tpu.vector_store %arg6[%512, %c128_322], %510 {strides = array<i32>} : memref<64x256xbf16, #tpu.memory_space<vmem>>, vector<8x16xbf16>,
    %514 = arith.addi %0, %c3_i32_268 : i32
    %c2_i32_323 = arith.constant 2 : i32
    %515 = arith.addi %514, %c2_i32_323 : i32
    %c0_324 = arith.constant 0 : index
    %516 = arith.index_cast %515 : i32 to index
    %c1_325 = arith.constant 1 : index
    %c0_326 = arith.constant 0 : index
    %517 = vector.load %arg2[%c0_324, %516, %c1_325, %c0_326] : memref<1x11x11x16xbf16, #tpu.memory_space<vmem>>, vector<1x1x8x16xbf16>
    %518 = vector.shape_cast %517 : vector<1x1x8x16xbf16> to vector<1x8x16xbf16>
    %519 = vector.shape_cast %518 : vector<1x8x16xbf16> to vector<8x16xbf16>
    %c8_i32_327 = arith.constant 8 : i32
    %520 = arith.muli %c3_i32_268, %c8_i32_327 : i32
    %521 = arith.index_cast %520 : i32 to index
    %c144_328 = arith.constant 144 : index
    %522 = vector.load %arg6[%521, %c144_328] : memref<64x256xbf16, #tpu.memory_space<vmem>>, vector<8x16xbf16>
    tpu.vector_store %arg6[%521, %c144_328], %519 {strides = array<i32>} : memref<64x256xbf16, #tpu.memory_space<vmem>>, vector<8x16xbf16>,
    %523 = arith.addi %0, %c3_i32_268 : i32
    %c2_i32_329 = arith.constant 2 : i32
    %524 = arith.addi %523, %c2_i32_329 : i32
    %c0_330 = arith.constant 0 : index
    %525 = arith.index_cast %524 : i32 to index
    %c2_331 = arith.constant 2 : index
    %c0_332 = arith.constant 0 : index
    %526 = vector.load %arg2[%c0_330, %525, %c2_331, %c0_332] : memref<1x11x11x16xbf16, #tpu.memory_space<vmem>>, vector<1x1x8x16xbf16>
    %527 = vector.shape_cast %526 : vector<1x1x8x16xbf16> to vector<1x8x16xbf16>
    %528 = vector.shape_cast %527 : vector<1x8x16xbf16> to vector<8x16xbf16>
    %c8_i32_333 = arith.constant 8 : i32
    %529 = arith.muli %c3_i32_268, %c8_i32_333 : i32
    %530 = arith.index_cast %529 : i32 to index
    %c160_334 = arith.constant 160 : index
    %531 = vector.load %arg6[%530, %c160_334] : memref<64x256xbf16, #tpu.memory_space<vmem>>, vector<8x16xbf16>
    tpu.vector_store %arg6[%530, %c160_334], %528 {strides = array<i32>} : memref<64x256xbf16, #tpu.memory_space<vmem>>, vector<8x16xbf16>,
    %532 = arith.addi %0, %c3_i32_268 : i32
    %c2_i32_335 = arith.constant 2 : i32
    %533 = arith.addi %532, %c2_i32_335 : i32
    %c0_336 = arith.constant 0 : index
    %534 = arith.index_cast %533 : i32 to index
    %c3_337 = arith.constant 3 : index
    %c0_338 = arith.constant 0 : index
    %535 = vector.load %arg2[%c0_336, %534, %c3_337, %c0_338] : memref<1x11x11x16xbf16, #tpu.memory_space<vmem>>, vector<1x1x8x16xbf16>
    %536 = vector.shape_cast %535 : vector<1x1x8x16xbf16> to vector<1x8x16xbf16>
    %537 = vector.shape_cast %536 : vector<1x8x16xbf16> to vector<8x16xbf16>
    %c8_i32_339 = arith.constant 8 : i32
    %538 = arith.muli %c3_i32_268, %c8_i32_339 : i32
    %539 = arith.index_cast %538 : i32 to index
    %c176_340 = arith.constant 176 : index
    %540 = vector.load %arg6[%539, %c176_340] : memref<64x256xbf16, #tpu.memory_space<vmem>>, vector<8x16xbf16>
    tpu.vector_store %arg6[%539, %c176_340], %537 {strides = array<i32>} : memref<64x256xbf16, #tpu.memory_space<vmem>>, vector<8x16xbf16>,
    %541 = arith.addi %0, %c3_i32_268 : i32
    %c3_i32_341 = arith.constant 3 : i32
    %542 = arith.addi %541, %c3_i32_341 : i32
    %c0_342 = arith.constant 0 : index
    %543 = arith.index_cast %542 : i32 to index
    %c0_343 = arith.constant 0 : index
    %c0_344 = arith.constant 0 : index
    %544 = vector.load %arg2[%c0_342, %543, %c0_343, %c0_344] : memref<1x11x11x16xbf16, #tpu.memory_space<vmem>>, vector<1x1x8x16xbf16>
    %545 = vector.shape_cast %544 : vector<1x1x8x16xbf16> to vector<1x8x16xbf16>
    %546 = vector.shape_cast %545 : vector<1x8x16xbf16> to vector<8x16xbf16>
    %c8_i32_345 = arith.constant 8 : i32
    %547 = arith.muli %c3_i32_268, %c8_i32_345 : i32
    %548 = arith.index_cast %547 : i32 to index
    %c192_346 = arith.constant 192 : index
    %549 = vector.load %arg6[%548, %c192_346] : memref<64x256xbf16, #tpu.memory_space<vmem>>, vector<8x16xbf16>
    tpu.vector_store %arg6[%548, %c192_346], %546 {strides = array<i32>} : memref<64x256xbf16, #tpu.memory_space<vmem>>, vector<8x16xbf16>,
    %550 = arith.addi %0, %c3_i32_268 : i32
    %c3_i32_347 = arith.constant 3 : i32
    %551 = arith.addi %550, %c3_i32_347 : i32
    %c0_348 = arith.constant 0 : index
    %552 = arith.index_cast %551 : i32 to index
    %c1_349 = arith.constant 1 : index
    %c0_350 = arith.constant 0 : index
    %553 = vector.load %arg2[%c0_348, %552, %c1_349, %c0_350] : memref<1x11x11x16xbf16, #tpu.memory_space<vmem>>, vector<1x1x8x16xbf16>
    %554 = vector.shape_cast %553 : vector<1x1x8x16xbf16> to vector<1x8x16xbf16>
    %555 = vector.shape_cast %554 : vector<1x8x16xbf16> to vector<8x16xbf16>
    %c8_i32_351 = arith.constant 8 : i32
    %556 = arith.muli %c3_i32_268, %c8_i32_351 : i32
    %557 = arith.index_cast %556 : i32 to index
    %c208_352 = arith.constant 208 : index
    %558 = vector.load %arg6[%557, %c208_352] : memref<64x256xbf16, #tpu.memory_space<vmem>>, vector<8x16xbf16>
    tpu.vector_store %arg6[%557, %c208_352], %555 {strides = array<i32>} : memref<64x256xbf16, #tpu.memory_space<vmem>>, vector<8x16xbf16>,
    %559 = arith.addi %0, %c3_i32_268 : i32
    %c3_i32_353 = arith.constant 3 : i32
    %560 = arith.addi %559, %c3_i32_353 : i32
    %c0_354 = arith.constant 0 : index
    %561 = arith.index_cast %560 : i32 to index
    %c2_355 = arith.constant 2 : index
    %c0_356 = arith.constant 0 : index
    %562 = vector.load %arg2[%c0_354, %561, %c2_355, %c0_356] : memref<1x11x11x16xbf16, #tpu.memory_space<vmem>>, vector<1x1x8x16xbf16>
    %563 = vector.shape_cast %562 : vector<1x1x8x16xbf16> to vector<1x8x16xbf16>
    %564 = vector.shape_cast %563 : vector<1x8x16xbf16> to vector<8x16xbf16>
    %c8_i32_357 = arith.constant 8 : i32
    %565 = arith.muli %c3_i32_268, %c8_i32_357 : i32
    %566 = arith.index_cast %565 : i32 to index
    %c224_358 = arith.constant 224 : index
    %567 = vector.load %arg6[%566, %c224_358] : memref<64x256xbf16, #tpu.memory_space<vmem>>, vector<8x16xbf16>
    tpu.vector_store %arg6[%566, %c224_358], %564 {strides = array<i32>} : memref<64x256xbf16, #tpu.memory_space<vmem>>, vector<8x16xbf16>,
    %568 = arith.addi %0, %c3_i32_268 : i32
    %c3_i32_359 = arith.constant 3 : i32
    %569 = arith.addi %568, %c3_i32_359 : i32
    %c0_360 = arith.constant 0 : index
    %570 = arith.index_cast %569 : i32 to index
    %c3_361 = arith.constant 3 : index
    %c0_362 = arith.constant 0 : index
    %571 = vector.load %arg2[%c0_360, %570, %c3_361, %c0_362] : memref<1x11x11x16xbf16, #tpu.memory_space<vmem>>, vector<1x1x8x16xbf16>
    %572 = vector.shape_cast %571 : vector<1x1x8x16xbf16> to vector<1x8x16xbf16>
    %573 = vector.shape_cast %572 : vector<1x8x16xbf16> to vector<8x16xbf16>
    %c8_i32_363 = arith.constant 8 : i32
    %574 = arith.muli %c3_i32_268, %c8_i32_363 : i32
    %575 = arith.index_cast %574 : i32 to index
    %c240_364 = arith.constant 240 : index
    %576 = vector.load %arg6[%575, %c240_364] : memref<64x256xbf16, #tpu.memory_space<vmem>>, vector<8x16xbf16>
    tpu.vector_store %arg6[%575, %c240_364], %573 {strides = array<i32>} : memref<64x256xbf16, #tpu.memory_space<vmem>>, vector<8x16xbf16>,
    %c4_i32 = arith.constant 4 : i32
    %577 = arith.addi %0, %c4_i32 : i32
    %c0_i32_365 = arith.constant 0 : i32
    %578 = arith.addi %577, %c0_i32_365 : i32
    %c0_366 = arith.constant 0 : index
    %579 = arith.index_cast %578 : i32 to index
    %c0_367 = arith.constant 0 : index
    %c0_368 = arith.constant 0 : index
    %580 = vector.load %arg2[%c0_366, %579, %c0_367, %c0_368] : memref<1x11x11x16xbf16, #tpu.memory_space<vmem>>, vector<1x1x8x16xbf16>
    %581 = vector.shape_cast %580 : vector<1x1x8x16xbf16> to vector<1x8x16xbf16>
    %582 = vector.shape_cast %581 : vector<1x8x16xbf16> to vector<8x16xbf16>
    %c8_i32_369 = arith.constant 8 : i32
    %583 = arith.muli %c4_i32, %c8_i32_369 : i32
    %584 = arith.index_cast %583 : i32 to index
    %c0_370 = arith.constant 0 : index
    %585 = vector.load %arg6[%584, %c0_370] : memref<64x256xbf16, #tpu.memory_space<vmem>>, vector<8x16xbf16>
    tpu.vector_store %arg6[%584, %c0_370], %582 {strides = array<i32>} : memref<64x256xbf16, #tpu.memory_space<vmem>>, vector<8x16xbf16>,
    %586 = arith.addi %0, %c4_i32 : i32
    %c0_i32_371 = arith.constant 0 : i32
    %587 = arith.addi %586, %c0_i32_371 : i32
    %c0_372 = arith.constant 0 : index
    %588 = arith.index_cast %587 : i32 to index
    %c1_373 = arith.constant 1 : index
    %c0_374 = arith.constant 0 : index
    %589 = vector.load %arg2[%c0_372, %588, %c1_373, %c0_374] : memref<1x11x11x16xbf16, #tpu.memory_space<vmem>>, vector<1x1x8x16xbf16>
    %590 = vector.shape_cast %589 : vector<1x1x8x16xbf16> to vector<1x8x16xbf16>
    %591 = vector.shape_cast %590 : vector<1x8x16xbf16> to vector<8x16xbf16>
    %c8_i32_375 = arith.constant 8 : i32
    %592 = arith.muli %c4_i32, %c8_i32_375 : i32
    %593 = arith.index_cast %592 : i32 to index
    %c16_376 = arith.constant 16 : index
    %594 = vector.load %arg6[%593, %c16_376] : memref<64x256xbf16, #tpu.memory_space<vmem>>, vector<8x16xbf16>
    tpu.vector_store %arg6[%593, %c16_376], %591 {strides = array<i32>} : memref<64x256xbf16, #tpu.memory_space<vmem>>, vector<8x16xbf16>,
    %595 = arith.addi %0, %c4_i32 : i32
    %c0_i32_377 = arith.constant 0 : i32
    %596 = arith.addi %595, %c0_i32_377 : i32
    %c0_378 = arith.constant 0 : index
    %597 = arith.index_cast %596 : i32 to index
    %c2_379 = arith.constant 2 : index
    %c0_380 = arith.constant 0 : index
    %598 = vector.load %arg2[%c0_378, %597, %c2_379, %c0_380] : memref<1x11x11x16xbf16, #tpu.memory_space<vmem>>, vector<1x1x8x16xbf16>
    %599 = vector.shape_cast %598 : vector<1x1x8x16xbf16> to vector<1x8x16xbf16>
    %600 = vector.shape_cast %599 : vector<1x8x16xbf16> to vector<8x16xbf16>
    %c8_i32_381 = arith.constant 8 : i32
    %601 = arith.muli %c4_i32, %c8_i32_381 : i32
    %602 = arith.index_cast %601 : i32 to index
    %c32_382 = arith.constant 32 : index
    %603 = vector.load %arg6[%602, %c32_382] : memref<64x256xbf16, #tpu.memory_space<vmem>>, vector<8x16xbf16>
    tpu.vector_store %arg6[%602, %c32_382], %600 {strides = array<i32>} : memref<64x256xbf16, #tpu.memory_space<vmem>>, vector<8x16xbf16>,
    %604 = arith.addi %0, %c4_i32 : i32
    %c0_i32_383 = arith.constant 0 : i32
    %605 = arith.addi %604, %c0_i32_383 : i32
    %c0_384 = arith.constant 0 : index
    %606 = arith.index_cast %605 : i32 to index
    %c3_385 = arith.constant 3 : index
    %c0_386 = arith.constant 0 : index
    %607 = vector.load %arg2[%c0_384, %606, %c3_385, %c0_386] : memref<1x11x11x16xbf16, #tpu.memory_space<vmem>>, vector<1x1x8x16xbf16>
    %608 = vector.shape_cast %607 : vector<1x1x8x16xbf16> to vector<1x8x16xbf16>
    %609 = vector.shape_cast %608 : vector<1x8x16xbf16> to vector<8x16xbf16>
    %c8_i32_387 = arith.constant 8 : i32
    %610 = arith.muli %c4_i32, %c8_i32_387 : i32
    %611 = arith.index_cast %610 : i32 to index
    %c48_388 = arith.constant 48 : index
    %612 = vector.load %arg6[%611, %c48_388] : memref<64x256xbf16, #tpu.memory_space<vmem>>, vector<8x16xbf16>
    tpu.vector_store %arg6[%611, %c48_388], %609 {strides = array<i32>} : memref<64x256xbf16, #tpu.memory_space<vmem>>, vector<8x16xbf16>,
    %613 = arith.addi %0, %c4_i32 : i32
    %c1_i32_389 = arith.constant 1 : i32
    %614 = arith.addi %613, %c1_i32_389 : i32
    %c0_390 = arith.constant 0 : index
    %615 = arith.index_cast %614 : i32 to index
    %c0_391 = arith.constant 0 : index
    %c0_392 = arith.constant 0 : index
    %616 = vector.load %arg2[%c0_390, %615, %c0_391, %c0_392] : memref<1x11x11x16xbf16, #tpu.memory_space<vmem>>, vector<1x1x8x16xbf16>
    %617 = vector.shape_cast %616 : vector<1x1x8x16xbf16> to vector<1x8x16xbf16>
    %618 = vector.shape_cast %617 : vector<1x8x16xbf16> to vector<8x16xbf16>
    %c8_i32_393 = arith.constant 8 : i32
    %619 = arith.muli %c4_i32, %c8_i32_393 : i32
    %620 = arith.index_cast %619 : i32 to index
    %c64_394 = arith.constant 64 : index
    %621 = vector.load %arg6[%620, %c64_394] : memref<64x256xbf16, #tpu.memory_space<vmem>>, vector<8x16xbf16>
    tpu.vector_store %arg6[%620, %c64_394], %618 {strides = array<i32>} : memref<64x256xbf16, #tpu.memory_space<vmem>>, vector<8x16xbf16>,
    %622 = arith.addi %0, %c4_i32 : i32
    %c1_i32_395 = arith.constant 1 : i32
    %623 = arith.addi %622, %c1_i32_395 : i32
    %c0_396 = arith.constant 0 : index
    %624 = arith.index_cast %623 : i32 to index
    %c1_397 = arith.constant 1 : index
    %c0_398 = arith.constant 0 : index
    %625 = vector.load %arg2[%c0_396, %624, %c1_397, %c0_398] : memref<1x11x11x16xbf16, #tpu.memory_space<vmem>>, vector<1x1x8x16xbf16>
    %626 = vector.shape_cast %625 : vector<1x1x8x16xbf16> to vector<1x8x16xbf16>
    %627 = vector.shape_cast %626 : vector<1x8x16xbf16> to vector<8x16xbf16>
    %c8_i32_399 = arith.constant 8 : i32
    %628 = arith.muli %c4_i32, %c8_i32_399 : i32
    %629 = arith.index_cast %628 : i32 to index
    %c80_400 = arith.constant 80 : index
    %630 = vector.load %arg6[%629, %c80_400] : memref<64x256xbf16, #tpu.memory_space<vmem>>, vector<8x16xbf16>
    tpu.vector_store %arg6[%629, %c80_400], %627 {strides = array<i32>} : memref<64x256xbf16, #tpu.memory_space<vmem>>, vector<8x16xbf16>,
    %631 = arith.addi %0, %c4_i32 : i32
    %c1_i32_401 = arith.constant 1 : i32
    %632 = arith.addi %631, %c1_i32_401 : i32
    %c0_402 = arith.constant 0 : index
    %633 = arith.index_cast %632 : i32 to index
    %c2_403 = arith.constant 2 : index
    %c0_404 = arith.constant 0 : index
    %634 = vector.load %arg2[%c0_402, %633, %c2_403, %c0_404] : memref<1x11x11x16xbf16, #tpu.memory_space<vmem>>, vector<1x1x8x16xbf16>
    %635 = vector.shape_cast %634 : vector<1x1x8x16xbf16> to vector<1x8x16xbf16>
    %636 = vector.shape_cast %635 : vector<1x8x16xbf16> to vector<8x16xbf16>
    %c8_i32_405 = arith.constant 8 : i32
    %637 = arith.muli %c4_i32, %c8_i32_405 : i32
    %638 = arith.index_cast %637 : i32 to index
    %c96_406 = arith.constant 96 : index
    %639 = vector.load %arg6[%638, %c96_406] : memref<64x256xbf16, #tpu.memory_space<vmem>>, vector<8x16xbf16>
    tpu.vector_store %arg6[%638, %c96_406], %636 {strides = array<i32>} : memref<64x256xbf16, #tpu.memory_space<vmem>>, vector<8x16xbf16>,
    %640 = arith.addi %0, %c4_i32 : i32
    %c1_i32_407 = arith.constant 1 : i32
    %641 = arith.addi %640, %c1_i32_407 : i32
    %c0_408 = arith.constant 0 : index
    %642 = arith.index_cast %641 : i32 to index
    %c3_409 = arith.constant 3 : index
    %c0_410 = arith.constant 0 : index
    %643 = vector.load %arg2[%c0_408, %642, %c3_409, %c0_410] : memref<1x11x11x16xbf16, #tpu.memory_space<vmem>>, vector<1x1x8x16xbf16>
    %644 = vector.shape_cast %643 : vector<1x1x8x16xbf16> to vector<1x8x16xbf16>
    %645 = vector.shape_cast %644 : vector<1x8x16xbf16> to vector<8x16xbf16>
    %c8_i32_411 = arith.constant 8 : i32
    %646 = arith.muli %c4_i32, %c8_i32_411 : i32
    %647 = arith.index_cast %646 : i32 to index
    %c112_412 = arith.constant 112 : index
    %648 = vector.load %arg6[%647, %c112_412] : memref<64x256xbf16, #tpu.memory_space<vmem>>, vector<8x16xbf16>
    tpu.vector_store %arg6[%647, %c112_412], %645 {strides = array<i32>} : memref<64x256xbf16, #tpu.memory_space<vmem>>, vector<8x16xbf16>,
    %649 = arith.addi %0, %c4_i32 : i32
    %c2_i32_413 = arith.constant 2 : i32
    %650 = arith.addi %649, %c2_i32_413 : i32
    %c0_414 = arith.constant 0 : index
    %651 = arith.index_cast %650 : i32 to index
    %c0_415 = arith.constant 0 : index
    %c0_416 = arith.constant 0 : index
    %652 = vector.load %arg2[%c0_414, %651, %c0_415, %c0_416] : memref<1x11x11x16xbf16, #tpu.memory_space<vmem>>, vector<1x1x8x16xbf16>
    %653 = vector.shape_cast %652 : vector<1x1x8x16xbf16> to vector<1x8x16xbf16>
    %654 = vector.shape_cast %653 : vector<1x8x16xbf16> to vector<8x16xbf16>
    %c8_i32_417 = arith.constant 8 : i32
    %655 = arith.muli %c4_i32, %c8_i32_417 : i32
    %656 = arith.index_cast %655 : i32 to index
    %c128_418 = arith.constant 128 : index
    %657 = vector.load %arg6[%656, %c128_418] : memref<64x256xbf16, #tpu.memory_space<vmem>>, vector<8x16xbf16>
    tpu.vector_store %arg6[%656, %c128_418], %654 {strides = array<i32>} : memref<64x256xbf16, #tpu.memory_space<vmem>>, vector<8x16xbf16>,
    %658 = arith.addi %0, %c4_i32 : i32
    %c2_i32_419 = arith.constant 2 : i32
    %659 = arith.addi %658, %c2_i32_419 : i32
    %c0_420 = arith.constant 0 : index
    %660 = arith.index_cast %659 : i32 to index
    %c1_421 = arith.constant 1 : index
    %c0_422 = arith.constant 0 : index
    %661 = vector.load %arg2[%c0_420, %660, %c1_421, %c0_422] : memref<1x11x11x16xbf16, #tpu.memory_space<vmem>>, vector<1x1x8x16xbf16>
    %662 = vector.shape_cast %661 : vector<1x1x8x16xbf16> to vector<1x8x16xbf16>
    %663 = vector.shape_cast %662 : vector<1x8x16xbf16> to vector<8x16xbf16>
    %c8_i32_423 = arith.constant 8 : i32
    %664 = arith.muli %c4_i32, %c8_i32_423 : i32
    %665 = arith.index_cast %664 : i32 to index
    %c144_424 = arith.constant 144 : index
    %666 = vector.load %arg6[%665, %c144_424] : memref<64x256xbf16, #tpu.memory_space<vmem>>, vector<8x16xbf16>
    tpu.vector_store %arg6[%665, %c144_424], %663 {strides = array<i32>} : memref<64x256xbf16, #tpu.memory_space<vmem>>, vector<8x16xbf16>,
    %667 = arith.addi %0, %c4_i32 : i32
    %c2_i32_425 = arith.constant 2 : i32
    %668 = arith.addi %667, %c2_i32_425 : i32
    %c0_426 = arith.constant 0 : index
    %669 = arith.index_cast %668 : i32 to index
    %c2_427 = arith.constant 2 : index
    %c0_428 = arith.constant 0 : index
    %670 = vector.load %arg2[%c0_426, %669, %c2_427, %c0_428] : memref<1x11x11x16xbf16, #tpu.memory_space<vmem>>, vector<1x1x8x16xbf16>
    %671 = vector.shape_cast %670 : vector<1x1x8x16xbf16> to vector<1x8x16xbf16>
    %672 = vector.shape_cast %671 : vector<1x8x16xbf16> to vector<8x16xbf16>
    %c8_i32_429 = arith.constant 8 : i32
    %673 = arith.muli %c4_i32, %c8_i32_429 : i32
    %674 = arith.index_cast %673 : i32 to index
    %c160_430 = arith.constant 160 : index
    %675 = vector.load %arg6[%674, %c160_430] : memref<64x256xbf16, #tpu.memory_space<vmem>>, vector<8x16xbf16>
    tpu.vector_store %arg6[%674, %c160_430], %672 {strides = array<i32>} : memref<64x256xbf16, #tpu.memory_space<vmem>>, vector<8x16xbf16>,
    %676 = arith.addi %0, %c4_i32 : i32
    %c2_i32_431 = arith.constant 2 : i32
    %677 = arith.addi %676, %c2_i32_431 : i32
    %c0_432 = arith.constant 0 : index
    %678 = arith.index_cast %677 : i32 to index
    %c3_433 = arith.constant 3 : index
    %c0_434 = arith.constant 0 : index
    %679 = vector.load %arg2[%c0_432, %678, %c3_433, %c0_434] : memref<1x11x11x16xbf16, #tpu.memory_space<vmem>>, vector<1x1x8x16xbf16>
    %680 = vector.shape_cast %679 : vector<1x1x8x16xbf16> to vector<1x8x16xbf16>
    %681 = vector.shape_cast %680 : vector<1x8x16xbf16> to vector<8x16xbf16>
    %c8_i32_435 = arith.constant 8 : i32
    %682 = arith.muli %c4_i32, %c8_i32_435 : i32
    %683 = arith.index_cast %682 : i32 to index
    %c176_436 = arith.constant 176 : index
    %684 = vector.load %arg6[%683, %c176_436] : memref<64x256xbf16, #tpu.memory_space<vmem>>, vector<8x16xbf16>
    tpu.vector_store %arg6[%683, %c176_436], %681 {strides = array<i32>} : memref<64x256xbf16, #tpu.memory_space<vmem>>, vector<8x16xbf16>,
    %685 = arith.addi %0, %c4_i32 : i32
    %c3_i32_437 = arith.constant 3 : i32
    %686 = arith.addi %685, %c3_i32_437 : i32
    %c0_438 = arith.constant 0 : index
    %687 = arith.index_cast %686 : i32 to index
    %c0_439 = arith.constant 0 : index
    %c0_440 = arith.constant 0 : index
    %688 = vector.load %arg2[%c0_438, %687, %c0_439, %c0_440] : memref<1x11x11x16xbf16, #tpu.memory_space<vmem>>, vector<1x1x8x16xbf16>
    %689 = vector.shape_cast %688 : vector<1x1x8x16xbf16> to vector<1x8x16xbf16>
    %690 = vector.shape_cast %689 : vector<1x8x16xbf16> to vector<8x16xbf16>
    %c8_i32_441 = arith.constant 8 : i32
    %691 = arith.muli %c4_i32, %c8_i32_441 : i32
    %692 = arith.index_cast %691 : i32 to index
    %c192_442 = arith.constant 192 : index
    %693 = vector.load %arg6[%692, %c192_442] : memref<64x256xbf16, #tpu.memory_space<vmem>>, vector<8x16xbf16>
    tpu.vector_store %arg6[%692, %c192_442], %690 {strides = array<i32>} : memref<64x256xbf16, #tpu.memory_space<vmem>>, vector<8x16xbf16>,
    %694 = arith.addi %0, %c4_i32 : i32
    %c3_i32_443 = arith.constant 3 : i32
    %695 = arith.addi %694, %c3_i32_443 : i32
    %c0_444 = arith.constant 0 : index
    %696 = arith.index_cast %695 : i32 to index
    %c1_445 = arith.constant 1 : index
    %c0_446 = arith.constant 0 : index
    %697 = vector.load %arg2[%c0_444, %696, %c1_445, %c0_446] : memref<1x11x11x16xbf16, #tpu.memory_space<vmem>>, vector<1x1x8x16xbf16>
    %698 = vector.shape_cast %697 : vector<1x1x8x16xbf16> to vector<1x8x16xbf16>
    %699 = vector.shape_cast %698 : vector<1x8x16xbf16> to vector<8x16xbf16>
    %c8_i32_447 = arith.constant 8 : i32
    %700 = arith.muli %c4_i32, %c8_i32_447 : i32
    %701 = arith.index_cast %700 : i32 to index
    %c208_448 = arith.constant 208 : index
    %702 = vector.load %arg6[%701, %c208_448] : memref<64x256xbf16, #tpu.memory_space<vmem>>, vector<8x16xbf16>
    tpu.vector_store %arg6[%701, %c208_448], %699 {strides = array<i32>} : memref<64x256xbf16, #tpu.memory_space<vmem>>, vector<8x16xbf16>,
    %703 = arith.addi %0, %c4_i32 : i32
    %c3_i32_449 = arith.constant 3 : i32
    %704 = arith.addi %703, %c3_i32_449 : i32
    %c0_450 = arith.constant 0 : index
    %705 = arith.index_cast %704 : i32 to index
    %c2_451 = arith.constant 2 : index
    %c0_452 = arith.constant 0 : index
    %706 = vector.load %arg2[%c0_450, %705, %c2_451, %c0_452] : memref<1x11x11x16xbf16, #tpu.memory_space<vmem>>, vector<1x1x8x16xbf16>
    %707 = vector.shape_cast %706 : vector<1x1x8x16xbf16> to vector<1x8x16xbf16>
    %708 = vector.shape_cast %707 : vector<1x8x16xbf16> to vector<8x16xbf16>
    %c8_i32_453 = arith.constant 8 : i32
    %709 = arith.muli %c4_i32, %c8_i32_453 : i32
    %710 = arith.index_cast %709 : i32 to index
    %c224_454 = arith.constant 224 : index
    %711 = vector.load %arg6[%710, %c224_454] : memref<64x256xbf16, #tpu.memory_space<vmem>>, vector<8x16xbf16>
    tpu.vector_store %arg6[%710, %c224_454], %708 {strides = array<i32>} : memref<64x256xbf16, #tpu.memory_space<vmem>>, vector<8x16xbf16>,
    %712 = arith.addi %0, %c4_i32 : i32
    %c3_i32_455 = arith.constant 3 : i32
    %713 = arith.addi %712, %c3_i32_455 : i32
    %c0_456 = arith.constant 0 : index
    %714 = arith.index_cast %713 : i32 to index
    %c3_457 = arith.constant 3 : index
    %c0_458 = arith.constant 0 : index
    %715 = vector.load %arg2[%c0_456, %714, %c3_457, %c0_458] : memref<1x11x11x16xbf16, #tpu.memory_space<vmem>>, vector<1x1x8x16xbf16>
    %716 = vector.shape_cast %715 : vector<1x1x8x16xbf16> to vector<1x8x16xbf16>
    %717 = vector.shape_cast %716 : vector<1x8x16xbf16> to vector<8x16xbf16>
    %c8_i32_459 = arith.constant 8 : i32
    %718 = arith.muli %c4_i32, %c8_i32_459 : i32
    %719 = arith.index_cast %718 : i32 to index
    %c240_460 = arith.constant 240 : index
    %720 = vector.load %arg6[%719, %c240_460] : memref<64x256xbf16, #tpu.memory_space<vmem>>, vector<8x16xbf16>
    tpu.vector_store %arg6[%719, %c240_460], %717 {strides = array<i32>} : memref<64x256xbf16, #tpu.memory_space<vmem>>, vector<8x16xbf16>,
    %c5_i32 = arith.constant 5 : i32
    %721 = arith.addi %0, %c5_i32 : i32
    %c0_i32_461 = arith.constant 0 : i32
    %722 = arith.addi %721, %c0_i32_461 : i32
    %c0_462 = arith.constant 0 : index
    %723 = arith.index_cast %722 : i32 to index
    %c0_463 = arith.constant 0 : index
    %c0_464 = arith.constant 0 : index
    %724 = vector.load %arg2[%c0_462, %723, %c0_463, %c0_464] : memref<1x11x11x16xbf16, #tpu.memory_space<vmem>>, vector<1x1x8x16xbf16>
    %725 = vector.shape_cast %724 : vector<1x1x8x16xbf16> to vector<1x8x16xbf16>
    %726 = vector.shape_cast %725 : vector<1x8x16xbf16> to vector<8x16xbf16>
    %c8_i32_465 = arith.constant 8 : i32
    %727 = arith.muli %c5_i32, %c8_i32_465 : i32
    %728 = arith.index_cast %727 : i32 to index
    %c0_466 = arith.constant 0 : index
    %729 = vector.load %arg6[%728, %c0_466] : memref<64x256xbf16, #tpu.memory_space<vmem>>, vector<8x16xbf16>
    tpu.vector_store %arg6[%728, %c0_466], %726 {strides = array<i32>} : memref<64x256xbf16, #tpu.memory_space<vmem>>, vector<8x16xbf16>,
    %730 = arith.addi %0, %c5_i32 : i32
    %c0_i32_467 = arith.constant 0 : i32
    %731 = arith.addi %730, %c0_i32_467 : i32
    %c0_468 = arith.constant 0 : index
    %732 = arith.index_cast %731 : i32 to index
    %c1_469 = arith.constant 1 : index
    %c0_470 = arith.constant 0 : index
    %733 = vector.load %arg2[%c0_468, %732, %c1_469, %c0_470] : memref<1x11x11x16xbf16, #tpu.memory_space<vmem>>, vector<1x1x8x16xbf16>
    %734 = vector.shape_cast %733 : vector<1x1x8x16xbf16> to vector<1x8x16xbf16>
    %735 = vector.shape_cast %734 : vector<1x8x16xbf16> to vector<8x16xbf16>
    %c8_i32_471 = arith.constant 8 : i32
    %736 = arith.muli %c5_i32, %c8_i32_471 : i32
    %737 = arith.index_cast %736 : i32 to index
    %c16_472 = arith.constant 16 : index
    %738 = vector.load %arg6[%737, %c16_472] : memref<64x256xbf16, #tpu.memory_space<vmem>>, vector<8x16xbf16>
    tpu.vector_store %arg6[%737, %c16_472], %735 {strides = array<i32>} : memref<64x256xbf16, #tpu.memory_space<vmem>>, vector<8x16xbf16>,
    %739 = arith.addi %0, %c5_i32 : i32
    %c0_i32_473 = arith.constant 0 : i32
    %740 = arith.addi %739, %c0_i32_473 : i32
    %c0_474 = arith.constant 0 : index
    %741 = arith.index_cast %740 : i32 to index
    %c2_475 = arith.constant 2 : index
    %c0_476 = arith.constant 0 : index
    %742 = vector.load %arg2[%c0_474, %741, %c2_475, %c0_476] : memref<1x11x11x16xbf16, #tpu.memory_space<vmem>>, vector<1x1x8x16xbf16>
    %743 = vector.shape_cast %742 : vector<1x1x8x16xbf16> to vector<1x8x16xbf16>
    %744 = vector.shape_cast %743 : vector<1x8x16xbf16> to vector<8x16xbf16>
    %c8_i32_477 = arith.constant 8 : i32
    %745 = arith.muli %c5_i32, %c8_i32_477 : i32
    %746 = arith.index_cast %745 : i32 to index
    %c32_478 = arith.constant 32 : index
    %747 = vector.load %arg6[%746, %c32_478] : memref<64x256xbf16, #tpu.memory_space<vmem>>, vector<8x16xbf16>
    tpu.vector_store %arg6[%746, %c32_478], %744 {strides = array<i32>} : memref<64x256xbf16, #tpu.memory_space<vmem>>, vector<8x16xbf16>,
    %748 = arith.addi %0, %c5_i32 : i32
    %c0_i32_479 = arith.constant 0 : i32
    %749 = arith.addi %748, %c0_i32_479 : i32
    %c0_480 = arith.constant 0 : index
    %750 = arith.index_cast %749 : i32 to index
    %c3_481 = arith.constant 3 : index
    %c0_482 = arith.constant 0 : index
    %751 = vector.load %arg2[%c0_480, %750, %c3_481, %c0_482] : memref<1x11x11x16xbf16, #tpu.memory_space<vmem>>, vector<1x1x8x16xbf16>
    %752 = vector.shape_cast %751 : vector<1x1x8x16xbf16> to vector<1x8x16xbf16>
    %753 = vector.shape_cast %752 : vector<1x8x16xbf16> to vector<8x16xbf16>
    %c8_i32_483 = arith.constant 8 : i32
    %754 = arith.muli %c5_i32, %c8_i32_483 : i32
    %755 = arith.index_cast %754 : i32 to index
    %c48_484 = arith.constant 48 : index
    %756 = vector.load %arg6[%755, %c48_484] : memref<64x256xbf16, #tpu.memory_space<vmem>>, vector<8x16xbf16>
    tpu.vector_store %arg6[%755, %c48_484], %753 {strides = array<i32>} : memref<64x256xbf16, #tpu.memory_space<vmem>>, vector<8x16xbf16>,
    %757 = arith.addi %0, %c5_i32 : i32
    %c1_i32_485 = arith.constant 1 : i32
    %758 = arith.addi %757, %c1_i32_485 : i32
    %c0_486 = arith.constant 0 : index
    %759 = arith.index_cast %758 : i32 to index
    %c0_487 = arith.constant 0 : index
    %c0_488 = arith.constant 0 : index
    %760 = vector.load %arg2[%c0_486, %759, %c0_487, %c0_488] : memref<1x11x11x16xbf16, #tpu.memory_space<vmem>>, vector<1x1x8x16xbf16>
    %761 = vector.shape_cast %760 : vector<1x1x8x16xbf16> to vector<1x8x16xbf16>
    %762 = vector.shape_cast %761 : vector<1x8x16xbf16> to vector<8x16xbf16>
    %c8_i32_489 = arith.constant 8 : i32
    %763 = arith.muli %c5_i32, %c8_i32_489 : i32
    %764 = arith.index_cast %763 : i32 to index
    %c64_490 = arith.constant 64 : index
    %765 = vector.load %arg6[%764, %c64_490] : memref<64x256xbf16, #tpu.memory_space<vmem>>, vector<8x16xbf16>
    tpu.vector_store %arg6[%764, %c64_490], %762 {strides = array<i32>} : memref<64x256xbf16, #tpu.memory_space<vmem>>, vector<8x16xbf16>,
    %766 = arith.addi %0, %c5_i32 : i32
    %c1_i32_491 = arith.constant 1 : i32
    %767 = arith.addi %766, %c1_i32_491 : i32
    %c0_492 = arith.constant 0 : index
    %768 = arith.index_cast %767 : i32 to index
    %c1_493 = arith.constant 1 : index
    %c0_494 = arith.constant 0 : index
    %769 = vector.load %arg2[%c0_492, %768, %c1_493, %c0_494] : memref<1x11x11x16xbf16, #tpu.memory_space<vmem>>, vector<1x1x8x16xbf16>
    %770 = vector.shape_cast %769 : vector<1x1x8x16xbf16> to vector<1x8x16xbf16>
    %771 = vector.shape_cast %770 : vector<1x8x16xbf16> to vector<8x16xbf16>
    %c8_i32_495 = arith.constant 8 : i32
    %772 = arith.muli %c5_i32, %c8_i32_495 : i32
    %773 = arith.index_cast %772 : i32 to index
    %c80_496 = arith.constant 80 : index
    %774 = vector.load %arg6[%773, %c80_496] : memref<64x256xbf16, #tpu.memory_space<vmem>>, vector<8x16xbf16>
    tpu.vector_store %arg6[%773, %c80_496], %771 {strides = array<i32>} : memref<64x256xbf16, #tpu.memory_space<vmem>>, vector<8x16xbf16>,
    %775 = arith.addi %0, %c5_i32 : i32
    %c1_i32_497 = arith.constant 1 : i32
    %776 = arith.addi %775, %c1_i32_497 : i32
    %c0_498 = arith.constant 0 : index
    %777 = arith.index_cast %776 : i32 to index
    %c2_499 = arith.constant 2 : index
    %c0_500 = arith.constant 0 : index
    %778 = vector.load %arg2[%c0_498, %777, %c2_499, %c0_500] : memref<1x11x11x16xbf16, #tpu.memory_space<vmem>>, vector<1x1x8x16xbf16>
    %779 = vector.shape_cast %778 : vector<1x1x8x16xbf16> to vector<1x8x16xbf16>
    %780 = vector.shape_cast %779 : vector<1x8x16xbf16> to vector<8x16xbf16>
    %c8_i32_501 = arith.constant 8 : i32
    %781 = arith.muli %c5_i32, %c8_i32_501 : i32
    %782 = arith.index_cast %781 : i32 to index
    %c96_502 = arith.constant 96 : index
    %783 = vector.load %arg6[%782, %c96_502] : memref<64x256xbf16, #tpu.memory_space<vmem>>, vector<8x16xbf16>
    tpu.vector_store %arg6[%782, %c96_502], %780 {strides = array<i32>} : memref<64x256xbf16, #tpu.memory_space<vmem>>, vector<8x16xbf16>,
    %784 = arith.addi %0, %c5_i32 : i32
    %c1_i32_503 = arith.constant 1 : i32
    %785 = arith.addi %784, %c1_i32_503 : i32
    %c0_504 = arith.constant 0 : index
    %786 = arith.index_cast %785 : i32 to index
    %c3_505 = arith.constant 3 : index
    %c0_506 = arith.constant 0 : index
    %787 = vector.load %arg2[%c0_504, %786, %c3_505, %c0_506] : memref<1x11x11x16xbf16, #tpu.memory_space<vmem>>, vector<1x1x8x16xbf16>
    %788 = vector.shape_cast %787 : vector<1x1x8x16xbf16> to vector<1x8x16xbf16>
    %789 = vector.shape_cast %788 : vector<1x8x16xbf16> to vector<8x16xbf16>
    %c8_i32_507 = arith.constant 8 : i32
    %790 = arith.muli %c5_i32, %c8_i32_507 : i32
    %791 = arith.index_cast %790 : i32 to index
    %c112_508 = arith.constant 112 : index
    %792 = vector.load %arg6[%791, %c112_508] : memref<64x256xbf16, #tpu.memory_space<vmem>>, vector<8x16xbf16>
    tpu.vector_store %arg6[%791, %c112_508], %789 {strides = array<i32>} : memref<64x256xbf16, #tpu.memory_space<vmem>>, vector<8x16xbf16>,
    %793 = arith.addi %0, %c5_i32 : i32
    %c2_i32_509 = arith.constant 2 : i32
    %794 = arith.addi %793, %c2_i32_509 : i32
    %c0_510 = arith.constant 0 : index
    %795 = arith.index_cast %794 : i32 to index
    %c0_511 = arith.constant 0 : index
    %c0_512 = arith.constant 0 : index
    %796 = vector.load %arg2[%c0_510, %795, %c0_511, %c0_512] : memref<1x11x11x16xbf16, #tpu.memory_space<vmem>>, vector<1x1x8x16xbf16>
    %797 = vector.shape_cast %796 : vector<1x1x8x16xbf16> to vector<1x8x16xbf16>
    %798 = vector.shape_cast %797 : vector<1x8x16xbf16> to vector<8x16xbf16>
    %c8_i32_513 = arith.constant 8 : i32
    %799 = arith.muli %c5_i32, %c8_i32_513 : i32
    %800 = arith.index_cast %799 : i32 to index
    %c128_514 = arith.constant 128 : index
    %801 = vector.load %arg6[%800, %c128_514] : memref<64x256xbf16, #tpu.memory_space<vmem>>, vector<8x16xbf16>
    tpu.vector_store %arg6[%800, %c128_514], %798 {strides = array<i32>} : memref<64x256xbf16, #tpu.memory_space<vmem>>, vector<8x16xbf16>,
    %802 = arith.addi %0, %c5_i32 : i32
    %c2_i32_515 = arith.constant 2 : i32
    %803 = arith.addi %802, %c2_i32_515 : i32
    %c0_516 = arith.constant 0 : index
    %804 = arith.index_cast %803 : i32 to index
    %c1_517 = arith.constant 1 : index
    %c0_518 = arith.constant 0 : index
    %805 = vector.load %arg2[%c0_516, %804, %c1_517, %c0_518] : memref<1x11x11x16xbf16, #tpu.memory_space<vmem>>, vector<1x1x8x16xbf16>
    %806 = vector.shape_cast %805 : vector<1x1x8x16xbf16> to vector<1x8x16xbf16>
    %807 = vector.shape_cast %806 : vector<1x8x16xbf16> to vector<8x16xbf16>
    %c8_i32_519 = arith.constant 8 : i32
    %808 = arith.muli %c5_i32, %c8_i32_519 : i32
    %809 = arith.index_cast %808 : i32 to index
    %c144_520 = arith.constant 144 : index
    %810 = vector.load %arg6[%809, %c144_520] : memref<64x256xbf16, #tpu.memory_space<vmem>>, vector<8x16xbf16>
    tpu.vector_store %arg6[%809, %c144_520], %807 {strides = array<i32>} : memref<64x256xbf16, #tpu.memory_space<vmem>>, vector<8x16xbf16>,
    %811 = arith.addi %0, %c5_i32 : i32
    %c2_i32_521 = arith.constant 2 : i32
    %812 = arith.addi %811, %c2_i32_521 : i32
    %c0_522 = arith.constant 0 : index
    %813 = arith.index_cast %812 : i32 to index
    %c2_523 = arith.constant 2 : index
    %c0_524 = arith.constant 0 : index
    %814 = vector.load %arg2[%c0_522, %813, %c2_523, %c0_524] : memref<1x11x11x16xbf16, #tpu.memory_space<vmem>>, vector<1x1x8x16xbf16>
    %815 = vector.shape_cast %814 : vector<1x1x8x16xbf16> to vector<1x8x16xbf16>
    %816 = vector.shape_cast %815 : vector<1x8x16xbf16> to vector<8x16xbf16>
    %c8_i32_525 = arith.constant 8 : i32
    %817 = arith.muli %c5_i32, %c8_i32_525 : i32
    %818 = arith.index_cast %817 : i32 to index
    %c160_526 = arith.constant 160 : index
    %819 = vector.load %arg6[%818, %c160_526] : memref<64x256xbf16, #tpu.memory_space<vmem>>, vector<8x16xbf16>
    tpu.vector_store %arg6[%818, %c160_526], %816 {strides = array<i32>} : memref<64x256xbf16, #tpu.memory_space<vmem>>, vector<8x16xbf16>,
    %820 = arith.addi %0, %c5_i32 : i32
    %c2_i32_527 = arith.constant 2 : i32
    %821 = arith.addi %820, %c2_i32_527 : i32
    %c0_528 = arith.constant 0 : index
    %822 = arith.index_cast %821 : i32 to index
    %c3_529 = arith.constant 3 : index
    %c0_530 = arith.constant 0 : index
    %823 = vector.load %arg2[%c0_528, %822, %c3_529, %c0_530] : memref<1x11x11x16xbf16, #tpu.memory_space<vmem>>, vector<1x1x8x16xbf16>
    %824 = vector.shape_cast %823 : vector<1x1x8x16xbf16> to vector<1x8x16xbf16>
    %825 = vector.shape_cast %824 : vector<1x8x16xbf16> to vector<8x16xbf16>
    %c8_i32_531 = arith.constant 8 : i32
    %826 = arith.muli %c5_i32, %c8_i32_531 : i32
    %827 = arith.index_cast %826 : i32 to index
    %c176_532 = arith.constant 176 : index
    %828 = vector.load %arg6[%827, %c176_532] : memref<64x256xbf16, #tpu.memory_space<vmem>>, vector<8x16xbf16>
    tpu.vector_store %arg6[%827, %c176_532], %825 {strides = array<i32>} : memref<64x256xbf16, #tpu.memory_space<vmem>>, vector<8x16xbf16>,
    %829 = arith.addi %0, %c5_i32 : i32
    %c3_i32_533 = arith.constant 3 : i32
    %830 = arith.addi %829, %c3_i32_533 : i32
    %c0_534 = arith.constant 0 : index
    %831 = arith.index_cast %830 : i32 to index
    %c0_535 = arith.constant 0 : index
    %c0_536 = arith.constant 0 : index
    %832 = vector.load %arg2[%c0_534, %831, %c0_535, %c0_536] : memref<1x11x11x16xbf16, #tpu.memory_space<vmem>>, vector<1x1x8x16xbf16>
    %833 = vector.shape_cast %832 : vector<1x1x8x16xbf16> to vector<1x8x16xbf16>
    %834 = vector.shape_cast %833 : vector<1x8x16xbf16> to vector<8x16xbf16>
    %c8_i32_537 = arith.constant 8 : i32
    %835 = arith.muli %c5_i32, %c8_i32_537 : i32
    %836 = arith.index_cast %835 : i32 to index
    %c192_538 = arith.constant 192 : index
    %837 = vector.load %arg6[%836, %c192_538] : memref<64x256xbf16, #tpu.memory_space<vmem>>, vector<8x16xbf16>
    tpu.vector_store %arg6[%836, %c192_538], %834 {strides = array<i32>} : memref<64x256xbf16, #tpu.memory_space<vmem>>, vector<8x16xbf16>,
    %838 = arith.addi %0, %c5_i32 : i32
    %c3_i32_539 = arith.constant 3 : i32
    %839 = arith.addi %838, %c3_i32_539 : i32
    %c0_540 = arith.constant 0 : index
    %840 = arith.index_cast %839 : i32 to index
    %c1_541 = arith.constant 1 : index
    %c0_542 = arith.constant 0 : index
    %841 = vector.load %arg2[%c0_540, %840, %c1_541, %c0_542] : memref<1x11x11x16xbf16, #tpu.memory_space<vmem>>, vector<1x1x8x16xbf16>
    %842 = vector.shape_cast %841 : vector<1x1x8x16xbf16> to vector<1x8x16xbf16>
    %843 = vector.shape_cast %842 : vector<1x8x16xbf16> to vector<8x16xbf16>
    %c8_i32_543 = arith.constant 8 : i32
    %844 = arith.muli %c5_i32, %c8_i32_543 : i32
    %845 = arith.index_cast %844 : i32 to index
    %c208_544 = arith.constant 208 : index
    %846 = vector.load %arg6[%845, %c208_544] : memref<64x256xbf16, #tpu.memory_space<vmem>>, vector<8x16xbf16>
    tpu.vector_store %arg6[%845, %c208_544], %843 {strides = array<i32>} : memref<64x256xbf16, #tpu.memory_space<vmem>>, vector<8x16xbf16>,
    %847 = arith.addi %0, %c5_i32 : i32
    %c3_i32_545 = arith.constant 3 : i32
    %848 = arith.addi %847, %c3_i32_545 : i32
    %c0_546 = arith.constant 0 : index
    %849 = arith.index_cast %848 : i32 to index
    %c2_547 = arith.constant 2 : index
    %c0_548 = arith.constant 0 : index
    %850 = vector.load %arg2[%c0_546, %849, %c2_547, %c0_548] : memref<1x11x11x16xbf16, #tpu.memory_space<vmem>>, vector<1x1x8x16xbf16>
    %851 = vector.shape_cast %850 : vector<1x1x8x16xbf16> to vector<1x8x16xbf16>
    %852 = vector.shape_cast %851 : vector<1x8x16xbf16> to vector<8x16xbf16>
    %c8_i32_549 = arith.constant 8 : i32
    %853 = arith.muli %c5_i32, %c8_i32_549 : i32
    %854 = arith.index_cast %853 : i32 to index
    %c224_550 = arith.constant 224 : index
    %855 = vector.load %arg6[%854, %c224_550] : memref<64x256xbf16, #tpu.memory_space<vmem>>, vector<8x16xbf16>
    tpu.vector_store %arg6[%854, %c224_550], %852 {strides = array<i32>} : memref<64x256xbf16, #tpu.memory_space<vmem>>, vector<8x16xbf16>,
    %856 = arith.addi %0, %c5_i32 : i32
    %c3_i32_551 = arith.constant 3 : i32
    %857 = arith.addi %856, %c3_i32_551 : i32
    %c0_552 = arith.constant 0 : index
    %858 = arith.index_cast %857 : i32 to index
    %c3_553 = arith.constant 3 : index
    %c0_554 = arith.constant 0 : index
    %859 = vector.load %arg2[%c0_552, %858, %c3_553, %c0_554] : memref<1x11x11x16xbf16, #tpu.memory_space<vmem>>, vector<1x1x8x16xbf16>
    %860 = vector.shape_cast %859 : vector<1x1x8x16xbf16> to vector<1x8x16xbf16>
    %861 = vector.shape_cast %860 : vector<1x8x16xbf16> to vector<8x16xbf16>
    %c8_i32_555 = arith.constant 8 : i32
    %862 = arith.muli %c5_i32, %c8_i32_555 : i32
    %863 = arith.index_cast %862 : i32 to index
    %c240_556 = arith.constant 240 : index
    %864 = vector.load %arg6[%863, %c240_556] : memref<64x256xbf16, #tpu.memory_space<vmem>>, vector<8x16xbf16>
    tpu.vector_store %arg6[%863, %c240_556], %861 {strides = array<i32>} : memref<64x256xbf16, #tpu.memory_space<vmem>>, vector<8x16xbf16>,
    %c6_i32 = arith.constant 6 : i32
    %865 = arith.addi %0, %c6_i32 : i32
    %c0_i32_557 = arith.constant 0 : i32
    %866 = arith.addi %865, %c0_i32_557 : i32
    %c0_558 = arith.constant 0 : index
    %867 = arith.index_cast %866 : i32 to index
    %c0_559 = arith.constant 0 : index
    %c0_560 = arith.constant 0 : index
    %868 = vector.load %arg2[%c0_558, %867, %c0_559, %c0_560] : memref<1x11x11x16xbf16, #tpu.memory_space<vmem>>, vector<1x1x8x16xbf16>
    %869 = vector.shape_cast %868 : vector<1x1x8x16xbf16> to vector<1x8x16xbf16>
    %870 = vector.shape_cast %869 : vector<1x8x16xbf16> to vector<8x16xbf16>
    %c8_i32_561 = arith.constant 8 : i32
    %871 = arith.muli %c6_i32, %c8_i32_561 : i32
    %872 = arith.index_cast %871 : i32 to index
    %c0_562 = arith.constant 0 : index
    %873 = vector.load %arg6[%872, %c0_562] : memref<64x256xbf16, #tpu.memory_space<vmem>>, vector<8x16xbf16>
    tpu.vector_store %arg6[%872, %c0_562], %870 {strides = array<i32>} : memref<64x256xbf16, #tpu.memory_space<vmem>>, vector<8x16xbf16>,
    %874 = arith.addi %0, %c6_i32 : i32
    %c0_i32_563 = arith.constant 0 : i32
    %875 = arith.addi %874, %c0_i32_563 : i32
    %c0_564 = arith.constant 0 : index
    %876 = arith.index_cast %875 : i32 to index
    %c1_565 = arith.constant 1 : index
    %c0_566 = arith.constant 0 : index
    %877 = vector.load %arg2[%c0_564, %876, %c1_565, %c0_566] : memref<1x11x11x16xbf16, #tpu.memory_space<vmem>>, vector<1x1x8x16xbf16>
    %878 = vector.shape_cast %877 : vector<1x1x8x16xbf16> to vector<1x8x16xbf16>
    %879 = vector.shape_cast %878 : vector<1x8x16xbf16> to vector<8x16xbf16>
    %c8_i32_567 = arith.constant 8 : i32
    %880 = arith.muli %c6_i32, %c8_i32_567 : i32
    %881 = arith.index_cast %880 : i32 to index
    %c16_568 = arith.constant 16 : index
    %882 = vector.load %arg6[%881, %c16_568] : memref<64x256xbf16, #tpu.memory_space<vmem>>, vector<8x16xbf16>
    tpu.vector_store %arg6[%881, %c16_568], %879 {strides = array<i32>} : memref<64x256xbf16, #tpu.memory_space<vmem>>, vector<8x16xbf16>,
    %883 = arith.addi %0, %c6_i32 : i32
    %c0_i32_569 = arith.constant 0 : i32
    %884 = arith.addi %883, %c0_i32_569 : i32
    %c0_570 = arith.constant 0 : index
    %885 = arith.index_cast %884 : i32 to index
    %c2_571 = arith.constant 2 : index
    %c0_572 = arith.constant 0 : index
    %886 = vector.load %arg2[%c0_570, %885, %c2_571, %c0_572] : memref<1x11x11x16xbf16, #tpu.memory_space<vmem>>, vector<1x1x8x16xbf16>
    %887 = vector.shape_cast %886 : vector<1x1x8x16xbf16> to vector<1x8x16xbf16>
    %888 = vector.shape_cast %887 : vector<1x8x16xbf16> to vector<8x16xbf16>
    %c8_i32_573 = arith.constant 8 : i32
    %889 = arith.muli %c6_i32, %c8_i32_573 : i32
    %890 = arith.index_cast %889 : i32 to index
    %c32_574 = arith.constant 32 : index
    %891 = vector.load %arg6[%890, %c32_574] : memref<64x256xbf16, #tpu.memory_space<vmem>>, vector<8x16xbf16>
    tpu.vector_store %arg6[%890, %c32_574], %888 {strides = array<i32>} : memref<64x256xbf16, #tpu.memory_space<vmem>>, vector<8x16xbf16>,
    %892 = arith.addi %0, %c6_i32 : i32
    %c0_i32_575 = arith.constant 0 : i32
    %893 = arith.addi %892, %c0_i32_575 : i32
    %c0_576 = arith.constant 0 : index
    %894 = arith.index_cast %893 : i32 to index
    %c3_577 = arith.constant 3 : index
    %c0_578 = arith.constant 0 : index
    %895 = vector.load %arg2[%c0_576, %894, %c3_577, %c0_578] : memref<1x11x11x16xbf16, #tpu.memory_space<vmem>>, vector<1x1x8x16xbf16>
    %896 = vector.shape_cast %895 : vector<1x1x8x16xbf16> to vector<1x8x16xbf16>
    %897 = vector.shape_cast %896 : vector<1x8x16xbf16> to vector<8x16xbf16>
    %c8_i32_579 = arith.constant 8 : i32
    %898 = arith.muli %c6_i32, %c8_i32_579 : i32
    %899 = arith.index_cast %898 : i32 to index
    %c48_580 = arith.constant 48 : index
    %900 = vector.load %arg6[%899, %c48_580] : memref<64x256xbf16, #tpu.memory_space<vmem>>, vector<8x16xbf16>
    tpu.vector_store %arg6[%899, %c48_580], %897 {strides = array<i32>} : memref<64x256xbf16, #tpu.memory_space<vmem>>, vector<8x16xbf16>,
    %901 = arith.addi %0, %c6_i32 : i32
    %c1_i32_581 = arith.constant 1 : i32
    %902 = arith.addi %901, %c1_i32_581 : i32
    %c0_582 = arith.constant 0 : index
    %903 = arith.index_cast %902 : i32 to index
    %c0_583 = arith.constant 0 : index
    %c0_584 = arith.constant 0 : index
    %904 = vector.load %arg2[%c0_582, %903, %c0_583, %c0_584] : memref<1x11x11x16xbf16, #tpu.memory_space<vmem>>, vector<1x1x8x16xbf16>
    %905 = vector.shape_cast %904 : vector<1x1x8x16xbf16> to vector<1x8x16xbf16>
    %906 = vector.shape_cast %905 : vector<1x8x16xbf16> to vector<8x16xbf16>
    %c8_i32_585 = arith.constant 8 : i32
    %907 = arith.muli %c6_i32, %c8_i32_585 : i32
    %908 = arith.index_cast %907 : i32 to index
    %c64_586 = arith.constant 64 : index
    %909 = vector.load %arg6[%908, %c64_586] : memref<64x256xbf16, #tpu.memory_space<vmem>>, vector<8x16xbf16>
    tpu.vector_store %arg6[%908, %c64_586], %906 {strides = array<i32>} : memref<64x256xbf16, #tpu.memory_space<vmem>>, vector<8x16xbf16>,
    %910 = arith.addi %0, %c6_i32 : i32
    %c1_i32_587 = arith.constant 1 : i32
    %911 = arith.addi %910, %c1_i32_587 : i32
    %c0_588 = arith.constant 0 : index
    %912 = arith.index_cast %911 : i32 to index
    %c1_589 = arith.constant 1 : index
    %c0_590 = arith.constant 0 : index
    %913 = vector.load %arg2[%c0_588, %912, %c1_589, %c0_590] : memref<1x11x11x16xbf16, #tpu.memory_space<vmem>>, vector<1x1x8x16xbf16>
    %914 = vector.shape_cast %913 : vector<1x1x8x16xbf16> to vector<1x8x16xbf16>
    %915 = vector.shape_cast %914 : vector<1x8x16xbf16> to vector<8x16xbf16>
    %c8_i32_591 = arith.constant 8 : i32
    %916 = arith.muli %c6_i32, %c8_i32_591 : i32
    %917 = arith.index_cast %916 : i32 to index
    %c80_592 = arith.constant 80 : index
    %918 = vector.load %arg6[%917, %c80_592] : memref<64x256xbf16, #tpu.memory_space<vmem>>, vector<8x16xbf16>
    tpu.vector_store %arg6[%917, %c80_592], %915 {strides = array<i32>} : memref<64x256xbf16, #tpu.memory_space<vmem>>, vector<8x16xbf16>,
    %919 = arith.addi %0, %c6_i32 : i32
    %c1_i32_593 = arith.constant 1 : i32
    %920 = arith.addi %919, %c1_i32_593 : i32
    %c0_594 = arith.constant 0 : index
    %921 = arith.index_cast %920 : i32 to index
    %c2_595 = arith.constant 2 : index
    %c0_596 = arith.constant 0 : index
    %922 = vector.load %arg2[%c0_594, %921, %c2_595, %c0_596] : memref<1x11x11x16xbf16, #tpu.memory_space<vmem>>, vector<1x1x8x16xbf16>
    %923 = vector.shape_cast %922 : vector<1x1x8x16xbf16> to vector<1x8x16xbf16>
    %924 = vector.shape_cast %923 : vector<1x8x16xbf16> to vector<8x16xbf16>
    %c8_i32_597 = arith.constant 8 : i32
    %925 = arith.muli %c6_i32, %c8_i32_597 : i32
    %926 = arith.index_cast %925 : i32 to index
    %c96_598 = arith.constant 96 : index
    %927 = vector.load %arg6[%926, %c96_598] : memref<64x256xbf16, #tpu.memory_space<vmem>>, vector<8x16xbf16>
    tpu.vector_store %arg6[%926, %c96_598], %924 {strides = array<i32>} : memref<64x256xbf16, #tpu.memory_space<vmem>>, vector<8x16xbf16>,
    %928 = arith.addi %0, %c6_i32 : i32
    %c1_i32_599 = arith.constant 1 : i32
    %929 = arith.addi %928, %c1_i32_599 : i32
    %c0_600 = arith.constant 0 : index
    %930 = arith.index_cast %929 : i32 to index
    %c3_601 = arith.constant 3 : index
    %c0_602 = arith.constant 0 : index
    %931 = vector.load %arg2[%c0_600, %930, %c3_601, %c0_602] : memref<1x11x11x16xbf16, #tpu.memory_space<vmem>>, vector<1x1x8x16xbf16>
    %932 = vector.shape_cast %931 : vector<1x1x8x16xbf16> to vector<1x8x16xbf16>
    %933 = vector.shape_cast %932 : vector<1x8x16xbf16> to vector<8x16xbf16>
    %c8_i32_603 = arith.constant 8 : i32
    %934 = arith.muli %c6_i32, %c8_i32_603 : i32
    %935 = arith.index_cast %934 : i32 to index
    %c112_604 = arith.constant 112 : index
    %936 = vector.load %arg6[%935, %c112_604] : memref<64x256xbf16, #tpu.memory_space<vmem>>, vector<8x16xbf16>
    tpu.vector_store %arg6[%935, %c112_604], %933 {strides = array<i32>} : memref<64x256xbf16, #tpu.memory_space<vmem>>, vector<8x16xbf16>,
    %937 = arith.addi %0, %c6_i32 : i32
    %c2_i32_605 = arith.constant 2 : i32
    %938 = arith.addi %937, %c2_i32_605 : i32
    %c0_606 = arith.constant 0 : index
    %939 = arith.index_cast %938 : i32 to index
    %c0_607 = arith.constant 0 : index
    %c0_608 = arith.constant 0 : index
    %940 = vector.load %arg2[%c0_606, %939, %c0_607, %c0_608] : memref<1x11x11x16xbf16, #tpu.memory_space<vmem>>, vector<1x1x8x16xbf16>
    %941 = vector.shape_cast %940 : vector<1x1x8x16xbf16> to vector<1x8x16xbf16>
    %942 = vector.shape_cast %941 : vector<1x8x16xbf16> to vector<8x16xbf16>
    %c8_i32_609 = arith.constant 8 : i32
    %943 = arith.muli %c6_i32, %c8_i32_609 : i32
    %944 = arith.index_cast %943 : i32 to index
    %c128_610 = arith.constant 128 : index
    %945 = vector.load %arg6[%944, %c128_610] : memref<64x256xbf16, #tpu.memory_space<vmem>>, vector<8x16xbf16>
    tpu.vector_store %arg6[%944, %c128_610], %942 {strides = array<i32>} : memref<64x256xbf16, #tpu.memory_space<vmem>>, vector<8x16xbf16>,
    %946 = arith.addi %0, %c6_i32 : i32
    %c2_i32_611 = arith.constant 2 : i32
    %947 = arith.addi %946, %c2_i32_611 : i32
    %c0_612 = arith.constant 0 : index
    %948 = arith.index_cast %947 : i32 to index
    %c1_613 = arith.constant 1 : index
    %c0_614 = arith.constant 0 : index
    %949 = vector.load %arg2[%c0_612, %948, %c1_613, %c0_614] : memref<1x11x11x16xbf16, #tpu.memory_space<vmem>>, vector<1x1x8x16xbf16>
    %950 = vector.shape_cast %949 : vector<1x1x8x16xbf16> to vector<1x8x16xbf16>
    %951 = vector.shape_cast %950 : vector<1x8x16xbf16> to vector<8x16xbf16>
    %c8_i32_615 = arith.constant 8 : i32
    %952 = arith.muli %c6_i32, %c8_i32_615 : i32
    %953 = arith.index_cast %952 : i32 to index
    %c144_616 = arith.constant 144 : index
    %954 = vector.load %arg6[%953, %c144_616] : memref<64x256xbf16, #tpu.memory_space<vmem>>, vector<8x16xbf16>
    tpu.vector_store %arg6[%953, %c144_616], %951 {strides = array<i32>} : memref<64x256xbf16, #tpu.memory_space<vmem>>, vector<8x16xbf16>,
    %955 = arith.addi %0, %c6_i32 : i32
    %c2_i32_617 = arith.constant 2 : i32
    %956 = arith.addi %955, %c2_i32_617 : i32
    %c0_618 = arith.constant 0 : index
    %957 = arith.index_cast %956 : i32 to index
    %c2_619 = arith.constant 2 : index
    %c0_620 = arith.constant 0 : index
    %958 = vector.load %arg2[%c0_618, %957, %c2_619, %c0_620] : memref<1x11x11x16xbf16, #tpu.memory_space<vmem>>, vector<1x1x8x16xbf16>
    %959 = vector.shape_cast %958 : vector<1x1x8x16xbf16> to vector<1x8x16xbf16>
    %960 = vector.shape_cast %959 : vector<1x8x16xbf16> to vector<8x16xbf16>
    %c8_i32_621 = arith.constant 8 : i32
    %961 = arith.muli %c6_i32, %c8_i32_621 : i32
    %962 = arith.index_cast %961 : i32 to index
    %c160_622 = arith.constant 160 : index
    %963 = vector.load %arg6[%962, %c160_622] : memref<64x256xbf16, #tpu.memory_space<vmem>>, vector<8x16xbf16>
    tpu.vector_store %arg6[%962, %c160_622], %960 {strides = array<i32>} : memref<64x256xbf16, #tpu.memory_space<vmem>>, vector<8x16xbf16>,
    %964 = arith.addi %0, %c6_i32 : i32
    %c2_i32_623 = arith.constant 2 : i32
    %965 = arith.addi %964, %c2_i32_623 : i32
    %c0_624 = arith.constant 0 : index
    %966 = arith.index_cast %965 : i32 to index
    %c3_625 = arith.constant 3 : index
    %c0_626 = arith.constant 0 : index
    %967 = vector.load %arg2[%c0_624, %966, %c3_625, %c0_626] : memref<1x11x11x16xbf16, #tpu.memory_space<vmem>>, vector<1x1x8x16xbf16>
    %968 = vector.shape_cast %967 : vector<1x1x8x16xbf16> to vector<1x8x16xbf16>
    %969 = vector.shape_cast %968 : vector<1x8x16xbf16> to vector<8x16xbf16>
    %c8_i32_627 = arith.constant 8 : i32
    %970 = arith.muli %c6_i32, %c8_i32_627 : i32
    %971 = arith.index_cast %970 : i32 to index
    %c176_628 = arith.constant 176 : index
    %972 = vector.load %arg6[%971, %c176_628] : memref<64x256xbf16, #tpu.memory_space<vmem>>, vector<8x16xbf16>
    tpu.vector_store %arg6[%971, %c176_628], %969 {strides = array<i32>} : memref<64x256xbf16, #tpu.memory_space<vmem>>, vector<8x16xbf16>,
    %973 = arith.addi %0, %c6_i32 : i32
    %c3_i32_629 = arith.constant 3 : i32
    %974 = arith.addi %973, %c3_i32_629 : i32
    %c0_630 = arith.constant 0 : index
    %975 = arith.index_cast %974 : i32 to index
    %c0_631 = arith.constant 0 : index
    %c0_632 = arith.constant 0 : index
    %976 = vector.load %arg2[%c0_630, %975, %c0_631, %c0_632] : memref<1x11x11x16xbf16, #tpu.memory_space<vmem>>, vector<1x1x8x16xbf16>
    %977 = vector.shape_cast %976 : vector<1x1x8x16xbf16> to vector<1x8x16xbf16>
    %978 = vector.shape_cast %977 : vector<1x8x16xbf16> to vector<8x16xbf16>
    %c8_i32_633 = arith.constant 8 : i32
    %979 = arith.muli %c6_i32, %c8_i32_633 : i32
    %980 = arith.index_cast %979 : i32 to index
    %c192_634 = arith.constant 192 : index
    %981 = vector.load %arg6[%980, %c192_634] : memref<64x256xbf16, #tpu.memory_space<vmem>>, vector<8x16xbf16>
    tpu.vector_store %arg6[%980, %c192_634], %978 {strides = array<i32>} : memref<64x256xbf16, #tpu.memory_space<vmem>>, vector<8x16xbf16>,
    %982 = arith.addi %0, %c6_i32 : i32
    %c3_i32_635 = arith.constant 3 : i32
    %983 = arith.addi %982, %c3_i32_635 : i32
    %c0_636 = arith.constant 0 : index
    %984 = arith.index_cast %983 : i32 to index
    %c1_637 = arith.constant 1 : index
    %c0_638 = arith.constant 0 : index
    %985 = vector.load %arg2[%c0_636, %984, %c1_637, %c0_638] : memref<1x11x11x16xbf16, #tpu.memory_space<vmem>>, vector<1x1x8x16xbf16>
    %986 = vector.shape_cast %985 : vector<1x1x8x16xbf16> to vector<1x8x16xbf16>
    %987 = vector.shape_cast %986 : vector<1x8x16xbf16> to vector<8x16xbf16>
    %c8_i32_639 = arith.constant 8 : i32
    %988 = arith.muli %c6_i32, %c8_i32_639 : i32
    %989 = arith.index_cast %988 : i32 to index
    %c208_640 = arith.constant 208 : index
    %990 = vector.load %arg6[%989, %c208_640] : memref<64x256xbf16, #tpu.memory_space<vmem>>, vector<8x16xbf16>
    tpu.vector_store %arg6[%989, %c208_640], %987 {strides = array<i32>} : memref<64x256xbf16, #tpu.memory_space<vmem>>, vector<8x16xbf16>,
    %991 = arith.addi %0, %c6_i32 : i32
    %c3_i32_641 = arith.constant 3 : i32
    %992 = arith.addi %991, %c3_i32_641 : i32
    %c0_642 = arith.constant 0 : index
    %993 = arith.index_cast %992 : i32 to index
    %c2_643 = arith.constant 2 : index
    %c0_644 = arith.constant 0 : index
    %994 = vector.load %arg2[%c0_642, %993, %c2_643, %c0_644] : memref<1x11x11x16xbf16, #tpu.memory_space<vmem>>, vector<1x1x8x16xbf16>
    %995 = vector.shape_cast %994 : vector<1x1x8x16xbf16> to vector<1x8x16xbf16>
    %996 = vector.shape_cast %995 : vector<1x8x16xbf16> to vector<8x16xbf16>
    %c8_i32_645 = arith.constant 8 : i32
    %997 = arith.muli %c6_i32, %c8_i32_645 : i32
    %998 = arith.index_cast %997 : i32 to index
    %c224_646 = arith.constant 224 : index
    %999 = vector.load %arg6[%998, %c224_646] : memref<64x256xbf16, #tpu.memory_space<vmem>>, vector<8x16xbf16>
    tpu.vector_store %arg6[%998, %c224_646], %996 {strides = array<i32>} : memref<64x256xbf16, #tpu.memory_space<vmem>>, vector<8x16xbf16>,
    %1000 = arith.addi %0, %c6_i32 : i32
    %c3_i32_647 = arith.constant 3 : i32
    %1001 = arith.addi %1000, %c3_i32_647 : i32
    %c0_648 = arith.constant 0 : index
    %1002 = arith.index_cast %1001 : i32 to index
    %c3_649 = arith.constant 3 : index
    %c0_650 = arith.constant 0 : index
    %1003 = vector.load %arg2[%c0_648, %1002, %c3_649, %c0_650] : memref<1x11x11x16xbf16, #tpu.memory_space<vmem>>, vector<1x1x8x16xbf16>
    %1004 = vector.shape_cast %1003 : vector<1x1x8x16xbf16> to vector<1x8x16xbf16>
    %1005 = vector.shape_cast %1004 : vector<1x8x16xbf16> to vector<8x16xbf16>
    %c8_i32_651 = arith.constant 8 : i32
    %1006 = arith.muli %c6_i32, %c8_i32_651 : i32
    %1007 = arith.index_cast %1006 : i32 to index
    %c240_652 = arith.constant 240 : index
    %1008 = vector.load %arg6[%1007, %c240_652] : memref<64x256xbf16, #tpu.memory_space<vmem>>, vector<8x16xbf16>
    tpu.vector_store %arg6[%1007, %c240_652], %1005 {strides = array<i32>} : memref<64x256xbf16, #tpu.memory_space<vmem>>, vector<8x16xbf16>,
    %c7_i32 = arith.constant 7 : i32
    %1009 = arith.addi %0, %c7_i32 : i32
    %c0_i32_653 = arith.constant 0 : i32
    %1010 = arith.addi %1009, %c0_i32_653 : i32
    %c0_654 = arith.constant 0 : index
    %1011 = arith.index_cast %1010 : i32 to index
    %c0_655 = arith.constant 0 : index
    %c0_656 = arith.constant 0 : index
    %1012 = vector.load %arg2[%c0_654, %1011, %c0_655, %c0_656] : memref<1x11x11x16xbf16, #tpu.memory_space<vmem>>, vector<1x1x8x16xbf16>
    %1013 = vector.shape_cast %1012 : vector<1x1x8x16xbf16> to vector<1x8x16xbf16>
    %1014 = vector.shape_cast %1013 : vector<1x8x16xbf16> to vector<8x16xbf16>
    %c8_i32_657 = arith.constant 8 : i32
    %1015 = arith.muli %c7_i32, %c8_i32_657 : i32
    %1016 = arith.index_cast %1015 : i32 to index
    %c0_658 = arith.constant 0 : index
    %1017 = vector.load %arg6[%1016, %c0_658] : memref<64x256xbf16, #tpu.memory_space<vmem>>, vector<8x16xbf16>
    tpu.vector_store %arg6[%1016, %c0_658], %1014 {strides = array<i32>} : memref<64x256xbf16, #tpu.memory_space<vmem>>, vector<8x16xbf16>,
    %1018 = arith.addi %0, %c7_i32 : i32
    %c0_i32_659 = arith.constant 0 : i32
    %1019 = arith.addi %1018, %c0_i32_659 : i32
    %c0_660 = arith.constant 0 : index
    %1020 = arith.index_cast %1019 : i32 to index
    %c1_661 = arith.constant 1 : index
    %c0_662 = arith.constant 0 : index
    %1021 = vector.load %arg2[%c0_660, %1020, %c1_661, %c0_662] : memref<1x11x11x16xbf16, #tpu.memory_space<vmem>>, vector<1x1x8x16xbf16>
    %1022 = vector.shape_cast %1021 : vector<1x1x8x16xbf16> to vector<1x8x16xbf16>
    %1023 = vector.shape_cast %1022 : vector<1x8x16xbf16> to vector<8x16xbf16>
    %c8_i32_663 = arith.constant 8 : i32
    %1024 = arith.muli %c7_i32, %c8_i32_663 : i32
    %1025 = arith.index_cast %1024 : i32 to index
    %c16_664 = arith.constant 16 : index
    %1026 = vector.load %arg6[%1025, %c16_664] : memref<64x256xbf16, #tpu.memory_space<vmem>>, vector<8x16xbf16>
    tpu.vector_store %arg6[%1025, %c16_664], %1023 {strides = array<i32>} : memref<64x256xbf16, #tpu.memory_space<vmem>>, vector<8x16xbf16>,
    %1027 = arith.addi %0, %c7_i32 : i32
    %c0_i32_665 = arith.constant 0 : i32
    %1028 = arith.addi %1027, %c0_i32_665 : i32
    %c0_666 = arith.constant 0 : index
    %1029 = arith.index_cast %1028 : i32 to index
    %c2_667 = arith.constant 2 : index
    %c0_668 = arith.constant 0 : index
    %1030 = vector.load %arg2[%c0_666, %1029, %c2_667, %c0_668] : memref<1x11x11x16xbf16, #tpu.memory_space<vmem>>, vector<1x1x8x16xbf16>
    %1031 = vector.shape_cast %1030 : vector<1x1x8x16xbf16> to vector<1x8x16xbf16>
    %1032 = vector.shape_cast %1031 : vector<1x8x16xbf16> to vector<8x16xbf16>
    %c8_i32_669 = arith.constant 8 : i32
    %1033 = arith.muli %c7_i32, %c8_i32_669 : i32
    %1034 = arith.index_cast %1033 : i32 to index
    %c32_670 = arith.constant 32 : index
    %1035 = vector.load %arg6[%1034, %c32_670] : memref<64x256xbf16, #tpu.memory_space<vmem>>, vector<8x16xbf16>
    tpu.vector_store %arg6[%1034, %c32_670], %1032 {strides = array<i32>} : memref<64x256xbf16, #tpu.memory_space<vmem>>, vector<8x16xbf16>,
    %1036 = arith.addi %0, %c7_i32 : i32
    %c0_i32_671 = arith.constant 0 : i32
    %1037 = arith.addi %1036, %c0_i32_671 : i32
    %c0_672 = arith.constant 0 : index
    %1038 = arith.index_cast %1037 : i32 to index
    %c3_673 = arith.constant 3 : index
    %c0_674 = arith.constant 0 : index
    %1039 = vector.load %arg2[%c0_672, %1038, %c3_673, %c0_674] : memref<1x11x11x16xbf16, #tpu.memory_space<vmem>>, vector<1x1x8x16xbf16>
    %1040 = vector.shape_cast %1039 : vector<1x1x8x16xbf16> to vector<1x8x16xbf16>
    %1041 = vector.shape_cast %1040 : vector<1x8x16xbf16> to vector<8x16xbf16>
    %c8_i32_675 = arith.constant 8 : i32
    %1042 = arith.muli %c7_i32, %c8_i32_675 : i32
    %1043 = arith.index_cast %1042 : i32 to index
    %c48_676 = arith.constant 48 : index
    %1044 = vector.load %arg6[%1043, %c48_676] : memref<64x256xbf16, #tpu.memory_space<vmem>>, vector<8x16xbf16>
    tpu.vector_store %arg6[%1043, %c48_676], %1041 {strides = array<i32>} : memref<64x256xbf16, #tpu.memory_space<vmem>>, vector<8x16xbf16>,
    %1045 = arith.addi %0, %c7_i32 : i32
    %c1_i32_677 = arith.constant 1 : i32
    %1046 = arith.addi %1045, %c1_i32_677 : i32
    %c0_678 = arith.constant 0 : index
    %1047 = arith.index_cast %1046 : i32 to index
    %c0_679 = arith.constant 0 : index
    %c0_680 = arith.constant 0 : index
    %1048 = vector.load %arg2[%c0_678, %1047, %c0_679, %c0_680] : memref<1x11x11x16xbf16, #tpu.memory_space<vmem>>, vector<1x1x8x16xbf16>
    %1049 = vector.shape_cast %1048 : vector<1x1x8x16xbf16> to vector<1x8x16xbf16>
    %1050 = vector.shape_cast %1049 : vector<1x8x16xbf16> to vector<8x16xbf16>
    %c8_i32_681 = arith.constant 8 : i32
    %1051 = arith.muli %c7_i32, %c8_i32_681 : i32
    %1052 = arith.index_cast %1051 : i32 to index
    %c64_682 = arith.constant 64 : index
    %1053 = vector.load %arg6[%1052, %c64_682] : memref<64x256xbf16, #tpu.memory_space<vmem>>, vector<8x16xbf16>
    tpu.vector_store %arg6[%1052, %c64_682], %1050 {strides = array<i32>} : memref<64x256xbf16, #tpu.memory_space<vmem>>, vector<8x16xbf16>,
    %1054 = arith.addi %0, %c7_i32 : i32
    %c1_i32_683 = arith.constant 1 : i32
    %1055 = arith.addi %1054, %c1_i32_683 : i32
    %c0_684 = arith.constant 0 : index
    %1056 = arith.index_cast %1055 : i32 to index
    %c1_685 = arith.constant 1 : index
    %c0_686 = arith.constant 0 : index
    %1057 = vector.load %arg2[%c0_684, %1056, %c1_685, %c0_686] : memref<1x11x11x16xbf16, #tpu.memory_space<vmem>>, vector<1x1x8x16xbf16>
    %1058 = vector.shape_cast %1057 : vector<1x1x8x16xbf16> to vector<1x8x16xbf16>
    %1059 = vector.shape_cast %1058 : vector<1x8x16xbf16> to vector<8x16xbf16>
    %c8_i32_687 = arith.constant 8 : i32
    %1060 = arith.muli %c7_i32, %c8_i32_687 : i32
    %1061 = arith.index_cast %1060 : i32 to index
    %c80_688 = arith.constant 80 : index
    %1062 = vector.load %arg6[%1061, %c80_688] : memref<64x256xbf16, #tpu.memory_space<vmem>>, vector<8x16xbf16>
    tpu.vector_store %arg6[%1061, %c80_688], %1059 {strides = array<i32>} : memref<64x256xbf16, #tpu.memory_space<vmem>>, vector<8x16xbf16>,
    %1063 = arith.addi %0, %c7_i32 : i32
    %c1_i32_689 = arith.constant 1 : i32
    %1064 = arith.addi %1063, %c1_i32_689 : i32
    %c0_690 = arith.constant 0 : index
    %1065 = arith.index_cast %1064 : i32 to index
    %c2_691 = arith.constant 2 : index
    %c0_692 = arith.constant 0 : index
    %1066 = vector.load %arg2[%c0_690, %1065, %c2_691, %c0_692] : memref<1x11x11x16xbf16, #tpu.memory_space<vmem>>, vector<1x1x8x16xbf16>
    %1067 = vector.shape_cast %1066 : vector<1x1x8x16xbf16> to vector<1x8x16xbf16>
    %1068 = vector.shape_cast %1067 : vector<1x8x16xbf16> to vector<8x16xbf16>
    %c8_i32_693 = arith.constant 8 : i32
    %1069 = arith.muli %c7_i32, %c8_i32_693 : i32
    %1070 = arith.index_cast %1069 : i32 to index
    %c96_694 = arith.constant 96 : index
    %1071 = vector.load %arg6[%1070, %c96_694] : memref<64x256xbf16, #tpu.memory_space<vmem>>, vector<8x16xbf16>
    tpu.vector_store %arg6[%1070, %c96_694], %1068 {strides = array<i32>} : memref<64x256xbf16, #tpu.memory_space<vmem>>, vector<8x16xbf16>,
    %1072 = arith.addi %0, %c7_i32 : i32
    %c1_i32_695 = arith.constant 1 : i32
    %1073 = arith.addi %1072, %c1_i32_695 : i32
    %c0_696 = arith.constant 0 : index
    %1074 = arith.index_cast %1073 : i32 to index
    %c3_697 = arith.constant 3 : index
    %c0_698 = arith.constant 0 : index
    %1075 = vector.load %arg2[%c0_696, %1074, %c3_697, %c0_698] : memref<1x11x11x16xbf16, #tpu.memory_space<vmem>>, vector<1x1x8x16xbf16>
    %1076 = vector.shape_cast %1075 : vector<1x1x8x16xbf16> to vector<1x8x16xbf16>
    %1077 = vector.shape_cast %1076 : vector<1x8x16xbf16> to vector<8x16xbf16>
    %c8_i32_699 = arith.constant 8 : i32
    %1078 = arith.muli %c7_i32, %c8_i32_699 : i32
    %1079 = arith.index_cast %1078 : i32 to index
    %c112_700 = arith.constant 112 : index
    %1080 = vector.load %arg6[%1079, %c112_700] : memref<64x256xbf16, #tpu.memory_space<vmem>>, vector<8x16xbf16>
    tpu.vector_store %arg6[%1079, %c112_700], %1077 {strides = array<i32>} : memref<64x256xbf16, #tpu.memory_space<vmem>>, vector<8x16xbf16>,
    %1081 = arith.addi %0, %c7_i32 : i32
    %c2_i32_701 = arith.constant 2 : i32
    %1082 = arith.addi %1081, %c2_i32_701 : i32
    %c0_702 = arith.constant 0 : index
    %1083 = arith.index_cast %1082 : i32 to index
    %c0_703 = arith.constant 0 : index
    %c0_704 = arith.constant 0 : index
    %1084 = vector.load %arg2[%c0_702, %1083, %c0_703, %c0_704] : memref<1x11x11x16xbf16, #tpu.memory_space<vmem>>, vector<1x1x8x16xbf16>
    %1085 = vector.shape_cast %1084 : vector<1x1x8x16xbf16> to vector<1x8x16xbf16>
    %1086 = vector.shape_cast %1085 : vector<1x8x16xbf16> to vector<8x16xbf16>
    %c8_i32_705 = arith.constant 8 : i32
    %1087 = arith.muli %c7_i32, %c8_i32_705 : i32
    %1088 = arith.index_cast %1087 : i32 to index
    %c128_706 = arith.constant 128 : index
    %1089 = vector.load %arg6[%1088, %c128_706] : memref<64x256xbf16, #tpu.memory_space<vmem>>, vector<8x16xbf16>
    tpu.vector_store %arg6[%1088, %c128_706], %1086 {strides = array<i32>} : memref<64x256xbf16, #tpu.memory_space<vmem>>, vector<8x16xbf16>,
    %1090 = arith.addi %0, %c7_i32 : i32
    %c2_i32_707 = arith.constant 2 : i32
    %1091 = arith.addi %1090, %c2_i32_707 : i32
    %c0_708 = arith.constant 0 : index
    %1092 = arith.index_cast %1091 : i32 to index
    %c1_709 = arith.constant 1 : index
    %c0_710 = arith.constant 0 : index
    %1093 = vector.load %arg2[%c0_708, %1092, %c1_709, %c0_710] : memref<1x11x11x16xbf16, #tpu.memory_space<vmem>>, vector<1x1x8x16xbf16>
    %1094 = vector.shape_cast %1093 : vector<1x1x8x16xbf16> to vector<1x8x16xbf16>
    %1095 = vector.shape_cast %1094 : vector<1x8x16xbf16> to vector<8x16xbf16>
    %c8_i32_711 = arith.constant 8 : i32
    %1096 = arith.muli %c7_i32, %c8_i32_711 : i32
    %1097 = arith.index_cast %1096 : i32 to index
    %c144_712 = arith.constant 144 : index
    %1098 = vector.load %arg6[%1097, %c144_712] : memref<64x256xbf16, #tpu.memory_space<vmem>>, vector<8x16xbf16>
    tpu.vector_store %arg6[%1097, %c144_712], %1095 {strides = array<i32>} : memref<64x256xbf16, #tpu.memory_space<vmem>>, vector<8x16xbf16>,
    %1099 = arith.addi %0, %c7_i32 : i32
    %c2_i32_713 = arith.constant 2 : i32
    %1100 = arith.addi %1099, %c2_i32_713 : i32
    %c0_714 = arith.constant 0 : index
    %1101 = arith.index_cast %1100 : i32 to index
    %c2_715 = arith.constant 2 : index
    %c0_716 = arith.constant 0 : index
    %1102 = vector.load %arg2[%c0_714, %1101, %c2_715, %c0_716] : memref<1x11x11x16xbf16, #tpu.memory_space<vmem>>, vector<1x1x8x16xbf16>
    %1103 = vector.shape_cast %1102 : vector<1x1x8x16xbf16> to vector<1x8x16xbf16>
    %1104 = vector.shape_cast %1103 : vector<1x8x16xbf16> to vector<8x16xbf16>
    %c8_i32_717 = arith.constant 8 : i32
    %1105 = arith.muli %c7_i32, %c8_i32_717 : i32
    %1106 = arith.index_cast %1105 : i32 to index
    %c160_718 = arith.constant 160 : index
    %1107 = vector.load %arg6[%1106, %c160_718] : memref<64x256xbf16, #tpu.memory_space<vmem>>, vector<8x16xbf16>
    tpu.vector_store %arg6[%1106, %c160_718], %1104 {strides = array<i32>} : memref<64x256xbf16, #tpu.memory_space<vmem>>, vector<8x16xbf16>,
    %1108 = arith.addi %0, %c7_i32 : i32
    %c2_i32_719 = arith.constant 2 : i32
    %1109 = arith.addi %1108, %c2_i32_719 : i32
    %c0_720 = arith.constant 0 : index
    %1110 = arith.index_cast %1109 : i32 to index
    %c3_721 = arith.constant 3 : index
    %c0_722 = arith.constant 0 : index
    %1111 = vector.load %arg2[%c0_720, %1110, %c3_721, %c0_722] : memref<1x11x11x16xbf16, #tpu.memory_space<vmem>>, vector<1x1x8x16xbf16>
    %1112 = vector.shape_cast %1111 : vector<1x1x8x16xbf16> to vector<1x8x16xbf16>
    %1113 = vector.shape_cast %1112 : vector<1x8x16xbf16> to vector<8x16xbf16>
    %c8_i32_723 = arith.constant 8 : i32
    %1114 = arith.muli %c7_i32, %c8_i32_723 : i32
    %1115 = arith.index_cast %1114 : i32 to index
    %c176_724 = arith.constant 176 : index
    %1116 = vector.load %arg6[%1115, %c176_724] : memref<64x256xbf16, #tpu.memory_space<vmem>>, vector<8x16xbf16>
    tpu.vector_store %arg6[%1115, %c176_724], %1113 {strides = array<i32>} : memref<64x256xbf16, #tpu.memory_space<vmem>>, vector<8x16xbf16>,
    %1117 = arith.addi %0, %c7_i32 : i32
    %c3_i32_725 = arith.constant 3 : i32
    %1118 = arith.addi %1117, %c3_i32_725 : i32
    %c0_726 = arith.constant 0 : index
    %1119 = arith.index_cast %1118 : i32 to index
    %c0_727 = arith.constant 0 : index
    %c0_728 = arith.constant 0 : index
    %1120 = vector.load %arg2[%c0_726, %1119, %c0_727, %c0_728] : memref<1x11x11x16xbf16, #tpu.memory_space<vmem>>, vector<1x1x8x16xbf16>
    %1121 = vector.shape_cast %1120 : vector<1x1x8x16xbf16> to vector<1x8x16xbf16>
    %1122 = vector.shape_cast %1121 : vector<1x8x16xbf16> to vector<8x16xbf16>
    %c8_i32_729 = arith.constant 8 : i32
    %1123 = arith.muli %c7_i32, %c8_i32_729 : i32
    %1124 = arith.index_cast %1123 : i32 to index
    %c192_730 = arith.constant 192 : index
    %1125 = vector.load %arg6[%1124, %c192_730] : memref<64x256xbf16, #tpu.memory_space<vmem>>, vector<8x16xbf16>
    tpu.vector_store %arg6[%1124, %c192_730], %1122 {strides = array<i32>} : memref<64x256xbf16, #tpu.memory_space<vmem>>, vector<8x16xbf16>,
    %1126 = arith.addi %0, %c7_i32 : i32
    %c3_i32_731 = arith.constant 3 : i32
    %1127 = arith.addi %1126, %c3_i32_731 : i32
    %c0_732 = arith.constant 0 : index
    %1128 = arith.index_cast %1127 : i32 to index
    %c1_733 = arith.constant 1 : index
    %c0_734 = arith.constant 0 : index
    %1129 = vector.load %arg2[%c0_732, %1128, %c1_733, %c0_734] : memref<1x11x11x16xbf16, #tpu.memory_space<vmem>>, vector<1x1x8x16xbf16>
    %1130 = vector.shape_cast %1129 : vector<1x1x8x16xbf16> to vector<1x8x16xbf16>
    %1131 = vector.shape_cast %1130 : vector<1x8x16xbf16> to vector<8x16xbf16>
    %c8_i32_735 = arith.constant 8 : i32
    %1132 = arith.muli %c7_i32, %c8_i32_735 : i32
    %1133 = arith.index_cast %1132 : i32 to index
    %c208_736 = arith.constant 208 : index
    %1134 = vector.load %arg6[%1133, %c208_736] : memref<64x256xbf16, #tpu.memory_space<vmem>>, vector<8x16xbf16>
    tpu.vector_store %arg6[%1133, %c208_736], %1131 {strides = array<i32>} : memref<64x256xbf16, #tpu.memory_space<vmem>>, vector<8x16xbf16>,
    %1135 = arith.addi %0, %c7_i32 : i32
    %c3_i32_737 = arith.constant 3 : i32
    %1136 = arith.addi %1135, %c3_i32_737 : i32
    %c0_738 = arith.constant 0 : index
    %1137 = arith.index_cast %1136 : i32 to index
    %c2_739 = arith.constant 2 : index
    %c0_740 = arith.constant 0 : index
    %1138 = vector.load %arg2[%c0_738, %1137, %c2_739, %c0_740] : memref<1x11x11x16xbf16, #tpu.memory_space<vmem>>, vector<1x1x8x16xbf16>
    %1139 = vector.shape_cast %1138 : vector<1x1x8x16xbf16> to vector<1x8x16xbf16>
    %1140 = vector.shape_cast %1139 : vector<1x8x16xbf16> to vector<8x16xbf16>
    %c8_i32_741 = arith.constant 8 : i32
    %1141 = arith.muli %c7_i32, %c8_i32_741 : i32
    %1142 = arith.index_cast %1141 : i32 to index
    %c224_742 = arith.constant 224 : index
    %1143 = vector.load %arg6[%1142, %c224_742] : memref<64x256xbf16, #tpu.memory_space<vmem>>, vector<8x16xbf16>
    tpu.vector_store %arg6[%1142, %c224_742], %1140 {strides = array<i32>} : memref<64x256xbf16, #tpu.memory_space<vmem>>, vector<8x16xbf16>,
    %1144 = arith.addi %0, %c7_i32 : i32
    %c3_i32_743 = arith.constant 3 : i32
    %1145 = arith.addi %1144, %c3_i32_743 : i32
    %c0_744 = arith.constant 0 : index
    %1146 = arith.index_cast %1145 : i32 to index
    %c3_745 = arith.constant 3 : index
    %c0_746 = arith.constant 0 : index
    %1147 = vector.load %arg2[%c0_744, %1146, %c3_745, %c0_746] : memref<1x11x11x16xbf16, #tpu.memory_space<vmem>>, vector<1x1x8x16xbf16>
    %1148 = vector.shape_cast %1147 : vector<1x1x8x16xbf16> to vector<1x8x16xbf16>
    %1149 = vector.shape_cast %1148 : vector<1x8x16xbf16> to vector<8x16xbf16>
    %c8_i32_747 = arith.constant 8 : i32
    %1150 = arith.muli %c7_i32, %c8_i32_747 : i32
    %1151 = arith.index_cast %1150 : i32 to index
    %c240_748 = arith.constant 240 : index
    %1152 = vector.load %arg6[%1151, %c240_748] : memref<64x256xbf16, #tpu.memory_space<vmem>>, vector<8x16xbf16>
    tpu.vector_store %arg6[%1151, %c240_748], %1149 {strides = array<i32>} : memref<64x256xbf16, #tpu.memory_space<vmem>>, vector<8x16xbf16>,
    %c8_i32_749 = arith.constant 8 : i32
    %c0_750 = arith.constant 0 : index
    %c0_751 = arith.constant 0 : index
    %1153 = vector.load %arg6[%c0_750, %c0_751] : memref<64x256xbf16, #tpu.memory_space<vmem>>, vector<64x256xbf16>
    %c0_752 = arith.constant 0 : index
    %c0_753 = arith.constant 0 : index
    %1154 = vector.load %arg3[%c0_752, %c0_753] : memref<256x128xbf16, #tpu.memory_space<vmem>>, vector<256x128xbf16>
    %cst = arith.constant dense<0.000000e+00> : vector<64x128xf32>
    %1155 = tpu.matmul %1153, %1154, %cst {dimension_numbers = #tpu.dot_dimension_numbers<[1], [0], [0], [1], [0, 0, 1, 1], [], []>} : vector<64x256xbf16>, vector<256x128xbf16>, vector<64x128xf32> -> vector<64x128xf32>
    %c0_754 = arith.constant 0 : index
    %c0_755 = arith.constant 0 : index
    %1156 = vector.load %arg4[%c0_754, %c0_755] : memref<1x128xf32, #tpu.memory_space<vmem>>, vector<1x128xf32>
    %1157 = vector.broadcast %1156 : vector<1x128xf32> to vector<64x128xf32>
    %1158 = arith.addf %1155, %1157 : vector<64x128xf32>
    %cst_756 = arith.constant 0.000000e+00 : f32
    %1159 = vector.broadcast %cst_756 : f32 to vector<64x128xf32>
    %1160 = arith.maximumf %1158, %1159 : vector<64x128xf32>
    %1161 = arith.truncf %1160 : vector<64x128xf32> to vector<64x128xbf16>
    %c0_757 = arith.constant 0 : index
    %c0_758 = arith.constant 0 : index
    %c0_759 = arith.constant 0 : index
    %1162 = vector.load %arg5[%c0_757, %c0_758, %c0_759] : memref<1x64x128xbf16, #tpu.memory_space<vmem>>, vector<1x64x128xbf16>
    %1163 = vector.shape_cast %1162 : vector<1x64x128xbf16> to vector<64x128xbf16>
    %1164 = vector.shape_cast %1161 : vector<64x128xbf16> to vector<1x64x128xbf16>
    tpu.vector_store %arg5[%c0_757, %c0_758, %c0_759], %1164 {strides = array<i32>} : memref<1x64x128xbf16, #tpu.memory_space<vmem>>, vector<1x64x128xbf16>,
    return
  }
  func.func @transform_0(%arg0: i32, %arg1: i32) -> (i32, i32, i32, i32) {
    %c0_i32 = arith.constant 0 : i32
    %c0_i32_0 = arith.constant 0 : i32
    %c0_i32_1 = arith.constant 0 : i32
    %c0_i32_2 = arith.constant 0 : i32
    return %arg0, %c0_i32, %c0_i32_0, %c0_i32_1 : i32, i32, i32, i32
  }
  func.func @transform_1(%arg0: i32, %arg1: i32) -> (i32, i32) {
    %c0_i32 = arith.constant 0 : i32
    %c0_i32_0 = arith.constant 0 : i32
    %c0_i32_1 = arith.constant 0 : i32
    return %c0_i32, %c0_i32_0 : i32, i32
  }
  func.func @transform_2(%arg0: i32, %arg1: i32) -> (i32, i32) {
    %c0_i32 = arith.constant 0 : i32
    %c0_i32_0 = arith.constant 0 : i32
    %c0_i32_1 = arith.constant 0 : i32
    return %c0_i32, %c0_i32_0 : i32, i32
  }
  func.func @transform_3(%arg0: i32, %arg1: i32) -> (i32, i32, i32) {
    %c0_i32 = arith.constant 0 : i32
    %c0_i32_0 = arith.constant 0 : i32
    return %arg0, %arg1, %c0_i32 : i32, i32, i32
  }
}

</mosaic_0001>

<bundles_post_ra>
// kernel: tpu_custom_call.1
= control target key start
LH: loop header
LB: loop body
LE: loop exit
PB: predicated region body
PF: predicated region fallthrough
CT: control target
= control target key end

     0   :  { %8 = vsyncpa [#allocation4], 0  ;;  %s4031_s0 = inlined_call_operand.hbm [shape: bf16[2,11,11,16], index: 0, kind: input, shape index: {}]   ;;  %s4032_s1 = inlined_call_operand.hbm [shape: bf16[256,128], index: 1, kind: input, shape index: {}]   ;;  %s4033_s2 = inlined_call_operand.hbm [shape: f32[1,128], index: 2, kind: input, shape index: {}]   ;;  %s4034_s3 = inlined_call_operand.hbm [shape: bf16[2,64,128], index: 3, kind: output, shape index: {}]  }
   0x1   :  { %10 = vsyncpa [#allocation4 + $0x1], 0 }
   0x2   :  { %11 = vsyncpa [#allocation7], 0 }
   0x3   :  { %12 = vsyncpa [#allocation5], 0 }
   0x4   :  { %14 = vsyncpa [#allocation5 + $0x1], 0  ;;  %s3391_s12 = smov 0   ;;  %s3393_s13 = smov 0  }
   0x5   :  { %s3395_s14 = smov 0   ;;  %s3397_s15 = smov 0  }
   0x6   :  { %s3399_s16 = smov 0   ;;  %s3401_s17 = smov 0  }
   0x7 LB: > { %s2485_s18 = sadd.s32 4294967295, %s3355_s17   ;;  %s2486_s19 = sadd.s32 4294967294, %s3355_s17   ;;  %s3355_s17 = sphi %s3401_s17, %s20_s17   ;;  %s3351_s16 = sphi %s3399_s16, %s4056_s16   ;;  %s3347_s15 = sphi %s3397_s15, %s4055_s15   ;;  %s3343_s14 = sphi %s3395_s14, %s4054_s14   ;;  %s3339_s13 = sphi %s3393_s13, %s4053_s13   ;;  %s3335_s12 = sphi %s3391_s12, %s4052_s12  }
   0x8   : > { %p52_p0 = scmp.ne.s32.totalorder %s3339_s13, %s3335_s12  ;;  %p3425_p1 = scmp.eq.s32.totalorder %s2485_s18, 0 }
   0x9   : > { %p3429_p2 = scmp.eq.s32.totalorder %s2485_s18, 1  ;;  %p126_p3 = scmp.eq.s32.totalorder %s2486_s19, 1 }
   0xa   : > { %s4039_s20 = scalar_select %p3425_p1, 1, 0 }
   0xb   : > { %p3435_p4 = por %p3425_p1, %p52_p0  ;;  %p2487_p5 = scmp.ge.s32.totalorder %s3355_s17, 1 }
   0xc   : > { %p3440_p6 = por %p126_p3, %p52_p0  ;;  %p133_p7 = scmp.lt.s32.totalorder %s3355_s17, 3 }
   0xd   : > { %s4041_s22 = scalar_select %p3435_p4, 1, 0 }
   0xe   : > { %s4042_s23 = scalar_select %p3440_p6, 1, 0 }
   0xf   : > { %p3445_p8 = pnand %p2487_p5, %p133_p7  ;;  %s3357_s25 = smov [#allocation6]  }
  0x10   : > { %s145_s26 = sshll.u32 %s3357_s25, 4  ;;  %s3358_s28 = smov [#allocation8]   ;;  %s3449_s26 = int_to_ptr.vmem [resolvable:$true] %s145_s26 }
  0x11   : > { %p2966_p9 = pneg %p3445_p8  ;;  %s159_s29 = sshll.u32 %s3358_s28, 4  ;;  %s3460_s29 = int_to_ptr.vmem [resolvable:$true] %s159_s29 }
  0x12   : > { %s3183_s5 = scalar_lea.hbm %s4032_s1, 2048 }
  0x13   : > { %p3456_p11 = pnand %p2966_p9, %p3425_p1  ;;  %p3184_p12 = scmp.ne.s32.totalorder %s4032_s1, %s3183_s5 }
  0x14   : > { %p3190_p5 = scmp.lt.u32.totalorder %s3183_s5, %s4032_s1 }
  0x15   : > { %p3185_p13 = pneg %p3456_p11 }
  0x17   : > { %p3186_p0 = pnand %p3185_p13, %p3184_p12 }
  0x19   : > { %p3187_p3 = pneg %p3186_p0 }
  0x1b   : > { %p3192_p7 = pnand %p3190_p5, %p3187_p3 }
  0x1d   : > { %3195 = shalt.err (!%p3192_p7)
}
  0x1e   : > { %s3196_s10 = scalar_lea.vmem %s3449_s26, 2048  ;;  %p3204_p1 = scmp.lt.s32.totalorder %s3449_s26, %s3449_s26 }
  0x1f   : > { %p3197_p9 = scmp.ne.s32.totalorder %s3449_s26, %s3196_s10  ;;  %p3205_p12 = scmp.lt.s32.totalorder %s3196_s10, %s3196_s10 }
  0x21   : > { %p3199_p10 = pnand %p3197_p9, %p3185_p13  ;;  %p3206_p0 = por %p3205_p12, %p3204_p1 }
  0x23   : > { %p3200_p6 = pneg %p3199_p10 }
  0x25   : > { %p3207_p4 = pnand %p3206_p0, %p3200_p6 }
  0x27   : > { %3210 = shalt.err (!%p3207_p4)
}
  0x28   : > { %s3359_s11 = smov 64   ;;  %s3360_s18 = smov 4  }
  0x29   : > { %2969 = dma.hbm_to_vmem [thread:$0]  (!%p3456_p11), %s4032_s1, 2048, %s3449_s26, [#allocation7], %s3359_s11, %s3359_s11, %s3360_s18  }
  0x2a   : > { %s3211_s4 = scalar_lea.hbm %s4033_s2, 16 }
  0x2b   : > { %p3212_p1 = scmp.ne.s32.totalorder %s4033_s2, %s3211_s4  ;;  %p3218_p10 = scmp.lt.u32.totalorder %s3211_s4, %s4033_s2 }
  0x2d   : > { %p3214_p4 = pnand %p3212_p1, %p3185_p13 }
  0x2f   : > { %p3215_p6 = pneg %p3214_p4 }
  0x31   : > { %p3220_p3 = pnand %p3218_p10, %p3215_p6 }
  0x33   : > { %3223 = shalt.err (!%p3220_p3)
}
  0x34   : > { %s3224_s26 = scalar_lea.vmem %s3460_s29, 16  ;;  %s3231_s9 = scalar_lea.vmem %s3460_s29, 32 }
  0x35   : > { %p3225_p5 = scmp.ne.s32.totalorder %s3460_s29, %s3224_s26  ;;  %p3232_p12 = scmp.lt.s32.totalorder %s3460_s29, %s3460_s29 }
  0x36   : > { %p3233_p0 = scmp.lt.s32.totalorder %s3231_s9, %s3224_s26 }
  0x37   : > { %p3227_p7 = pnand %p3225_p5, %p3185_p13 }
  0x38   : > { %p3234_p1 = por %p3233_p0, %p3232_p12 }
  0x39   : > { %p3228_p9 = pneg %p3227_p7 }
  0x3b   : > { %p3235_p4 = pnand %p3234_p1, %p3228_p9 }
  0x3d   : > { %3238 = shalt.err (!%p3235_p4)
}
  0x3e   : > { %2972 = dma.hbm_to_vmem [thread:$0]  (!%p3456_p11), %s4033_s2, 16, %s3460_s29, [#allocation7]  }
  0x3f   : > { %s32_s25 = sadd.s32 1, %s3351_s16  ;;  %s39_s28 = sadd.s32 1, %s3343_s14 }
  0x40   : > { %p34_p13 = scmp.ge.s32.totalorder %s32_s25, 2  ;;  %p46_p6 = scmp.ne.s32.totalorder %s3343_s14, %s3339_s13 }
  0x41   : > { %p47_p10 = scmp.eq.s32.totalorder %s3355_s17, 0  ;;  %p2983_p3 = scmp.lt.s32.totalorder %s3355_s17, 2 }
  0x42   : > { %s4058_s25 = smov (%p34_p13, %s32_s25), 0  ;;  %p3528_p7 = por %p3429_p2, %p46_p6 }
  0x43   : > { %p48_p5 = por %p47_p10, %p46_p6  ;;  %s36_s30 = ssub.s32 %s3351_s16, %s4058_s25 }
  0x44   : > { %s4045_s27 = scalar_select %p3528_p7, 1, 0 }
  0x45   : > { %s170_s4 = sand.u32 1, %s3343_s14   ;;  %p37_p9 = scmp.eq.s32.totalorder %s36_s30, 0 }
  0x46   : > { %s2951_s29 = smul.u32 88, %s170_s4  ;;  %p3535_p11 = pnand %p2983_p3, %p48_p5 }
  0x47   : > { %s3540_s6 = scalar_select %p37_p9, %s3343_s14, %s39_s28  }
  0x48   : > { %s2952_s7 = smul.u32 1408, %s3351_s16  ;;  %s174_s8 = scalar_lea.vmem [#allocation3], %s2951_s29 }
  0x49   : > { %s181_s26 = sshll.u32 %s174_s8, 4  ;;  %s3550_s19 = scalar_lea.sflag [#allocation4], %s170_s4  ;;  %s3548_s26 = int_to_ptr.vmem [resolvable:$true] %s181_s26 }
  0x4a   : > { %s3546_s10 = scalar_lea.hbm %s4031_s0, %s2952_s7  ;;  %p3241_p12 = pneg %p3535_p11 }
  0x4b   : > { %s3239_s30 = scalar_lea.hbm %s3546_s10, 1408  ;;  %s3244_s7 = scalar_lea.hbm %s4031_s0, 2816 }
  0x4c   : > { %p3240_p2 = scmp.ne.s32.totalorder %s3546_s10, %s3239_s30  ;;  %p3245_p4 = scmp.lt.u32.totalorder %s3546_s10, %s4031_s0 }
  0x4d   : > { %p3246_p13 = scmp.lt.u32.totalorder %s3244_s7, %s3239_s30  ;;  %p3248_p10 = scmp.lt.u32.totalorder %s3239_s30, %s3546_s10 }
  0x4e   : > { %p3242_p0 = pnand %p3241_p12, %p3240_p2 }
  0x4f   : > { %p3247_p6 = por %p3246_p13, %p3245_p4 }
  0x50   : > { %p3243_p1 = pneg %p3242_p0 }
  0x51   : > { %p3249_p3 = por %p3248_p10, %p3247_p6 }
  0x53   : > { %p3250_p5 = pnand %p3249_p3, %p3243_p1 }
  0x55   : > { %3253 = shalt.err (!%p3250_p5)
}
  0x56   : > { %s3254_s4 = scalar_lea.vmem %s3548_s26, 1408  ;;  %s3361_s9 = smov [#allocation3]  }
  0x57   : > { %p3255_p9 = scmp.ne.s32.totalorder %s3548_s26, %s3254_s4  ;;  %s3259_s28 = sshll.u32 %s3361_s9, 4  ;;  %s3260_s28 = int_to_ptr.vmem [resolvable:$false] %s3259_s28 }
  0x58   : > { %s3261_s29 = scalar_lea.vmem %s3260_s28, 2816  ;;  %p3262_p7 = scmp.lt.s32.totalorder %s3548_s26, %s3260_s28 }
  0x59   : > { %p3257_p2 = pnand %p3255_p9, %p3241_p12  ;;  %p3263_p4 = scmp.lt.s32.totalorder %s3261_s29, %s3254_s4 }
  0x5b   : > { %p3258_p0 = pneg %p3257_p2  ;;  %p3264_p13 = por %p3263_p4, %p3262_p7 }
  0x5d   : > { %p3265_p6 = pnand %p3264_p13, %p3258_p0 }
  0x5f   : > { %3268 = shalt.err (!%p3265_p6)
}
  0x60   : > { %2976 = dma.hbm_to_vmem [thread:$0]  (!%p3535_p11), %s3546_s10, 1408, %s3548_s26, %s3550_s19, %s3359_s11, %s3359_s11, %s3360_s18  }
  0x61   : > { %193 = sbr.rel (%p3445_p8) target bundleno = 697 (0x2b9), region = 32  ;;  %s3584_s30 = sand.u32 (!%p3445_p8), 1, %s3339_s13  }
  0x62   : > { %s2953_s7 = smul.u32 (!%p3445_p8), 88, %s3584_s30  ;;  %s196_s8 = scalar_lea.sflag (!%p3445_p8), [#allocation4], %s3584_s30 }
  0x63   : > { %p4047_p7 = scmp.ne.s32.totalorder (!%p3445_p8), %s4041_s22, 0 }
  0x64   : > { %s3588_s21 = scalar_lea.vmem (!%p3445_p8), [#allocation3], %s2953_s7 }
  0x68   : > { %3322 = dma.done.wait (%p4047_p7), %s196_s8, 1408  }
  0x69   : > { %3324 = vsyncadd (%p4047_p7), %s196_s8, 4294965888  ;;  %p4048_p11 = scmp.ne.s32.totalorder %s4039_s20, 0 }
  0x6b   : > { %3326 = dma.done.wait (%p4048_p11), [#allocation7], 2064  }
  0x6c   : > { %3328 = vsyncadd (%p4048_p11), [#allocation7], 4294965232  ;;  %v3047_v0 = vld [vmem:[%s3588_s21 + $0x10] sm:$0x1e]   ;;  %v3048_v1 = vld [vmem:[%s3588_s21 + $0x18] sm:$0x1e]  }
  0x6d   : > { %v387_v2 = vrot.slane %v3047_v0, 1  ;;  %v626_v3 = vrot.slane %v3048_v1, 5  ;;  %v3049_v4 = vld [vmem:[%s3588_s21 + $0x10] sm:$0x1f]   ;;  %s3362_s22 = smov 32   ;;  %s3363_s20 = smov 16  }
  0x6e   : > { %v3050_v5 = vld [vmem:[%s3588_s21 + $0x30] sm:$0x1e]   ;;  %v370_v6 = vshrl.u32 %v3049_v4, 16  ;;  %v372_v7 = vshll.u32 %v3049_v4, 16  ;;  %v3051_v8 = vld [vmem:[%s3588_s21 + $0x18] sm:$0x1f]  }
  0x6f   : > { %388 = vrot.lane.b32.xlu1 %v387_v2, %s3362_s22  ;;  %v1299_v10 = vrot.slane %v3050_v5, 1  ;;  %v608_v11 = vshrl.u32 %v3051_v8, 16  ;;  %v611_v12 = vshll.u32 %v3051_v8, 16  ;;  %v3052_v13 = vld [vmem:[%s3588_s21 + $0x30] sm:$0x1f]   ;;  %s3364_s24 = smov 48  }
  0x70   : > { %v374_v9 = vrot.slane %v372_v7, 1  ;;  %v3053_v14 = vld [vmem:[%s3588_s21] sm:$0x1f]   ;;  %v1282_v18 = vshrl.u32 %v3052_v13, 16  ;;  %v1284_v19 = vshll.u32 %v3052_v13, 16  ;;  %s3365_s11 = smov 64  }
  0x71   : > { %v610_v16 = vrot.slane %v608_v11, 4  ;;  %v613_v17 = vrot.slane %v611_v12, 5  ;;  %v247_v20 = vshrl.u32 %v3053_v14, 16  ;;  %v249_v21 = vshll.u32 %v3053_v14, 16  ;;  %v3054_v23 = vld [vmem:[%s3588_s21 + $0x38] sm:$0x1f]  }
  0x72   : > { %v375_v15 = vor.u32 %v374_v9, %v370_v6  ;;  %v1286_v24 = vrot.slane %v1284_v19, 1  ;;  %v3055_v26 = vld [vmem:[%s3588_s21 + $0x8] sm:$0x1f]   ;;  %v1512_v27 = vshrl.u32 %v3054_v23, 16  ;;  %v1515_v28 = vshll.u32 %v3054_v23, 16  ;;  %s3366_s18 = smov 80  }
  0x73   : > { %627 = vrot.lane.b32.xlu1 %v626_v3, %s3362_s22  ;;  %v614_v22 = vor.u32 %v613_v17, %v610_v16  ;;  %v251_v25 = vrot.slane %v249_v21, 1  ;;  %v3056_v29 = vld [vmem:[%s3588_s21 + $0x38] sm:$0x1e]   ;;  %v487_v31 = vshrl.u32 %v3055_v26, 16  ;;  %v490_v32 = vshll.u32 %v3055_v26, 16  ;;  %s3367_s5 = smov 96  }
  0x74   : > { %376 = vrot.lane.b32.xlu0 %v375_v15, %s3363_s20  ;;  %v1287_v30 = vor.u32 %v1286_v24, %v1282_v18  ;;  %v1514_v34 = vrot.slane %v1512_v27, 4  ;;  %v1517_v35 = vrot.slane %v1515_v28, 5  ;;  %v1530_v36 = vrot.slane %v3056_v29, 5  ;;  %v3057_v37 = vld [vmem:[%s3588_s21 + $0x20] sm:$0x1f]   ;;  %s3368_s26 = smov 112  }
  0x75   : > { %v252_v33 = vor.u32 %v251_v25, %v247_v20  ;;  %v489_v38 = vrot.slane %v487_v31, 4  ;;  %v492_v39 = vrot.slane %v490_v32, 5  ;;  %v1174_v41 = vshrl.u32 %v3057_v37, 16  ;;  %v3058_v43 = vld [vmem:[%s3588_s21 + $0x10] sm:$0x3e]   ;;  %s2495_s10 = sshll.u32 %s3584_s30, 5 }
  0x76   : > { %v1518_v40 = vor.u32 %v1517_v35, %v1514_v34  ;;  %v1176_v42 = vshll.u32 %v3057_v37, 16  ;;  %v3059_v44 = vld [vmem:[%s3588_s21 + $0x28] sm:$0x1f]   ;;  %v400_v47 = vshrl.u32 %v3058_v43, 16  ;;  %v403_v48 = vshll.u32 %v3058_v43, 16  ;;  %s3967_s19 = scalar_lea.vmem [#allocation9], %s2495_s10 }
  0x77   : > { %1300 = vrot.lane.b32.xlu1 %v1299_v10, %s3362_s22  ;;  %v493_v45 = vor.u32 %v492_v39, %v489_v38  ;;  %v1398_v49 = vshrl.u32 %v3059_v44, 16  ;;  %v1401_v50 = vshll.u32 %v3059_v44, 16  ;;  %v3060_v51 = vld [vmem:[%s3588_s21 + $0x18] sm:$0x3e]   ;;  %v3062_v59 = vld [vmem:[%s3588_s21 + $0x30] sm:$0x3e]  }
  0x78   : > { %615 = vrot.lane.b32.xlu0 %v614_v22, %s3363_s20  ;;  %v1178_v46 = vrot.slane %v1176_v42, 1  ;;  %v402_v52 = vrot.slane %v400_v47, 1  ;;  %v405_v53 = vrot.slane %v403_v48, 2  ;;  %v639_v54 = vshrl.u32 %v3060_v51, 16  ;;  %v3064_v1 = vld [vmem:[%s3588_s21 + $0x38] sm:$0x3e]  }
  0x79   : > { %v642_v55 = vshll.u32 %v3060_v51, 16  ;;  %v1400_v57 = vrot.slane %v1398_v49, 4  ;;  %v1403_v58 = vrot.slane %v1401_v50, 5  ;;  %v1312_v63 = vshrl.u32 %v3062_v59, 16  ;;  %v3061_v4 = vld [vmem:[%s3588_s21] sm:$0x1e]  }
  0x7a   : > { %v1179_v56 = vor.u32 %v1178_v46, %v1174_v41  ;;  %v406_v60 = vor.u32 %v405_v53, %v402_v52  ;;  %v641_v61 = vrot.slane %v639_v54, 5  ;;  %v1315_v0 = vshll.u32 %v3062_v59, 16  ;;  %v3063_v9 = vld [vmem:[%s3588_s21 + $0x8] sm:$0x1e]   ;;  %v3065_v15 = vld [vmem:[%s3588_s21 + $0x20] sm:$0x1e]  }
  0x7b   : > { %1288 = vrot.lane.b32.xlu1 %v1287_v30, %s3363_s20  ;;  %v644_v62 = vrot.slane %v642_v55, 6  ;;  %v1404_v2 = vor.u32 %v1403_v58, %v1400_v57  ;;  %v1314_v5 = vrot.slane %v1312_v63, 1  ;;  %v1543_v7 = vshrl.u32 %v3064_v1, 16  ;;  %v3069_v16 = vld [vmem:[%s3588_s21] sm:$0x3e]   ;;  %s2340_s4 = sshll.u32 %s3967_s19, 4  ;;  %s3974_s4 = int_to_ptr.vmem [resolvable:$true] %s2340_s4 }
  0x7c   : > { %253 = vrot.lane.b32.xlu0 %v252_v33, %s3363_s20  ;;  %v1317_v6 = vrot.slane %v1315_v0, 2  ;;  %v1546_v8 = vshll.u32 %v3064_v1, 16  ;;  %v265_v10 = vrot.slane %v3061_v4, 1  ;;  %v506_v14 = vrot.slane %v3063_v9, 5  ;;  %v3071_v19 = vld [vmem:[%s3588_s21 + $0x8] sm:$0x3e]  }
  0x7d   : > { %v645_v3 = vor.u32 %v644_v62, %v641_v61  ;;  %v1545_v12 = vrot.slane %v1543_v7, 5  ;;  %v1191_v18 = vrot.slane %v3065_v15, 1  ;;  %v3067_v20 = vld [vmem:[%s3588_s21 + $0x28] sm:$0x1e]   ;;  %v279_v21 = vshrl.u32 %v3069_v16, 16  ;;  %s2871_s9 = sshll.u32 %s3347_s15, 9 }
  0x7e   : > { %v1318_v11 = vor.u32 %v1317_v6, %v1314_v5  ;;  %v1548_v13 = vrot.slane %v1546_v8, 6  ;;  %v282_v22 = vshll.u32 %v3069_v16, 16  ;;  %v3066_v23 = vld [vmem:[%s3588_s21 + $0x18] ss:$0 sps:$4 sm:$0xff]   ;;  %v3073_v24 = vld [vmem:[%s3588_s21 + $0x20] sm:$0x3e]   ;;  %s3979_s7 = scalar_lea.hbm %s4034_s3, %s2871_s9 }
  0x7f   : > { %1519 = vrot.lane.b32.xlu1 %v1518_v40, %s3363_s20  ;;  %v520_v25 = vshrl.u32 %v3071_v19, 16  ;;  %v523_v26 = vshll.u32 %v3071_v19, 16  ;;  %v1416_v27 = vrot.slane %v3067_v20, 5  ;;  %v281_v28 = vrot.slane %v279_v21, 1  ;;  %v3068_v30 = vld [vmem:[%s3588_s21 + $0x20] ss:$0 sps:$4 sm:$0xff]  }
  0x80   : > { %494 = vrot.lane.b32.xlu0 %v493_v45, %s3363_s20  ;;  %v1549_v17 = vor.u32 %v1548_v13, %v1545_v12  ;;  %v284_v29 = vrot.slane %v282_v22, 2  ;;  %v3074_v31 = vld [vmem:[%s3588_s21 + $0x18] sm:$0x1f]   ;;  %v1204_v32 = vshrl.u32 %v3073_v24, 16  ;;  %v1207_v33 = vshll.u32 %v3073_v24, 16  ;;  %s2325_s8 = scalar_lea.sflag [#allocation5], %s3584_s30 }
  0x81   : > { %v522_v34 = vrot.slane %v520_v25, 5  ;;  %v525_v35 = vrot.slane %v523_v26, 6  ;;  %v3076_v38 = vld [vmem:[%s3588_s21 + $0x20] sm:$0x1f]   ;;  %v3070_v39 = vld [vmem:[%s3588_s21 + $0x38] ss:$0 sps:$4 sm:$0xff]  }
  0x82   : > { %v285_v37 = vor.u32 %v284_v29, %v281_v28  ;;  %v433_v40 = vshll.u32 %v3074_v31, 16  ;;  %v1206_v41 = vrot.slane %v1204_v32, 1  ;;  %v1209_v42 = vrot.slane %v1207_v33, 2  ;;  %v3072_v43 = vld [vmem:[%s3588_s21 + $0x40] ss:$0 sps:$4 sm:$0xff]   ;;  %v3150_v25 = vld [vmem:[#allocation6 + $0x40] sm:$0xff]  }
  0x83   : > { %1531 = vrot.lane.b32.xlu1 %v1530_v36, %s3362_s22  ;;  %v3075_v36 = vld [vmem:[%s3588_s21 + $0x28] sm:$0x3e]   ;;  %v526_v46 = vor.u32 %v525_v35, %v522_v34  ;;  %v670_v47 = vshrl.u32 %v3076_v38, 16  ;;  %v673_v48 = vshll.u32 %v3076_v38, 16  ;;  %v3078_v49 = vld [vmem:[%s3588_s21 + $0x38] sm:$0x1f]   ;;  %2895 = vmatprep.subr.bf16.mxu0 %v3150_v25 }
  0x84   : > { %1180 = vrot.lane.b32.xlu0 %v1179_v56, %s3363_s20  ;;  %v1429_v44 = vshrl.u32 %v3075_v36, 16  ;;  %v1432_v45 = vshll.u32 %v3075_v36, 16  ;;  %v431_v50 = vshrl.u32 %v3074_v31, 16  ;;  %v435_v51 = vrot.slane %v433_v40, 1  ;;  %v3080_v59 = vld [vmem:[%s3588_s21 + $0x40] sm:$0x1f]   ;;  %2935 = vmatprep.subr.bf16.mxu1 %v3150_v25 }
  0x85   : > { %v1210_v52 = vor.u32 %v1209_v42, %v1206_v41  ;;  %v672_v55 = vrot.slane %v670_v47, 4  ;;  %v675_v56 = vrot.slane %v673_v48, 5  ;;  %v1345_v57 = vshll.u32 %v3078_v49, 16  ;;  %v3085_v6 = vld [vmem:[%s3588_s21 + $0x8] sm:$0x1f]   ;;  %v3151_v48 = vld [vmem:[#allocation6] sm:$0xff]  }
  0x86   : > { %v1431_v53 = vrot.slane %v1429_v44, 5  ;;  %v1434_v54 = vrot.slane %v1432_v45, 6  ;;  %v436_v58 = vor.u32 %v435_v51, %v431_v50  ;;  %v1343_v61 = vshrl.u32 %v3078_v49, 16  ;;  %v3079_v7 = vld [vmem:[%s3588_s21 + $0x10] ss:$0 sps:$4 sm:$0xff]   ;;  %2896 = vmatpush3.bf16.msra.mxu0 %v3151_v48  ;;  %2943 = vmatpush3.bf16.msra.mxu1 %v3151_v48  ;;  %p4049_p12 = scmp.ne.s32.totalorder %s4045_s27, 0 }
  0x87   : > { %407 = vrot.lane.b32.xlu1 %v406_v60, %s3364_s24  ;;  %v676_v62 = vor.u32 %v675_v56, %v672_v55  ;;  %v1347_v63 = vrot.slane %v1345_v57, 1  ;;  %v1574_v0 = vshrl.u32 %v3080_v59, 16  ;;  %v1577_v1 = vshll.u32 %v3080_v59, 16  ;;  %v3082_v8 = vld [vmem:[%s3588_s21 + $0x18] sm:$0x1e]   ;;  %s3369_s15 = smov [#allocation9]  }
  0x88   : > { %1405 = vrot.lane.b32.xlu0 %v1404_v2, %s3363_s20  ;;  %v1435_v60 = vor.u32 %v1434_v54, %v1431_v53  ;;  %v3077_v2 = vld [vmem:[%s3588_s21 + $0x8] ss:$0 sps:$4 sm:$0xff]   ;;  %v448_v12 = vrot.slane %v3082_v8, 1  ;;  %v3087_v13 = vld [vmem:[%s3588_s21 + $0x10] sm:$0x1f]   ;;  %vm237_vm0 = vcmask 125952  }
  0x89   : > { %v1576_v4 = vrot.slane %v1574_v0, 4  ;;  %v1579_v5 = vrot.slane %v1577_v1, 5  ;;  %v3083_v15 = vld [vmem:[%s3588_s21 + $0x30] ss:$0 sps:$4 sm:$0xff]   ;;  %v3089_v16 = vld [vmem:[%s3588_s21 + $0x28] sm:$0x1f]  }
  0x8a   : > { %v3086_v20 = vld [vmem:[%s3588_s21 + $0x38] sm:$0x1e]   ;;  %v549_v21 = vshrl.u32 %v3087_v13, 16  ;;  %v552_v22 = vshll.u32 %v3087_v13, 16  ;;  %v3088_v24 = vld [vmem:[%s3588_s21 + $0x40] sm:$0x1e]  }
  0x8b   : > { %646 = vrot.lane.b32.xlu1 %v645_v3, %s3364_s24  ;;  %v1348_v3 = vor.u32 %v1347_v63, %v1343_v61  ;;  %v1580_v9 = vor.u32 %v1579_v5, %v1576_v4  ;;  %v1233_v26 = vshll.u32 %v3089_v16, 16  ;;  %v3091_v28 = vld [vmem:[%s3588_s21 + $0x30] sm:$0x1f]   ;;  %v3092_v29 = vld [vmem:[%s3588_s21 + $0x20] sm:$0x3e]   ;;  %v1360_v33 = vrot.slane %v3086_v20, 1 }
  0x8c   : > { %266 = vrot.lane.b32.xlu0 %v265_v10, %s3362_s22  ;;  %v3081_v10 = vld [vmem:[%s3588_s21 + $0x28] ss:$0 sps:$4 sm:$0xff]   ;;  %v551_v31 = vrot.slane %v549_v21, 4  ;;  %v554_v32 = vrot.slane %v552_v22, 5  ;;  %v1592_v34 = vrot.slane %v3088_v24, 5  ;;  %v1231_v35 = vshrl.u32 %v3089_v16, 16 }
  0x8d   : > { %v1459_v38 = vshll.u32 %v3091_v28, 16  ;;  %v701_v41 = vshrl.u32 %v3092_v29, 16  ;;  %v704_v42 = vshll.u32 %v3092_v29, 16  ;;  %v3094_v44 = vld [vmem:[%s3588_s21 + $0x38] sm:$0x3e]   ;;  %vm477_vm1 = vcmask 130052  }
  0x8e   : > { %v2510_v47 = vld [vmem:[%s3588_s21 + $0x10] sm:$0xf]  ;;  %v3154_v53 = vld [vmem:[#allocation6 + $0x48] sm:$0xff]   ;;  %v1373_v56 = vshrl.u32 %v3094_v44, 16  ;;  %v3101_v16 = vld [vmem:[%s3588_s21 + $0x8] sm:$0x3e]  }
  0x8f   : > { %1319 = vrot.lane.b32.xlu1 %v1318_v11, %s3364_s24  ;;  %v314_v11 = vshll.u32 %v3085_v6, 16  ;;  %v1461_v50 = vrot.slane %v1459_v38, 5  ;;  %361 = vst.msk [vmem:[#allocation2 + $0x8] sm:$0xf] %vm237_vm0, %v2510_v47  ;;  %v703_v51 = vrot.slane %v701_v41, 5  ;;  %v706_v55 = vrot.slane %v704_v42, 6  ;;  %2897 = vmatprep.subr.bf16.mxu0 %v3154_v53 }
  0x90   : > { %507 = vrot.lane.b32.xlu0 %v506_v14, %s3362_s22  ;;  %v3084_v14 = vld [vmem:[%s3588_s21 + $0x20] sm:$0x1e]   ;;  %2936 = vmatprep.subr.bf16.mxu1 %v3154_v53  ;;  %v3098_v63 = vld [vmem:[%s3588_s21 + $0x10] sm:$0x3e]   ;;  %v1375_v4 = vrot.slane %v1373_v56, 1  ;;  %v347_v29 = vshll.u32 %v3101_v16, 16 }
  0x91   : > { %v316_v19 = vrot.slane %v314_v11, 1  ;;  %v3155_v61 = vld [vmem:[#allocation6 + $0x8] sm:$0xff]   ;;  %v582_v11 = vshrl.u32 %v3098_v63, 16  ;;  %v3100_v13 = vld [vmem:[%s3588_s21 + $0x30] sm:$0x3e]   ;;  %vm256_vm2 = vcmask 257152  }
  0x92   : > { %2898 = vmatpush3.bf16.msra.mxu0 %v3155_v61  ;;  %2944 = vmatpush3.bf16.msra.mxu1 %v3155_v61  ;;  %v1487_v24 = vshrl.u32 %v3100_v13, 16  ;;  %v2661_v25 = vld [vmem:[%s3588_s21 + $0x20] sm:$0xf]  ;;  %v349_v41 = vrot.slane %v347_v29, 2  ;;  %v3162_v56 = vld [vmem:[#allocation6 + $0x58] sm:$0xff]   ;;  %vm269_vm3 = vcmask 388352  }
  0x93   : > { %1550 = vrot.lane.b32.xlu1 %v1549_v17, %s3364_s24  ;;  %v3090_v17 = vld [vmem:[%s3588_s21 + $0x18] sm:$0x3e]   ;;  %v584_v21 = vrot.slane %v582_v11, 5  ;;  %1165 = vst.msk [vmem:[#allocation2 + $0x20] sm:$0xf] %vm237_vm0, %v2661_v25  ;;  %vm497_vm4 = vcmask 261252  }
  0x94   : > { %1192 = vrot.lane.b32.xlu0 %v1191_v18, %s3362_s22  ;;  %v312_v18 = vshrl.u32 %v3085_v6, 16  ;;  %v464_v36 = vshll.u32 %v3090_v17, 16  ;;  %v3095_v6 = vld [vmem:[%s3588_s21 + $0x10] sm:$0x1e]   ;;  %v3105_v47 = vld [vmem:[%s3588_s21 + $0x20] sm:$0x1f]  }
  0x95   : > { %v3106_v61 = vld [vmem:[%s3588_s21 + $0x20] sm:$0x1e]   ;;  %v3112_v11 = vld [vmem:[%s3588_s21 + $0x18] sm:$0x1f]   ;;  %vm510_vm5 = vcmask 392452   ;;  %vm289_vm6 = vcmask 519552  }
  0x96   : > { %v466_v45 = vrot.slane %v464_v36, 2  ;;  %v3167_v29 = vld [vmem:[#allocation6 + $0x20] sm:$0xff]   ;;  %vm530_vm7 = vcmask 523652   ;;  %vm302_vm8 = vcmask 650752   ;;  %vm539_vm9 = vcmask 654852  }
  0x97   : > { %419 = vrot.lane.b32.xlu1 %v3066_v23, %s3365_s11  ;;  %v688_v23 = vrot.slane %v3084_v14, 5  ;;  %v3113_v14 = vld [vmem:[%s3588_s21 + $0x38] ss:$0 sps:$4 sm:$0xff]   ;;  %vm321_vm10 = vcmask 781952   ;;  %vm559_vm11 = vcmask 786052   ;;  %vm334_vm12 = vcmask 913152  }
  0x98   : > { %1417 = vrot.lane.b32.xlu0 %v1416_v27, %s3362_s22  ;;  %v461_v27 = vshrl.u32 %v3090_v17, 16  ;;  %v3114_v17 = vld [vmem:[%s3588_s21 + $0x8] ss:$0 sps:$4 sm:$0xff]   ;;  %1503 = vst.msk [vmem:[#allocation2 + $0x28] sm:$0xf0] %vm477_vm1, %v3113_v14  ;;  %vm572_vm13 = vcmask 917252  }
  0x99   : > { %478 = vst.msk [vmem:[#allocation2] sm:$0xf0] %vm477_vm1, %v3114_v17  ;;  %v3117_v14 = vld [vmem:[%s3588_s21 + $0x20] sm:$0x3e]   ;;  %vm354_vm14 = vcmask 1044352   ;;  %vm592_vm15 = vcmask 1048452  }
  0x9a   : > { %v463_v40 = vrot.slane %v461_v27, 1  ;;  %v1490_v27 = vshll.u32 %v3100_v13, 16  ;;  %v3116_v13 = vld [vmem:[%s3588_s21 + $0x30] sm:$0x1f]  }
  0x9b   : > { %658 = vrot.lane.b32.xlu1 %v3068_v30, %s3365_s11  ;;  %v317_v30 = vor.u32 %v316_v19, %v312_v18  ;;  %v3102_v18 = vld [vmem:[%s3588_s21 + $0x28] sm:$0x1f]   ;;  %v568_v19 = vrot.slane %v3095_v6, 5  ;;  %v847_v6 = vrot.slane %v3106_v61, 1  ;;  %v1628_v25 = vshll.u32 %v3116_v13, 16 }
  0x9c   : > { %286 = vrot.lane.b32.xlu0 %v285_v37, %s3364_s24  ;;  %v1456_v37 = vshrl.u32 %v3091_v28, 16  ;;  %v467_v57 = vor.u32 %v466_v45, %v463_v40  ;;  %v344_v28 = vshrl.u32 %v3101_v16, 16  ;;  %v1492_v38 = vrot.slane %v1490_v27, 6  ;;  %v3124_v61 = vld [vmem:[%s3588_s21 + $0x48] sm:$0x3e]  }
  0x9e   : > { %v1458_v49 = vrot.slane %v1456_v37, 4  ;;  %v1489_v37 = vrot.slane %v1487_v24, 5  ;;  %v346_v40 = vrot.slane %v344_v28, 1  ;;  %v3115_v24 = vld [vmem:[%s3588_s21 + $0x48] sm:$0x1e]  }
  0x9f   : > { %1331 = vrot.lane.b32.xlu1 %v3070_v39, %s3365_s11  ;;  %v1235_v39 = vrot.slane %v1233_v26, 1  ;;  %v3118_v28 = vld [vmem:[%s3588_s21 + $0x38] sm:$0x1f]  }
  0xa0   : > { %527 = vrot.lane.b32.xlu0 %v526_v46, %s3364_s24  ;;  %v3096_v46 = vld [vmem:[%s3588_s21 + $0x40] sm:$0x3e]   ;;  %v1462_v0 = vor.u32 %v1461_v50, %v1458_v49  ;;  %v1493_v48 = vor.u32 %v1492_v38, %v1489_v37  ;;  %v350_v53 = vor.u32 %v349_v41, %v346_v40  ;;  %v1982_v37 = vrot.slane %v3115_v24, 5 }
  0xa1   : > { %v1236_v54 = vor.u32 %v1235_v39, %v1231_v35  ;;  %v1605_v59 = vshrl.u32 %v3096_v46, 16  ;;  %v3158_v35 = vld [vmem:[#allocation6 + $0x50] sm:$0xff]   ;;  %v1626_v38 = vshrl.u32 %v3116_v13, 16 }
  0xa2   : > { %2899 = vmatprep.subr.bf16.mxu0 %v3158_v35  ;;  %2937 = vmatprep.subr.bf16.mxu1 %v3158_v35  ;;  %v3159_v50 = vld [vmem:[#allocation6 + $0x10] sm:$0xff]   ;;  %v863_v35 = vshll.u32 %v3117_v14, 16 }
  0xa3   : > { %1562 = vrot.lane.b32.xlu1 %v3072_v43, %s3365_s11  ;;  %v555_v43 = vor.u32 %v554_v32, %v551_v31  ;;  %v1607_v8 = vrot.slane %v1605_v59, 5  ;;  %v3103_v31 = vld [vmem:[%s3588_s21 + $0x28] sm:$0x3e]   ;;  %2900 = vmatpush3.bf16.msra.mxu0 %v3159_v50 }
  0xa4   : > { %1211 = vrot.lane.b32.xlu0 %v1210_v52, %s3364_s24  ;;  %v3093_v52 = vld [vmem:[%s3588_s21 + $0x8] sm:$0x1e]   ;;  %2945 = vmatpush3.bf16.msra.mxu1 %v3159_v50 }
  0xa5   : > { %v330_v1 = vrot.slane %v3093_v52, 1  ;;  %v3104_v32 = vld [vmem:[%s3588_s21 + $0x48] sm:$0x1f]   ;;  %2901 = vmatprep.subr.bf16.mxu0 %v3162_v56  ;;  %2938 = vmatprep.subr.bf16.mxu1 %v3162_v56 }
  0xa6   : > { %v1967_v49 = vshll.u32 %v3104_v32, 16 }
  0xa7   : > { %437 = vrot.lane.b32.xlu1 %v436_v58, %s3366_s18  ;;  %v1376_v58 = vshll.u32 %v3094_v44, 16  ;;  %v1264_v44 = vshll.u32 %v3103_v31, 16 }
  0xa8   : > { %1436 = vrot.lane.b32.xlu0 %v1435_v60, %s3364_s24  ;;  %v1608_v60 = vshll.u32 %v3096_v46, 16  ;;  %v1964_v46 = vshrl.u32 %v3104_v32, 16  ;;  %v1969_v59 = vrot.slane %v1967_v49, 5  ;;  %v3169_v49 = vld [vmem:[#allocation6 + $0x68] sm:$0xff]  }
  0xa9   : > { %v1378_v5 = vrot.slane %v1376_v58, 2  ;;  %v1266_v52 = vrot.slane %v1264_v44, 2 }
  0xaa   : > { %v1966_v58 = vrot.slane %v1964_v46, 4 }
  0xab   : > { %677 = vrot.lane.b32.xlu1 %v676_v62, %s3366_s18  ;;  %v3108_v62 = vld [vmem:[%s3588_s21 + $0x18] ss:$0 sps:$4 sm:$0xff]  }
  0xac   : > { %299 = vrot.lane.b32.xlu0 %v3077_v2, %s3365_s11  ;;  %599 = vst.msk [vmem:[#allocation2 + $0x8] sm:$0xf0] %vm477_vm1, %v3108_v62  ;;  %v2682_v2 = vld [vmem:[%s3588_s21 + $0x30] sm:$0xf] }
  0xad   : > { %1273 = vst.msk [vmem:[#allocation2 + $0x28] sm:$0xf] %vm237_vm0, %v2682_v2  ;;  %v3163_v62 = vld [vmem:[#allocation6 + $0x18] sm:$0xff]  }
  0xae   : > { %v3110_v2 = vld [vmem:[%s3588_s21 + $0x10] sm:$0x1f]   ;;  %2902 = vmatpush3.bf16.msra.mxu0 %v3163_v62  ;;  %2946 = vmatpush3.bf16.msra.mxu1 %v3163_v62 }
  0xaf   : > { %1349 = vrot.lane.b32.xlu1 %v1348_v3, %s3366_s18  ;;  %v707_v3 = vor.u32 %v706_v55, %v703_v51  ;;  %v3107_v55 = vld [vmem:[%s3588_s21 + $0x40] sm:$0x1f]   ;;  %v722_v16 = vshrl.u32 %v3110_v2, 16 }
  0xb0   : > { %536 = vrot.lane.b32.xlu0 %v3079_v7, %s3365_s11  ;;  %v236_v7 = vld [vmem:[%s3588_s21] sm:$0xf] }
  0xb1   : > { %238 = vst.msk [vmem:[#allocation2] sm:$0xf] %vm237_vm0, %v236_v7  ;;  %v1734_v7 = vshrl.u32 %v3107_v55, 16 }
  0xb3   : > { %1581 = vrot.lane.b32.xlu1 %v1580_v9, %s3366_s18  ;;  %v1610_v9 = vrot.slane %v1608_v60, 6  ;;  %v830_v60 = vshrl.u32 %v3105_v47, 16 }
  0xb4   : > { %1219 = vrot.lane.b32.xlu0 %v3081_v10, %s3365_s11  ;;  %v3097_v10 = vld [vmem:[%s3588_s21 + $0x28] sm:$0x1e]  }
  0xb5   : > { %v1248_v20 = vrot.slane %v3097_v10, 1  ;;  %v1611_v26 = vor.u32 %v1610_v9, %v1607_v8  ;;  %v724_v10 = vshll.u32 %v3110_v2, 16 }
  0xb7   : > { %449 = vrot.lane.b32.xlu1 %v448_v12, %s3367_s5  ;;  %v585_v12 = vshll.u32 %v3098_v63, 16 }
  0xb8   : > { %1444 = vrot.lane.b32.xlu0 %v3083_v15, %s3365_s11  ;;  %v1379_v15 = vor.u32 %v1378_v5, %v1375_v4  ;;  %v3166_v4 = vld [vmem:[#allocation6 + $0x60] sm:$0xff]  }
  0xb9   : > { %v587_v22 = vrot.slane %v585_v12, 6  ;;  %2903 = vmatprep.subr.bf16.mxu0 %v3166_v4  ;;  %v3109_v12 = vld [vmem:[%s3588_s21 + $0x28] sm:$0x1e]   ;;  %2939 = vmatprep.subr.bf16.mxu1 %v3166_v4 }
  0xba   : > { %2904 = vmatpush3.bf16.msra.mxu0 %v3167_v29  ;;  %2947 = vmatpush3.bf16.msra.mxu1 %v3167_v29 }
  0xbb   : > { %689 = vrot.lane.b32.xlu1 %v688_v23, %s3367_s5  ;;  %v3099_v23 = vld [vmem:[%s3588_s21 + $0x30] sm:$0x1e]   ;;  %v588_v36 = vor.u32 %v587_v22, %v584_v21  ;;  %v1078_v21 = vrot.slane %v3109_v12, 5  ;;  %v3111_v22 = vld [vmem:[%s3588_s21 + $0x40] sm:$0x1e]   ;;  %2905 = vmatprep.subr.bf16.mxu0 %v3169_v49 }
  0xbc   : > { %318 = vrot.lane.b32.xlu0 %v317_v30, %s3366_s18  ;;  %v1060_v30 = vshrl.u32 %v3102_v18, 16  ;;  %v1474_v39 = vrot.slane %v3099_v23, 5  ;;  %2940 = vmatprep.subr.bf16.mxu1 %v3169_v49  ;;  %v3136_v49 = vld [vmem:[%s3588_s21 + $0x30] sm:$0x1f]  }
  0xbe   : > { %v1062_v42 = vrot.slane %v1060_v30, 4 }
  0xbf   : > { %1361 = vrot.lane.b32.xlu1 %v1360_v33, %s3367_s5  ;;  %v1063_v33 = vshll.u32 %v3102_v18, 16  ;;  %v726_v18 = vrot.slane %v724_v10, 1  ;;  %v3123_v10 = vld [vmem:[%s3588_s21 + $0x18] sm:$0x1e]  }
  0xc0   : > { %556 = vrot.lane.b32.xlu0 %v555_v43, %s3366_s18  ;;  %v1261_v43 = vshrl.u32 %v3103_v31, 16 }
  0xc1   : > { %v1065_v45 = vrot.slane %v1063_v33, 5  ;;  %v727_v30 = vor.u32 %v726_v18, %v722_v16  ;;  %v3120_v33 = vld [vmem:[%s3588_s21 + $0x28] sm:$0x3e]  }
  0xc2   : > { %v1263_v51 = vrot.slane %v1261_v43, 1  ;;  %v1853_v43 = vshll.u32 %v3118_v28, 16  ;;  %v1094_v46 = vshll.u32 %v3120_v33, 16 }
  0xc3   : > { %1593 = vrot.lane.b32.xlu1 %v1592_v34, %s3367_s5  ;;  %v3119_v34 = vld [vmem:[%s3588_s21 + $0x28] ss:$0 sps:$4 sm:$0xff]  }
  0xc4   : > { %1237 = vrot.lane.b32.xlu0 %v1236_v54, %s3366_s18  ;;  %1389 = vst.msk [vmem:[#allocation2 + $0x20] sm:$0xf0] %vm477_vm1, %v3119_v34  ;;  %v832_v54 = vshll.u32 %v3105_v47, 16  ;;  %v1267_v63 = vor.u32 %v1266_v52, %v1263_v51  ;;  %v1751_v34 = vrot.slane %v3111_v22, 1  ;;  %v3122_v47 = vld [vmem:[%s3588_s21 + $0x40] sm:$0x3e]  }
  0xc5   : > { %v1096_v56 = vrot.slane %v1094_v46, 6  ;;  %v3131_v22 = vld [vmem:[%s3588_s21 + $0x18] sm:$0x3e]  }
  0xc6   : > { %v3135_v46 = vld [vmem:[%s3588_s21 + $0x38] sm:$0x3e]  }
  0xc7   : > { %468 = vrot.lane.b32.xlu1 %v467_v57, %s3368_s26  ;;  %v1066_v57 = vor.u32 %v1065_v45, %v1062_v42  ;;  %v1850_v42 = vshrl.u32 %v3118_v28, 16  ;;  %v1091_v45 = vshrl.u32 %v3120_v33, 16 }
  0xc8   : > { %1463 = vrot.lane.b32.xlu0 %v1462_v0, %s3366_s18  ;;  %v834_v0 = vrot.slane %v832_v54, 1  ;;  %v1855_v54 = vrot.slane %v1853_v43, 5 }
  0xca   : > { %v835_v8 = vor.u32 %v834_v0, %v830_v60 }
  0xcb   : > { %708 = vrot.lane.b32.xlu1 %v707_v3, %s3368_s26  ;;  %v1970_v3 = vor.u32 %v1969_v59, %v1966_v58  ;;  %v1767_v58 = vshll.u32 %v3122_v47, 16  ;;  %v3170_v59 = vld [vmem:[#allocation6 + $0x28] sm:$0xff]  }
  0xcc   : > { %331 = vrot.lane.b32.xlu0 %v330_v1, %s3367_s5  ;;  %v1736_v1 = vshll.u32 %v3107_v55, 16  ;;  %v1093_v55 = vrot.slane %v1091_v45, 5  ;;  %2906 = vmatpush3.bf16.msra.mxu0 %v3170_v59 }
  0xcd   : > { %2948 = vmatpush3.bf16.msra.mxu1 %v3170_v59  ;;  %v3132_v59 = vld [vmem:[%s3588_s21 + $0x50] ss:$0 sps:$4 sm:$0xff]  }
  0xce   : > { %v1738_v9 = vrot.slane %v1736_v1, 1  ;;  %v1097_v2 = vor.u32 %v1096_v56, %v1093_v55 }
  0xcf   : > { %1380 = vrot.lane.b32.xlu1 %v1379_v15, %s3368_s26 }
  0xd0   : > { %569 = vrot.lane.b32.xlu0 %v568_v19, %s3367_s5  ;;  %v1739_v17 = vor.u32 %v1738_v9, %v1734_v7  ;;  %v946_v19 = vshrl.u32 %v3112_v11, 16  ;;  %v1998_v7 = vshll.u32 %v3124_v61, 16 }
  0xd2   : > { %v948_v31 = vrot.slane %v946_v19, 4  ;;  %v964_v19 = vrot.slane %v3123_v10, 5 }
  0xd3   : > { %1612 = vrot.lane.b32.xlu1 %v1611_v26, %s3368_s26  ;;  %v860_v26 = vshrl.u32 %v3117_v14, 16 }
  0xd4   : > { %1249 = vrot.lane.b32.xlu0 %v1248_v20, %s3367_s5  ;;  %v949_v20 = vshll.u32 %v3112_v11, 16  ;;  %v3174_v11 = vld [vmem:[#allocation6 + $0x30] sm:$0xff]  }
  0xd5   : > { %v862_v40 = vrot.slane %v860_v26, 1 }
  0xd6   : > { %v951_v32 = vrot.slane %v949_v20, 5  ;;  %v3129_v20 = vld [vmem:[%s3588_s21 + $0x10] sm:$0x3e]  }
  0xd7   : > { %589 = vrot.lane.b32.xlu1 %v588_v36, %s3368_s26  ;;  %v752_v28 = vshrl.u32 %v3129_v20, 16  ;;  %v755_v29 = vshll.u32 %v3129_v20, 16  ;;  %v3177_v20 = vld [vmem:[%s3588_s21 + $0x28] ss:$0 sps:$4 sm:$0xff]  }
  0xd8   : > { %1475 = vrot.lane.b32.xlu0 %v1474_v39, %s3367_s5  ;;  %v1630_v39 = vrot.slane %v1628_v25, 1  ;;  %v952_v44 = vor.u32 %v951_v32, %v948_v31  ;;  %v3127_v25 = vld [vmem:[%s3588_s21 + $0x38] sm:$0x1e]   ;;  %v977_v31 = vshrl.u32 %v3131_v22, 16  ;;  %v3133_v32 = vld [vmem:[%s3588_s21 + $0x30] sm:$0x3e]  }
  0xd9   : > { %v1656_v43 = vshrl.u32 %v3133_v32, 16  ;;  %1051 = vst.msk [vmem:[#allocation2 + $0x18] sm:$0xf0] %vm477_vm1, %v3177_v20 }
  0xda   : > { %v1631_v52 = vor.u32 %v1630_v39, %v1626_v38  ;;  %v754_v38 = vrot.slane %v752_v28, 1  ;;  %v757_v39 = vrot.slane %v755_v29, 2  ;;  %v2596_v28 = vld [vmem:[%s3588_s21 + $0x20] sm:$0xf] }
  0xdb   : > { %1494 = vrot.lane.b32.xlu1 %v1493_v48, %s3368_s26  ;;  %v865_v48 = vrot.slane %v863_v35, 2  ;;  %v3179_v35 = vld [vmem:[#allocation6 + $0x38] sm:$0xff]   ;;  %v2768_v29 = vld [vmem:[%s3588_s21 + $0x40] sm:$0xf]  ;;  %821 = vst.msk [vmem:[#allocation2 + $0x18] sm:$0xf] %vm237_vm0, %v2596_v28 }
  0xdc   : > { %351 = vrot.lane.b32.xlu0 %v350_v53, %s3368_s26  ;;  %v1852_v53 = vrot.slane %v1850_v42, 4  ;;  %v980_v42 = vshll.u32 %v3131_v22, 16  ;;  %1725 = vst.msk [vmem:[#allocation2 + $0x38] sm:$0xf] %vm237_vm0, %v2768_v29 }
  0xdd   : > { %v866_v60 = vor.u32 %v865_v48, %v862_v40  ;;  %v3134_v40 = vld [vmem:[%s3588_s21 + $0x28] sm:$0x1f]  }
  0xde   : > { %v1856_v1 = vor.u32 %v1855_v54, %v1852_v53  ;;  %v3130_v48 = vld [vmem:[%s3588_s21 + $0x48] ss:$0 sps:$4 sm:$0xff]   ;;  %v1658_v53 = vrot.slane %v1656_v43, 1  ;;  %v891_v54 = vshrl.u32 %v3134_v40, 16  ;;  %v3141_v43 = vld [vmem:[%s3588_s21 + $0x38] ss:$0 sps:$4 sm:$0xff]  }
  0xdf   : > { %1067 = vrot.lane.b32.xlu1 %v1066_v57, %s3363_s20  ;;  %v1764_v57 = vshrl.u32 %v3122_v47, 16 }
  0xe0   : > { %1268 = vrot.lane.b32.xlu0 %v1267_v63, %s3368_s26  ;;  %v3173_v63 = vld [vmem:[#allocation6 + $0x70] sm:$0xff]  }
  0xe1   : > { %v389_v5 = vpop.permute.xlu1 %388  ;;  %2907 = vmatprep.subr.bf16.mxu0 %v3173_v63  ;;  %v1766_v4 = vrot.slane %v1764_v57, 1  ;;  %2941 = vmatprep.subr.bf16.mxu1 %v3173_v63  ;;  %v1881_v57 = vshrl.u32 %v3135_v46, 16 }
  0xe2   : > { %2908 = vmatpush3.bf16.msra.mxu0 %v3174_v11  ;;  %2949 = vmatpush3.bf16.msra.mxu1 %v3174_v11 }
  0xe3   : > { %1971 = vrot.lane.b32.xlu1 %v1970_v3, %s3363_s20  ;;  %v3121_v3 = vld [vmem:[%s3588_s21 + $0x10] sm:$0x1e]  }
  0xe4   : > { %836 = vrot.lane.b32.xlu0 %v835_v8, %s3363_s20  ;;  %v739_v12 = vrot.slane %v3121_v3, 1  ;;  %v1883_v3 = vrot.slane %v1881_v57, 5  ;;  %v3146_v57 = vld [vmem:[%s3588_s21 + $0x48] sm:$0x1e]  }
  0xe5   : > { %v628_v15 = vpop.permute.xlu1 %627 }
  0xe6   : > { %v377_v23 = vpop.permute.xlu0 %376 }
  0xe7   : > { %848 = vrot.lane.b32.xlu1 %v847_v6, %s3362_s22  ;;  %379 = vst.msk [vmem:[#allocation2 + $0x8] sm:$0xf] %vm256_vm2, %v377_v23  ;;  %v1995_v6 = vshrl.u32 %v3124_v61, 16  ;;  %v1122_v61 = vshrl.u32 %v3136_v49, 16 }
  0xe8   : > { %1740 = vrot.lane.b32.xlu0 %v1739_v17, %s3363_s20  ;;  %391 = vst.msk [vmem:[#allocation2 + $0x8] sm:$0xf] %vm269_vm3, %v389_v5  ;;  %v1769_v5 = vrot.slane %v1767_v58, 2  ;;  %v3125_v17 = vld [vmem:[%s3588_s21 + $0x30] sm:$0x1e]  }
  0xe9   : > { %v1301_v27 = vpop.permute.xlu1 %1300  ;;  %v1997_v14 = vrot.slane %v1995_v6, 5  ;;  %v1124_v6 = vrot.slane %v1122_v61, 4 }
  0xea   : > { %v616_v36 = vpop.permute.xlu0 %615  ;;  %v1770_v13 = vor.u32 %v1769_v5, %v1766_v4 }
  0xeb   : > { %1079 = vrot.lane.b32.xlu1 %v1078_v21, %s3362_s22  ;;  %618 = vst.msk [vmem:[#allocation2 + $0x8] sm:$0xf0] %vm497_vm4, %v616_v36  ;;  %v3178_v21 = vld [vmem:[#allocation6 + $0x78] sm:$0xff]  }
  0xec   : > { %728 = vrot.lane.b32.xlu0 %v727_v30, %s3363_s20  ;;  %630 = vst.msk [vmem:[#allocation2 + $0x8] sm:$0xf0] %vm510_vm5, %v628_v15  ;;  %v2000_v15 = vrot.slane %v1998_v7, 6  ;;  %2909 = vmatprep.subr.bf16.mxu0 %v3178_v21  ;;  %v1643_v30 = vrot.slane %v3125_v17, 1 }
  0xed   : > { %v1289_v41 = vpop.permute.xlu1 %1288  ;;  %2942 = vmatprep.subr.bf16.mxu1 %v3178_v21  ;;  %2910 = vmatpush3.bf16.msra.mxu0 %v3179_v35 }
  0xee   : > { %1291 = vst.msk [vmem:[#allocation2 + $0x28] sm:$0xf] %vm256_vm2, %v1289_v41  ;;  %v254_v50 = vpop.permute.xlu0 %253  ;;  %v2001_v23 = vor.u32 %v2000_v15, %v1997_v14  ;;  %v979_v41 = vrot.slane %v977_v31, 5  ;;  %2950 = vmatpush3.bf16.msra.mxu1 %v3179_v35  ;;  %v3182_v35 = vld [vmem:[%s3588_s21 + $0x38] ss:$0 sps:$4 sm:$0xff]  }
  0xef   : > { %1752 = vrot.lane.b32.xlu1 %v1751_v34, %s3362_s22  ;;  %1303 = vst.msk [vmem:[#allocation2 + $0x28] sm:$0xf] %vm269_vm3, %v1301_v27  ;;  %v3126_v27 = vld [vmem:[%s3588_s21 + $0x28] ss:$0 sps:$4 sm:$0xff]   ;;  %v1868_v34 = vrot.slane %v3127_v25, 5 }
  0xf0   : > { %257 = vst.msk [vmem:[#allocation2] sm:$0xf] %vm256_vm2, %v254_v50  ;;  %953 = vrot.lane.b32.xlu0 %v952_v44, %s3363_s20  ;;  %v1659_v44 = vshll.u32 %v3133_v32, 16  ;;  %v758_v50 = vor.u32 %v757_v39, %v754_v38  ;;  %v3181_v32 = vld [vmem:[%s3588_s21 + $0x18] ss:$0 sps:$4 sm:$0xff]  }
  0xf1   : > { %v1520_v51 = vpop.permute.xlu1 %1519  ;;  %937 = vst.msk [vmem:[#allocation2 + $0x10] sm:$0xf0] %vm477_vm1, %v3181_v32  ;;  %v3142_v39 = vld [vmem:[%s3588_s21 + $0x28] sm:$0x1e]   ;;  %1841 = vst.msk [vmem:[#allocation2 + $0x30] sm:$0xf0] %vm477_vm1, %v3182_v35 }
  0xf2   : > { %1522 = vst.msk [vmem:[#allocation2 + $0x28] sm:$0xf0] %vm497_vm4, %v1520_v51  ;;  %v495_v62 = vpop.permute.xlu0 %494  ;;  %v982_v51 = vrot.slane %v980_v42, 6  ;;  %v1661_v56 = vrot.slane %v1659_v44, 2  ;;  %v3147_v42 = vld [vmem:[%s3588_s21 + $0x20] sm:$0x1f]  }
  0xf3   : > { %1983 = vrot.lane.b32.xlu1 %v1982_v37, %s3362_s22  ;;  %498 = vst.msk [vmem:[#allocation2] sm:$0xf0] %vm497_vm4, %v495_v62  ;;  %v3128_v37 = vld [vmem:[%s3588_s21 + $0x30] ss:$0 sps:$4 sm:$0xff]  }
  0xf4   : > { %1632 = vrot.lane.b32.xlu0 %v1631_v52, %s3363_s20  ;;  %v893_v52 = vshll.u32 %v3134_v40, 16  ;;  %v983_v62 = vor.u32 %v982_v51, %v979_v41  ;;  %v1662_v7 = vor.u32 %v1661_v56, %v1658_v53  ;;  %v3149_v51 = vld [vmem:[%s3588_s21 + $0x38] sm:$0x1f]  }
  0xf5   : > { %v1532_v0 = vpop.permute.xlu1 %1531 }
  0xf6   : > { %1534 = vst.msk [vmem:[#allocation2 + $0x28] sm:$0xf0] %vm510_vm5, %v1532_v0  ;;  %v1181_v8 = vpop.permute.xlu0 %1180  ;;  %v895_v63 = vrot.slane %v893_v52, 1  ;;  %v1125_v0 = vshll.u32 %v3136_v49, 16  ;;  %v1004_v49 = vshrl.u32 %v3147_v42, 16 }
  0xf7   : > { %867 = vrot.lane.b32.xlu1 %v866_v60, %s3364_s24  ;;  %1183 = vst.msk [vmem:[#allocation2 + $0x20] sm:$0xf] %vm256_vm2, %v1181_v8  ;;  %v1884_v60 = vshll.u32 %v3135_v46, 16  ;;  %v3140_v8 = vld [vmem:[%s3588_s21 + $0x50] sm:$0x1f]  }
  0xf8   : > { %1857 = vrot.lane.b32.xlu0 %v1856_v1, %s3363_s20  ;;  %v3138_v1 = vld [vmem:[%s3588_s21 + $0x48] sm:$0x1f]   ;;  %v1127_v10 = vrot.slane %v1125_v0, 5  ;;  %v2026_v15 = vshrl.u32 %v3140_v8, 16  ;;  %v3144_v46 = vld [vmem:[%s3588_s21 + $0x30] sm:$0x1e]  }
  0xf9   : > { %v408_v9 = vpop.permute.xlu1 %407  ;;  %v1886_v5 = vrot.slane %v1884_v60, 6  ;;  %v1797_v11 = vshll.u32 %v3138_v1, 16  ;;  %v3143_v52 = vld [vmem:[%s3588_s21 + $0x40] ss:$0 sps:$4 sm:$0xff]   ;;  %v1140_v56 = vrot.slane %v3144_v46, 5  ;;  %v1006_v60 = vrot.slane %v1004_v49, 4 }
  0xfa   : > { %410 = vst.msk [vmem:[#allocation2 + $0x8] sm:$0xf] %vm289_vm6, %v408_v9  ;;  %v1406_v16 = vpop.permute.xlu0 %1405  ;;  %v896_v9 = vor.u32 %v895_v63, %v891_v54  ;;  %v1128_v17 = vor.u32 %v1127_v10, %v1124_v6  ;;  %v3175_v49 = vld [vmem:[%s3588_s21 + $0x40] sm:$0x3e]  }
  0xfb   : > { %1098 = vrot.lane.b32.xlu1 %v1097_v2, %s3364_s24  ;;  %1408 = vst.msk [vmem:[#allocation2 + $0x20] sm:$0xf0] %vm497_vm4, %v1406_v16  ;;  %v1887_v14 = vor.u32 %v1886_v5, %v1883_v3  ;;  %v2029_v16 = vshll.u32 %v3140_v8, 16  ;;  %v1812_v3 = vrot.slane %v3146_v57, 1  ;;  %v3156_v5 = vld [vmem:[%s3588_s21 + $0x30] sm:$0x3e]  }
  0xfc   : > { %740 = vrot.lane.b32.xlu0 %v739_v12, %s3362_s22 }
  0xfd   : > { %v647_v18 = vpop.permute.xlu1 %646  ;;  %v2031_v25 = vrot.slane %v2029_v16, 5  ;;  %v1153_v16 = vshrl.u32 %v3156_v5, 16 }
  0xfe   : > { %649 = vst.msk [vmem:[#allocation2 + $0x8] sm:$0xf0] %vm530_vm7, %v647_v18  ;;  %v267_v24 = vpop.permute.xlu0 %266  ;;  %v1795_v18 = vshrl.u32 %v3138_v1, 16 }
  0xff   : > { %1771 = vrot.lane.b32.xlu1 %v1770_v13, %s3364_s24  ;;  %270 = vst.msk [vmem:[#allocation2] sm:$0xf] %vm269_vm3, %v267_v24  ;;  %v2028_v24 = vrot.slane %v2026_v15, 4 }
 0x100   : > { %965 = vrot.lane.b32.xlu0 %v964_v19, %s3362_s22  ;;  %v1799_v19 = vrot.slane %v1797_v11, 1 }
 0x101   : > { %v1320_v26 = vpop.permute.xlu1 %1319  ;;  %v2032_v38 = vor.u32 %v2031_v25, %v2028_v24  ;;  %v3164_v25 = vld [vmem:[%s3588_s21 + $0x50] sm:$0x3e]  }
 0x102   : > { %1322 = vst.msk [vmem:[#allocation2 + $0x28] sm:$0xf] %vm289_vm6, %v1320_v26  ;;  %v508_v33 = vpop.permute.xlu0 %507  ;;  %v3180_v26 = vld [vmem:[%s3588_s21 + $0x48] ss:$0 sps:$4 sm:$0xff]   ;;  %v2060_v35 = vshll.u32 %v3164_v25, 16 }
 0x103   : > { %2002 = vrot.lane.b32.xlu1 %v2001_v23, %s3364_s24  ;;  %511 = vst.msk [vmem:[#allocation2] sm:$0xf0] %vm510_vm5, %v508_v33  ;;  %v3137_v23 = vld [vmem:[%s3588_s21 + $0x18] ss:$0 sps:$4 sm:$0xff]   ;;  %v2747_v33 = vld [vmem:[%s3588_s21 + $0x30] sm:$0xf] }
 0x104   : > { %1644 = vrot.lane.b32.xlu0 %v1643_v30, %s3362_s22  ;;  %v2575_v30 = vld [vmem:[%s3588_s21 + $0x10] sm:$0xf]  ;;  %1955 = vst.msk [vmem:[#allocation2 + $0x38] sm:$0xf0] %vm477_vm1, %v3180_v26  ;;  %v1155_v26 = vrot.slane %v1153_v16, 5 }
 0x105   : > { %v1551_v36 = vpop.permute.xlu1 %1550  ;;  %713 = vst.msk [vmem:[#allocation2 + $0x10] sm:$0xf] %vm237_vm0, %v2575_v30  ;;  %1617 = vst.msk [vmem:[#allocation2 + $0x30] sm:$0xf] %vm237_vm0, %v2747_v33  ;;  %v3157_v33 = vld [vmem:[%s3588_s21 + $0x18] sm:$0x1e]  }
 0x106   : > { %1553 = vst.msk [vmem:[#allocation2 + $0x28] sm:$0xf0] %vm530_vm7, %v1551_v36  ;;  %v1193_v45 = vpop.permute.xlu0 %1192  ;;  %v3139_v36 = vld [vmem:[%s3588_s21 + $0x20] ss:$0 sps:$4 sm:$0xff]  }
 0x107   : > { %879 = vrot.lane.b32.xlu1 %v3126_v27, %s3365_s11  ;;  %1195 = vst.msk [vmem:[#allocation2 + $0x20] sm:$0xf] %vm269_vm3, %v1193_v45  ;;  %v1800_v27 = vor.u32 %v1799_v19, %v1795_v18  ;;  %v908_v45 = vrot.slane %v3142_v39, 1  ;;  %v3160_v18 = vld [vmem:[%s3588_s21 + $0x48] sm:$0x3e]  }
 0x108   : > { %1869 = vrot.lane.b32.xlu0 %v1868_v34, %s3362_s22  ;;  %v1825_v28 = vshrl.u32 %v3160_v18, 16  ;;  %v1828_v29 = vshll.u32 %v3160_v18, 16  ;;  %v3171_v39 = vld [vmem:[%s3588_s21 + $0x20] sm:$0x3e]   ;;  %s3273_s22 = sshll.u32 %s3369_s15, 4  ;;  %s3274_s22 = int_to_ptr.vmem [resolvable:$false] %s3273_s22 }
 0x109   : > { %v420_v47 = vpop.permute.xlu1 %419  ;;  %s3275_s20 = scalar_lea.vmem %s3274_s22, 1024  ;;  %p3276_p3 = scmp.lt.s32.totalorder %s3974_s4, %s3274_s22 }
 0x10a   : > { %422 = vst.msk [vmem:[#allocation2 + $0x8] sm:$0xf] %vm302_vm8, %v420_v47  ;;  %v1418_v55 = vpop.permute.xlu0 %1417 }
 0x10b   : > { %1110 = vrot.lane.b32.xlu1 %v3128_v37, %s3365_s11  ;;  %1420 = vst.msk [vmem:[#allocation2 + $0x20] sm:$0xf0] %vm510_vm5, %v1418_v55  ;;  %v3145_v37 = vld [vmem:[%s3588_s21 + $0x18] sm:$0x1f]   ;;  %v3152_v55 = vld [vmem:[%s3588_s21 + $0x28] sm:$0x3e]  }
 0x10c   : > { %759 = vrot.lane.b32.xlu0 %v758_v50, %s3364_s24  ;;  %v781_v44 = vshll.u32 %v3145_v37, 16  ;;  %v1007_v50 = vshll.u32 %v3147_v42, 16  ;;  %v779_v53 = vshrl.u32 %v3145_v37, 16  ;;  %v921_v0 = vshrl.u32 %v3152_v55, 16 }
 0x10d   : > { %v659_v58 = vpop.permute.xlu1 %658  ;;  %v924_v1 = vshll.u32 %v3152_v55, 16  ;;  %v1827_v37 = vrot.slane %v1825_v28, 1  ;;  %v796_v42 = vrot.slane %v3157_v33, 1  ;;  %v3172_v55 = vld [vmem:[%s3588_s21 + $0x18] sm:$0x3e]  }
 0x10e   : > { %661 = vst.msk [vmem:[#allocation2 + $0x8] sm:$0xf0] %vm539_vm9, %v659_v58  ;;  %v287_v2 = vpop.permute.xlu0 %286  ;;  %v783_v54 = vrot.slane %v781_v44, 1  ;;  %v1009_v61 = vrot.slane %v1007_v50, 5  ;;  %v923_v11 = vrot.slane %v921_v0, 1  ;;  %v809_v0 = vshrl.u32 %v3172_v55, 16 }
 0x10f   : > { %1783 = vrot.lane.b32.xlu1 %v3130_v48, %s3365_s11  ;;  %290 = vst.msk [vmem:[#allocation2] sm:$0xf] %vm289_vm6, %v287_v2  ;;  %v3153_v2 = vld [vmem:[%s3588_s21 + $0x40] sm:$0x1f]  }
 0x110   : > { %984 = vrot.lane.b32.xlu0 %v983_v62, %s3364_s24  ;;  %v1685_v62 = vshll.u32 %v3149_v51, 16  ;;  %v784_v63 = vor.u32 %v783_v54, %v779_v53  ;;  %v1010_v8 = vor.u32 %v1009_v61, %v1006_v60  ;;  %v3165_v54 = vld [vmem:[%s3588_s21 + $0x38] sm:$0x1e]  }
 0x111   : > { %v1332_v4 = vpop.permute.xlu1 %1331 }
 0x112   : > { %1334 = vst.msk [vmem:[#allocation2 + $0x28] sm:$0xf] %vm302_vm8, %v1332_v4  ;;  %v528_v12 = vpop.permute.xlu0 %527  ;;  %v3148_v4 = vld [vmem:[%s3588_s21 + $0x50] sm:$0x1e]   ;;  %v1687_v10 = vrot.slane %v1685_v62, 1 }
 0x113   : > { %2014 = vrot.lane.b32.xlu1 %v3132_v59, %s3365_s11  ;;  %531 = vst.msk [vmem:[#allocation2] sm:$0xf0] %vm530_vm7, %v528_v12  ;;  %v926_v12 = vrot.slane %v924_v1, 2  ;;  %v2044_v15 = vrot.slane %v3148_v4, 5  ;;  %v3168_v62 = vld [vmem:[%s3588_s21 + $0x40] sm:$0x1e]  }
 0x114   : > { %1663 = vrot.lane.b32.xlu0 %v1662_v7, %s3364_s24  ;;  %v812_v1 = vshll.u32 %v3172_v55, 16 }
 0x115   : > { %v1563_v13 = vpop.permute.xlu1 %1562 }
 0x116   : > { %1565 = vst.msk [vmem:[#allocation2 + $0x28] sm:$0xf0] %vm539_vm9, %v1563_v13  ;;  %v1212_v21 = vpop.permute.xlu0 %1211  ;;  %v1908_v13 = vshrl.u32 %v3153_v2, 16 }
 0x117   : > { %897 = vrot.lane.b32.xlu1 %v896_v9, %s3366_s18  ;;  %1214 = vst.msk [vmem:[#allocation2 + $0x20] sm:$0xf] %vm289_vm6, %v1212_v21  ;;  %v1683_v9 = vshrl.u32 %v3149_v51, 16 }
 0x118   : > { %1888 = vrot.lane.b32.xlu0 %v1887_v14, %s3364_s24  ;;  %v1911_v14 = vshll.u32 %v3153_v2, 16  ;;  %v3176_v2 = vld [vmem:[%s3588_s21 + $0x38] sm:$0x3e]  }
 0x119   : > { %v438_v22 = vpop.permute.xlu1 %437  ;;  %v1688_v21 = vor.u32 %v1687_v10, %v1683_v9  ;;  %v1926_v9 = vrot.slane %v3168_v62, 5  ;;  %v811_v10 = vrot.slane %v809_v0, 1 }
 0x11a   : > { %440 = vst.msk [vmem:[#allocation2 + $0x8] sm:$0xf] %vm321_vm10, %v438_v22  ;;  %v1437_v31 = vpop.permute.xlu0 %1436  ;;  %v927_v22 = vor.u32 %v926_v12, %v923_v11  ;;  %v1913_v24 = vrot.slane %v1911_v14, 5  ;;  %v814_v11 = vrot.slane %v812_v1, 2  ;;  %v1713_v12 = vshrl.u32 %v3176_v2, 16 }
 0x11b   : > { %1129 = vrot.lane.b32.xlu1 %v1128_v17, %s3366_s18  ;;  %1439 = vst.msk [vmem:[#allocation2 + $0x20] sm:$0xf0] %vm530_vm7, %v1437_v31  ;;  %v1156_v17 = vshll.u32 %v3156_v5, 16 }
 0x11c   : > { %767 = vrot.lane.b32.xlu0 %v3137_v23, %s3365_s11  ;;  %v1910_v23 = vrot.slane %v1908_v13, 4  ;;  %v1716_v13 = vshll.u32 %v3176_v2, 16  ;;  %v1715_v18 = vrot.slane %v1713_v12, 1 }
 0x11d   : > { %v678_v34 = vpop.permute.xlu1 %677 }
 0x11e   : > { %680 = vst.msk [vmem:[#allocation2 + $0x8] sm:$0xf0] %vm559_vm11, %v678_v34  ;;  %v300_v40 = vpop.permute.xlu0 %299  ;;  %v1914_v32 = vor.u32 %v1913_v24, %v1910_v23  ;;  %v2057_v34 = vshrl.u32 %v3164_v25, 16 }
 0x11f   : > { %1801 = vrot.lane.b32.xlu1 %v1800_v27, %s3366_s18  ;;  %303 = vst.msk [vmem:[#allocation2] sm:$0xf] %vm302_vm8, %v300_v40  ;;  %v1158_v27 = vrot.slane %v1156_v17, 6  ;;  %v815_v17 = vor.u32 %v814_v11, %v811_v10 }
 0x120   : > { %992 = vrot.lane.b32.xlu0 %v3139_v36, %s3365_s11  ;;  %v2059_v44 = vrot.slane %v2057_v34, 5 }
 0x121   : > { %v1350_v41 = vpop.permute.xlu1 %1349  ;;  %v1159_v36 = vor.u32 %v1158_v27, %v1155_v26 }
 0x122   : > { %1352 = vst.msk [vmem:[#allocation2 + $0x28] sm:$0xf] %vm321_vm10, %v1350_v41  ;;  %v537_v47 = vpop.permute.xlu0 %536 }
 0x123   : > { %2033 = vrot.lane.b32.xlu1 %v2032_v38, %s3366_s18  ;;  %540 = vst.msk [vmem:[#allocation2] sm:$0xf0] %vm539_vm9, %v537_v47  ;;  %v1830_v38 = vrot.slane %v1828_v29, 2  ;;  %v1035_v47 = vshrl.u32 %v3171_v39, 16 }
 0x124   : > { %1671 = vrot.lane.b32.xlu0 %v3141_v43, %s3365_s11  ;;  %v3161_v43 = vld [vmem:[%s3588_s21 + $0x20] sm:$0x1e]   ;;  %s3269_s21 = scalar_lea.vmem %s3974_s4, 512 }
 0x125   : > { %v1582_v48 = vpop.permute.xlu1 %1581  ;;  %v1831_v46 = vor.u32 %v1830_v38, %v1827_v37  ;;  %p3270_p8 = scmp.ne.s32.totalorder %s3974_s4, %s3269_s21  ;;  %p3277_p5 = scmp.lt.s32.totalorder %s3275_s20, %s3269_s21 }
 0x126   : > { %1584 = vst.msk [vmem:[#allocation2 + $0x28] sm:$0xf0] %vm559_vm11, %v1582_v48  ;;  %v1220_v58 = vpop.permute.xlu0 %1219  ;;  %v1038_v48 = vshll.u32 %v3171_v39, 16 }
 0x127   : > { %909 = vrot.lane.b32.xlu1 %v908_v45, %s3367_s5  ;;  %1222 = vst.msk [vmem:[#allocation2 + $0x20] sm:$0xf] %vm302_vm8, %v1220_v58  ;;  %v2062_v45 = vrot.slane %v2060_v35, 6  ;;  %v1939_v58 = vshrl.u32 %v3175_v49, 16  ;;  %p3271_p1 = pnand %p3270_p8, %p4049_p12  ;;  %p3278_p9 = por %p3277_p5, %p3276_p3 }
 0x128   : > { %1896 = vrot.lane.b32.xlu0 %v3143_v52, %s3365_s11  ;;  %v1022_v52 = vrot.slane %v3161_v43, 5  ;;  %v1040_v57 = vrot.slane %v1038_v48, 6 }
 0x129   : > { %v450_v59 = vpop.permute.xlu1 %449  ;;  %v2063_v53 = vor.u32 %v2062_v45, %v2059_v44  ;;  %v1941_v4 = vrot.slane %v1939_v58, 5  ;;  %p3272_p10 = pneg %p3271_p1 }
 0x12a   : > { %452 = vst.msk [vmem:[#allocation2 + $0x8] sm:$0xf] %vm334_vm12, %v450_v59  ;;  %v1445_v6 = vpop.permute.xlu0 %1444  ;;  %v1942_v59 = vshll.u32 %v3175_v49, 16 }
 0x12b   : > { %1141 = vrot.lane.b32.xlu1 %v1140_v56, %s3367_s5  ;;  %1447 = vst.msk [vmem:[#allocation2 + $0x20] sm:$0xf0] %vm539_vm9, %v1445_v6  ;;  %v1037_v56 = vrot.slane %v1035_v47, 5  ;;  %p3279_p2 = pnand %p3278_p9, %p3272_p10 }
 0x12c   : > { %785 = vrot.lane.b32.xlu0 %v784_v63, %s3366_s18  ;;  %v1700_v63 = vrot.slane %v3165_v54, 1  ;;  %v1944_v5 = vrot.slane %v1942_v59, 6 }
 0x12d   : > { %v690_v7 = vpop.permute.xlu1 %689 }
 0x12e   : > { %692 = vst.msk [vmem:[#allocation2 + $0x8] sm:$0xf0] %vm572_vm13, %v690_v7  ;;  %v319_v19 = vpop.permute.xlu0 %318  ;;  %v1945_v14 = vor.u32 %v1944_v5, %v1941_v4 }
 0x12f   : > { %1813 = vrot.lane.b32.xlu1 %v1812_v3, %s3367_s5  ;;  %322 = vst.msk [vmem:[#allocation2] sm:$0xf] %vm321_vm10, %v319_v19  ;;  %v1041_v3 = vor.u32 %v1040_v57, %v1037_v56  ;;  %v1718_v19 = vrot.slane %v1716_v13, 2 }
 0x130   : > { %1011 = vrot.lane.b32.xlu0 %v1010_v8, %s3366_s18 }
 0x131   : > { %v1362_v20 = vpop.permute.xlu1 %1361  ;;  %v1719_v23 = vor.u32 %v1718_v19, %v1715_v18 }
 0x132   : > { %1364 = vst.msk [vmem:[#allocation2 + $0x28] sm:$0xf] %vm334_vm12, %v1362_v20  ;;  %v557_v30 = vpop.permute.xlu0 %556 }
 0x133   : > { %2045 = vrot.lane.b32.xlu1 %v2044_v15, %s3367_s5  ;;  %560 = vst.msk [vmem:[#allocation2] sm:$0xf0] %vm559_vm11, %v557_v30 }
 0x134   : > { %1689 = vrot.lane.b32.xlu0 %v1688_v21, %s3366_s18 }
 0x135   : > { %v1594_v31 = vpop.permute.xlu1 %1593 }
 0x136   : > { %1596 = vst.msk [vmem:[#allocation2 + $0x28] sm:$0xf0] %vm572_vm13, %v1594_v31  ;;  %v1238_v40 = vpop.permute.xlu0 %1237 }
 0x137   : > { %928 = vrot.lane.b32.xlu1 %v927_v22, %s3368_s26  ;;  %1240 = vst.msk [vmem:[#allocation2 + $0x20] sm:$0xf] %vm321_vm10, %v1238_v40 }
 0x138   : > { %1915 = vrot.lane.b32.xlu0 %v1914_v32, %s3366_s18 }
 0x139   : > { %v469_v41 = vpop.permute.xlu1 %468 }
 0x13a   : > { %471 = vst.msk [vmem:[#allocation2 + $0x8] sm:$0xf] %vm354_vm14, %v469_v41  ;;  %v1464_v50 = vpop.permute.xlu0 %1463 }
 0x13b   : > { %1160 = vrot.lane.b32.xlu1 %v1159_v36, %s3368_s26  ;;  %1466 = vst.msk [vmem:[#allocation2 + $0x20] sm:$0xf0] %vm559_vm11, %v1464_v50 }
 0x13c   : > { %797 = vrot.lane.b32.xlu0 %v796_v42, %s3367_s5 }
 0x13d   : > { %v709_v51 = vpop.permute.xlu1 %708 }
 0x13e   : > { %711 = vst.msk [vmem:[#allocation2 + $0x8] sm:$0xf0] %vm592_vm15, %v709_v51  ;;  %v332_v60 = vpop.permute.xlu0 %331 }
 0x13f   : > { %1832 = vrot.lane.b32.xlu1 %v1831_v46, %s3368_s26  ;;  %335 = vst.msk [vmem:[#allocation2] sm:$0xf] %vm334_vm12, %v332_v60 }
 0x140   : > { %1023 = vrot.lane.b32.xlu0 %v1022_v52, %s3367_s5 }
 0x141   : > { %v1381_v61 = vpop.permute.xlu1 %1380 }
 0x142   : > { %1383 = vst.msk [vmem:[#allocation2 + $0x28] sm:$0xf] %vm354_vm14, %v1381_v61  ;;  %v570_v6 = vpop.permute.xlu0 %569 }
 0x143   : > { %2064 = vrot.lane.b32.xlu1 %v2063_v53, %s3368_s26  ;;  %573 = vst.msk [vmem:[#allocation2] sm:$0xf0] %vm572_vm13, %v570_v6 }
 0x144   : > { %1701 = vrot.lane.b32.xlu0 %v1700_v63, %s3367_s5 }
 0x145   : > { %v1613_v7 = vpop.permute.xlu1 %1612  ;;  %v2069_v8 = vld [vmem:[#allocation2 + $0x8] sm:$0xff] }
 0x146   : > { %1615 = vst.msk [vmem:[#allocation2 + $0x28] sm:$0xf0] %vm592_vm15, %v1613_v7  ;;  %2243 = vmatprep.mubr.bf16.mxu0 %v2069_v8  ;;  %v1250_v15 = vpop.permute.xlu0 %1249 }
 0x147   : > { %1042 = vrot.lane.b32.xlu1 %v1041_v3, %s3368_s26  ;;  %1252 = vst.msk [vmem:[#allocation2 + $0x20] sm:$0xf] %vm334_vm12, %v1250_v15 }
 0x148   : > { %1927 = vrot.lane.b32.xlu0 %v1926_v9, %s3367_s5 }
 0x149   : > { %v590_v16 = vpop.permute.xlu1 %589 }
 0x14a   : > { %593 = vst.msk [vmem:[#allocation2] sm:$0xf0] %vm592_vm15, %v590_v16  ;;  %v1476_v20 = vpop.permute.xlu0 %1475 }
 0x14b   : > { %1946 = vrot.lane.b32.xlu1 %v1945_v14, %s3368_s26  ;;  %1478 = vst.msk [vmem:[#allocation2 + $0x20] sm:$0xf0] %vm572_vm13, %v1476_v20 }
 0x14c   : > { %816 = vrot.lane.b32.xlu0 %v815_v17, %s3368_s26 }
 0x14d   : > { %v1495_v21 = vpop.permute.xlu1 %1494  ;;  %v2073_v22 = vld [vmem:[#allocation2 + $0x28] sm:$0xff] }
 0x14e   : > { %1497 = vst.msk [vmem:[#allocation2 + $0x20] sm:$0xf0] %vm592_vm15, %v1495_v21  ;;  %2259 = vmatprep.mubr.bf16.mxu1 %v2073_v22  ;;  %v352_v24 = vpop.permute.xlu0 %351 }
 0x14f   : > { %355 = vst.msk [vmem:[#allocation2] sm:$0xf] %vm354_vm14, %v352_v24 }
 0x150   : > { %1720 = vrot.lane.b32.xlu0 %v1719_v23, %s3368_s26 }
 0x151   : > { %v1068_v25 = vpop.permute.xlu1 %1067 }
 0x152   : > { %1070 = vst.msk [vmem:[#allocation2 + $0x18] sm:$0xf0] %vm497_vm4, %v1068_v25  ;;  %v1269_v26 = vpop.permute.xlu0 %1268  ;;  %v2833_v25 = vld [vmem:[#allocation8] ss:$0 sm:$0xff] }
 0x153   : > { %1271 = vst.msk [vmem:[#allocation2 + $0x20] sm:$0xf] %vm354_vm14, %v1269_v26 }
 0x155   : > { %v1972_v27 = vpop.permute.xlu1 %1971 }
 0x156   : > { %1974 = vst.msk [vmem:[#allocation2 + $0x38] sm:$0xf0] %vm497_vm4, %v1972_v27  ;;  %v837_v28 = vpop.permute.xlu0 %836  ;;  %v2068_v29 = vld [vmem:[#allocation2] sm:$0xff] }
 0x157   : > { %839 = vst.msk [vmem:[#allocation2 + $0x18] sm:$0xf] %vm256_vm2, %v837_v28  ;;  %2244 = vmatmul.mubr.bf16.vlgmr.msra.gmra.mrb[0].mxu0 %v2068_v29 }
 0x159   : > { %v849_v30 = vpop.permute.xlu1 %848 }
 0x15a   : > { %851 = vst.msk [vmem:[#allocation2 + $0x18] sm:$0xf] %vm269_vm3, %v849_v30  ;;  %v1741_v31 = vpop.permute.xlu0 %1740  ;;  %v2072_v32 = vld [vmem:[#allocation2 + $0x20] sm:$0xff] }
 0x15b   : > { %1743 = vst.msk [vmem:[#allocation2 + $0x38] sm:$0xf] %vm256_vm2, %v1741_v31  ;;  %2260 = vmatmul.mubr.bf16.vlgmr.msra.gmra.mrb[0].mxu1 %v2072_v32 }
 0x15d   : > { %v1080_v33 = vpop.permute.xlu1 %1079 }
 0x15e   : > { %1082 = vst.msk [vmem:[#allocation2 + $0x18] sm:$0xf0] %vm510_vm5, %v1080_v33  ;;  %v729_v34 = vpop.permute.xlu0 %728 }
 0x15f   : > { %731 = vst.msk [vmem:[#allocation2 + $0x10] sm:$0xf] %vm256_vm2, %v729_v34 }
 0x161   : > { %v1753_v35 = vpop.permute.xlu1 %1752 }
 0x162   : > { %1755 = vst.msk [vmem:[#allocation2 + $0x38] sm:$0xf] %vm269_vm3, %v1753_v35  ;;  %v954_v36 = vpop.permute.xlu0 %953 }
 0x163   : > { %956 = vst.msk [vmem:[#allocation2 + $0x10] sm:$0xf0] %vm497_vm4, %v954_v36 }
 0x165   : > { %v1984_v37 = vpop.permute.xlu1 %1983 }
 0x166   : > { %1986 = vst.msk [vmem:[#allocation2 + $0x38] sm:$0xf0] %vm510_vm5, %v1984_v37  ;;  %v1633_v38 = vpop.permute.xlu0 %1632 }
 0x167   : > { %1635 = vst.msk [vmem:[#allocation2 + $0x30] sm:$0xf] %vm256_vm2, %v1633_v38 }
 0x169   : > { %v868_v39 = vpop.permute.xlu1 %867 }
 0x16a   : > { %870 = vst.msk [vmem:[#allocation2 + $0x18] sm:$0xf] %vm289_vm6, %v868_v39  ;;  %v1858_v40 = vpop.permute.xlu0 %1857 }
 0x16b   : > { %1860 = vst.msk [vmem:[#allocation2 + $0x30] sm:$0xf0] %vm497_vm4, %v1858_v40 }
 0x16d   : > { %v1099_v41 = vpop.permute.xlu1 %1098 }
 0x16e   : > { %1101 = vst.msk [vmem:[#allocation2 + $0x18] sm:$0xf0] %vm530_vm7, %v1099_v41  ;;  %v741_v42 = vpop.permute.xlu0 %740 }
 0x16f   : > { %743 = vst.msk [vmem:[#allocation2 + $0x10] sm:$0xf] %vm269_vm3, %v741_v42 }
 0x171   : > { %v1772_v43 = vpop.permute.xlu1 %1771 }
 0x172   : > { %1774 = vst.msk [vmem:[#allocation2 + $0x38] sm:$0xf] %vm289_vm6, %v1772_v43  ;;  %v966_v44 = vpop.permute.xlu0 %965 }
 0x173   : > { %968 = vst.msk [vmem:[#allocation2 + $0x10] sm:$0xf0] %vm510_vm5, %v966_v44 }
 0x175   : > { %v2003_v45 = vpop.permute.xlu1 %2002 }
 0x176   : > { %2005 = vst.msk [vmem:[#allocation2 + $0x38] sm:$0xf0] %vm530_vm7, %v2003_v45  ;;  %v1645_v46 = vpop.permute.xlu0 %1644 }
 0x177   : > { %1647 = vst.msk [vmem:[#allocation2 + $0x30] sm:$0xf] %vm269_vm3, %v1645_v46 }
 0x179   : > { %v880_v47 = vpop.permute.xlu1 %879 }
 0x17a   : > { %882 = vst.msk [vmem:[#allocation2 + $0x18] sm:$0xf] %vm302_vm8, %v880_v47  ;;  %v1870_v48 = vpop.permute.xlu0 %1869 }
 0x17b   : > { %1872 = vst.msk [vmem:[#allocation2 + $0x30] sm:$0xf0] %vm510_vm5, %v1870_v48 }
 0x17d   : > { %v1111_v49 = vpop.permute.xlu1 %1110 }
 0x17e   : > { %1113 = vst.msk [vmem:[#allocation2 + $0x18] sm:$0xf0] %vm539_vm9, %v1111_v49  ;;  %v760_v50 = vpop.permute.xlu0 %759 }
 0x17f   : > { %762 = vst.msk [vmem:[#allocation2 + $0x10] sm:$0xf] %vm289_vm6, %v760_v50 }
 0x181   : > { %v1784_v51 = vpop.permute.xlu1 %1783 }
 0x182   : > { %1786 = vst.msk [vmem:[#allocation2 + $0x38] sm:$0xf] %vm302_vm8, %v1784_v51  ;;  %v985_v52 = vpop.permute.xlu0 %984 }
 0x183   : > { %987 = vst.msk [vmem:[#allocation2 + $0x10] sm:$0xf0] %vm530_vm7, %v985_v52 }
 0x185   : > { %v2015_v53 = vpop.permute.xlu1 %2014 }
 0x186   : > { %2017 = vst.msk [vmem:[#allocation2 + $0x38] sm:$0xf0] %vm539_vm9, %v2015_v53  ;;  %v1664_v54 = vpop.permute.xlu0 %1663 }
 0x187   : > { %1666 = vst.msk [vmem:[#allocation2 + $0x30] sm:$0xf] %vm289_vm6, %v1664_v54 }
 0x189   : > { %v898_v55 = vpop.permute.xlu1 %897 }
 0x18a   : > { %900 = vst.msk [vmem:[#allocation2 + $0x18] sm:$0xf] %vm321_vm10, %v898_v55  ;;  %v1889_v56 = vpop.permute.xlu0 %1888 }
 0x18b   : > { %1891 = vst.msk [vmem:[#allocation2 + $0x30] sm:$0xf0] %vm530_vm7, %v1889_v56 }
 0x18d   : > { %v1130_v57 = vpop.permute.xlu1 %1129 }
 0x18e   : > { %1132 = vst.msk [vmem:[#allocation2 + $0x18] sm:$0xf0] %vm559_vm11, %v1130_v57  ;;  %v768_v58 = vpop.permute.xlu0 %767 }
 0x18f   : > { %770 = vst.msk [vmem:[#allocation2 + $0x10] sm:$0xf] %vm302_vm8, %v768_v58 }
 0x191   : > { %v1802_v59 = vpop.permute.xlu1 %1801 }
 0x192   : > { %1804 = vst.msk [vmem:[#allocation2 + $0x38] sm:$0xf] %vm321_vm10, %v1802_v59  ;;  %v993_v60 = vpop.permute.xlu0 %992 }
 0x193   : > { %995 = vst.msk [vmem:[#allocation2 + $0x10] sm:$0xf0] %vm539_vm9, %v993_v60 }
 0x195   : > { %v2034_v61 = vpop.permute.xlu1 %2033 }
 0x196   : > { %2036 = vst.msk [vmem:[#allocation2 + $0x38] sm:$0xf0] %vm559_vm11, %v2034_v61  ;;  %v1672_v62 = vpop.permute.xlu0 %1671 }
 0x197   : > { %1674 = vst.msk [vmem:[#allocation2 + $0x30] sm:$0xf] %vm302_vm8, %v1672_v62 }
 0x199   : > { %v910_v63 = vpop.permute.xlu1 %909 }
 0x19a   : > { %912 = vst.msk [vmem:[#allocation2 + $0x18] sm:$0xf] %vm334_vm12, %v910_v63  ;;  %v1897_v0 = vpop.permute.xlu0 %1896 }
 0x19b   : > { %1899 = vst.msk [vmem:[#allocation2 + $0x30] sm:$0xf0] %vm539_vm9, %v1897_v0 }
 0x19d   : > { %v1142_v1 = vpop.permute.xlu1 %1141 }
 0x19e   : > { %1144 = vst.msk [vmem:[#allocation2 + $0x18] sm:$0xf0] %vm572_vm13, %v1142_v1  ;;  %v786_v2 = vpop.permute.xlu0 %785 }
 0x19f   : > { %788 = vst.msk [vmem:[#allocation2 + $0x10] sm:$0xf] %vm321_vm10, %v786_v2 }
 0x1a1   : > { %v1814_v3 = vpop.permute.xlu1 %1813 }
 0x1a2   : > { %1816 = vst.msk [vmem:[#allocation2 + $0x38] sm:$0xf] %vm334_vm12, %v1814_v3  ;;  %v1012_v4 = vpop.permute.xlu0 %1011 }
 0x1a3   : > { %1014 = vst.msk [vmem:[#allocation2 + $0x10] sm:$0xf0] %vm559_vm11, %v1012_v4 }
 0x1a5   : > { %v2046_v5 = vpop.permute.xlu1 %2045 }
 0x1a6   : > { %2048 = vst.msk [vmem:[#allocation2 + $0x38] sm:$0xf0] %vm572_vm13, %v2046_v5  ;;  %v1690_v6 = vpop.permute.xlu0 %1689 }
 0x1a7   : > { %1692 = vst.msk [vmem:[#allocation2 + $0x30] sm:$0xf] %vm321_vm10, %v1690_v6 }
 0x1a9   : > { %v929_v7 = vpop.permute.xlu1 %928 }
 0x1aa   : > { %931 = vst.msk [vmem:[#allocation2 + $0x18] sm:$0xf] %vm354_vm14, %v929_v7  ;;  %v1916_v8 = vpop.permute.xlu0 %1915 }
 0x1ab   : > { %1918 = vst.msk [vmem:[#allocation2 + $0x30] sm:$0xf0] %vm559_vm11, %v1916_v8 }
 0x1ad   : > { %v1161_v9 = vpop.permute.xlu1 %1160 }
 0x1ae   : > { %1163 = vst.msk [vmem:[#allocation2 + $0x18] sm:$0xf0] %vm592_vm15, %v1161_v9  ;;  %v798_v10 = vpop.permute.xlu0 %797 }
 0x1af   : > { %800 = vst.msk [vmem:[#allocation2 + $0x10] sm:$0xf] %vm334_vm12, %v798_v10 }
 0x1b1   : > { %v1833_v11 = vpop.permute.xlu1 %1832 }
 0x1b2   : > { %1835 = vst.msk [vmem:[#allocation2 + $0x38] sm:$0xf] %vm354_vm14, %v1833_v11  ;;  %v1024_v12 = vpop.permute.xlu0 %1023 }
 0x1b3   : > { %1026 = vst.msk [vmem:[#allocation2 + $0x10] sm:$0xf0] %vm572_vm13, %v1024_v12 }
 0x1b5   : > { %v2065_v13 = vpop.permute.xlu1 %2064  ;;  %v2071_v14 = vld [vmem:[#allocation2 + $0x18] sm:$0xff] }
 0x1b6   : > { %2067 = vst.msk [vmem:[#allocation2 + $0x38] sm:$0xf0] %vm592_vm15, %v2065_v13  ;;  %2251 = vmatprep.mubr.bf16.mxu0 %v2071_v14  ;;  %v1702_v15 = vpop.permute.xlu0 %1701 }
 0x1b7   : > { %1704 = vst.msk [vmem:[#allocation2 + $0x30] sm:$0xf] %vm334_vm12, %v1702_v15 }
 0x1b9   : > { %v1043_v16 = vpop.permute.xlu1 %1042 }
 0x1ba   : > { %1045 = vst.msk [vmem:[#allocation2 + $0x10] sm:$0xf0] %vm592_vm15, %v1043_v16  ;;  %v1928_v17 = vpop.permute.xlu0 %1927 }
 0x1bb   : > { %1930 = vst.msk [vmem:[#allocation2 + $0x30] sm:$0xf0] %vm572_vm13, %v1928_v17 }
 0x1bd   : > { %v2075_v18 = vld [vmem:[#allocation2 + $0x38] sm:$0xff]  ;;  %v1947_v19 = vpop.permute.xlu1 %1946 }
 0x1be   : > { %2267 = vmatprep.mubr.bf16.mxu1 %v2075_v18  ;;  %1949 = vst.msk [vmem:[#allocation2 + $0x30] sm:$0xf0] %vm592_vm15, %v1947_v19  ;;  %v817_v20 = vpop.permute.xlu0 %816 }
 0x1bf   : > { %819 = vst.msk [vmem:[#allocation2 + $0x10] sm:$0xf] %vm354_vm14, %v817_v20 }
 0x1c2   : > { %v1721_v21 = vpop.permute.xlu0 %1720 }
 0x1c3   : > { %1723 = vst.msk [vmem:[#allocation2 + $0x30] sm:$0xf] %vm354_vm14, %v1721_v21 }
 0x1c6   : > { %v2070_v22 = vld [vmem:[#allocation2 + $0x10] sm:$0xff] }
 0x1c7   : > { %2252 = vmatmul.mubr.bf16.gmra.mrb[4].mxu0 %v2070_v22 }
 0x1ca   : > { %v2074_v23 = vld [vmem:[#allocation2 + $0x30] sm:$0xff] }
 0x1cb   : > { %2268 = vmatmul.mubr.bf16.gmra.mrb[4].mxu1 %v2074_v23 }
 0x22a   : > { %v2911_v24 = vpop.f32.mrb[0].mxu0 }
 0x22b   : > { %v2912_v26 = vpop.f32.mrb[1].mxu0 }
 0x22c   : > { %v2913_v27 = vadd.f32 %v2912_v26, %v2911_v24  ;;  %v2914_v28 = vpop.f32.mrb[2].mxu0 }
 0x22d   : > { %v2915_v29 = vpop.f32.mrb[3].mxu0 }
 0x22e   : > { %v2246_v30 = vadd.f32 %v2913_v27, %v2833_v25  ;;  %v2916_v31 = vadd.f32 %v2915_v29, %v2914_v28  ;;  %v2923_v32 = vpop.f32.mrb[0].mxu1 }
 0x22f   : > { %v2924_v33 = vpop.f32.mrb[1].mxu1 }
 0x230   : > { %v2249_v34 = vadd.f32 %v2916_v31, %v2833_v25  ;;  %v2925_v35 = vadd.f32 %v2924_v33, %v2923_v32  ;;  %v2926_v36 = vpop.f32.mrb[2].mxu1  ;;  %v2276_v38 = vmax.f32 %v2246_v30, 0.0 }
 0x231   : > { %v2927_v37 = vpop.f32.mrb[3].mxu1 }
 0x232   : > { %v2277_v39 = vmax.f32 %v2249_v34, 0.0  ;;  %v2262_v40 = vadd.f32 %v2925_v35, %v2833_v25  ;;  %v2928_v41 = vadd.f32 %v2927_v37, %v2926_v36 }
 0x234   : > { %v2875_v42 = vpack.c.bf16 %v2277_v39, %v2276_v38  ;;  %v2265_v43 = vadd.f32 %v2928_v41, %v2833_v25  ;;  %v2280_v44 = vmax.f32 %v2262_v40, 0.0 }
 0x236   : > { %2876 = vst [vmem:[%s3967_s19] sm:$0xff] %v2875_v42   ;;  %v2281_v45 = vmax.f32 %v2265_v43, 0.0 }
 0x238   : > { %v2885_v46 = vpack.c.bf16 %v2281_v45, %v2280_v44 }
 0x23a   : > { %2893 = vst [vmem:[%s3967_s19 + $0x10] sm:$0xff] %v2885_v46  }
 0x29a   : > { %v2917_v47 = vpop.f32.mrb[4].mxu0 }
 0x29b   : > { %v2918_v48 = vpop.f32.mrb[5].mxu0 }
 0x29c   : > { %v2919_v49 = vadd.f32 %v2918_v48, %v2917_v47  ;;  %v2920_v50 = vpop.f32.mrb[6].mxu0 }
 0x29d   : > { %v2921_v51 = vpop.f32.mrb[7].mxu0 }
 0x29e   : > { %v2254_v52 = vadd.f32 %v2919_v49, %v2833_v25  ;;  %v2922_v53 = vadd.f32 %v2921_v51, %v2920_v50  ;;  %v2929_v54 = vpop.f32.mrb[4].mxu1 }
 0x29f   : > { %v2930_v55 = vpop.f32.mrb[5].mxu1 }
 0x2a0   : > { %v2257_v56 = vadd.f32 %v2922_v53, %v2833_v25  ;;  %v2931_v57 = vadd.f32 %v2930_v55, %v2929_v54  ;;  %v2932_v58 = vpop.f32.mrb[6].mxu1  ;;  %v2278_v60 = vmax.f32 %v2254_v52, 0.0 }
 0x2a1   : > { %v2933_v59 = vpop.f32.mrb[7].mxu1 }
 0x2a2   : > { %v2279_v61 = vmax.f32 %v2257_v56, 0.0  ;;  %v2270_v62 = vadd.f32 %v2931_v57, %v2833_v25  ;;  %v2934_v63 = vadd.f32 %v2933_v59, %v2932_v58 }
 0x2a4   : > { %v2880_v0 = vpack.c.bf16 %v2279_v61, %v2278_v60  ;;  %v2273_v1 = vadd.f32 %v2934_v63, %v2833_v25  ;;  %v2282_v2 = vmax.f32 %v2270_v62, 0.0 }
 0x2a6   : > { %2892 = vst [vmem:[%s3967_s19 + $0x8] sm:$0xff] %v2880_v0   ;;  %v2283_v3 = vmax.f32 %v2273_v1, 0.0 }
 0x2a8   : > { %v2890_v4 = vpack.c.bf16 %v2283_v3, %v2282_v2 }
 0x2aa   : > { %2894 = vst [vmem:[%s3967_s19 + $0x18] sm:$0xff] %v2890_v4  }
 0x2ab   : > { %3282 = shalt.err (!%p3279_p2)
}
 0x2ac   : > { %s3283_s24 = scalar_lea.hbm %s3979_s7, 512  ;;  %s3287_s26 = scalar_lea.hbm %s4034_s3, 1024 }
 0x2ad   : > { %p3284_p0 = scmp.ne.s32.totalorder %s3979_s7, %s3283_s24  ;;  %p3288_p6 = scmp.lt.u32.totalorder %s3979_s7, %s4034_s3 }
 0x2ae   : > { %p3289_p7 = scmp.lt.u32.totalorder %s3287_s26, %s3283_s24  ;;  %p3291_p8 = scmp.lt.u32.totalorder %s3283_s24, %s3979_s7 }
 0x2af   : > { %p3285_p4 = pnand %p3284_p0, %p4049_p12 }
 0x2b0   : > { %p3290_p11 = por %p3289_p7, %p3288_p6 }
 0x2b1   : > { %p3286_p13 = pneg %p3285_p4 }
 0x2b2   : > { %p3292_p1 = por %p3291_p8, %p3290_p11 }
 0x2b4   : > { %p3293_p10 = pnand %p3292_p1, %p3286_p13 }
 0x2b6   : > { %3296 = shalt.err (!%p3293_p10)
}
 0x2b7   : > { %s3370_s9 = smov 4  }
 0x2b8   : > { %2964 = dma.vmem_to_hbm [thread:$0]  (%p4049_p12), %s3974_s4, 512, %s3979_s7, %s2325_s8, %s3365_s11, %s3365_s11, %s3370_s9  }
 0x2b9 PF: > { %s2355_s28 = sand.u32 1, %s3335_s12   ;;  %p4050_p3 = scmp.ne.s32.totalorder %s4042_s23, 0 }
 0x2ba   : > { %p4051_p5 = scmp.ge.s32.totalorder %s3355_s17, 2  ;;  %s2356_s29 = scalar_lea.sflag [#allocation5], %s2355_s28 }
 0x2bc   : > { %p2978_p9 = pnand %p4051_p5, %p4050_p3 }
 0x2be   : > { %3330 = dma.done.wait (!%p2978_p9), %s2356_s29, 512  }
 0x2bf   : > { %3332 = vsyncadd (!%p2978_p9), %s2356_s29, 4294966784  ;;  %s20_s17 = sadd.s32 1, %s3355_s17   ;;  %s4052_s12 = smov %s3339_s13 }
 0x2c0   : > { %p17_p2 = scmp.ge.s32.totalorder %s20_s17, 4   ;;  %s4053_s13 = smov %s3343_s14 }
 0x2c1   : > { %s4054_s14 = smov %s3540_s6  ;;  %s4055_s15 = smov %s3351_s16 }
 0x2c2   : > { %s4056_s16 = smov %s4058_s25  ;;  %19 = sbr.rel (!%p17_p2) target bundleno = 7 (0x7), region = 96 }
 0x2c9   :  { %2361 = vsyncpa [#allocation4], 1 }
 0x2ca   :  { %2363 = vsyncpa [#allocation4 + $0x1], 1 }
 0x2cb   :  { %2364 = vsyncpa [#allocation7], 1 }
 0x2cc   :  { %2365 = vsyncpa [#allocation5], 1 }
 0x2cd   :  { %2367 = vsyncpa [#allocation5 + $0x1], 1 }

</bundles_post_ra>
